<compile_context>
chip_gen: v7x
topology: tpu7x:2x2x1
jax: 0.10.0
libtpu: 0.0.40
codegen_flags: <defaults>
</compile_context>

<pallas_src>
import functools

import jax
import jax.numpy as jnp
from jax.experimental import pallas as pl
from jax.experimental.pallas import tpu as pltpu

# ---- config stand-ins (config.nSamplesconfi, config.primNum, ...) ----------
N_SAMPLES = 512      # config.nSamplesconfi
PRIM_NUM = 8         # config.primNum
CELL_GT_SIZE = 32    # config.cellGTSize  (unused in forward)
CELL_DAN = 0.05      # config.celldan     (unused in forward)
LARGE = 1e8          # "unused primitive" fill value for the min-composition

_PARAMS_PER_PRIM = 16   # 9 (R^T rows) + 3 (trans) + 3 (shape) + 1 (inUse)


def _part_composition_kernel(P, prm_ref, pts_ref, out_ref):
    """One grid step = (Bt batch rows) x (St samples).

    prm_ref : VMEM (Bt, P*16)  packed per-primitive params
              layout per primitive p (base = 16*p):
                [0:9)  rows of R^T (row-major)
                [9:12) translation
                [12:15) cuboid half-extents
                [15]   inUse mask
    pts_ref : VMEM (3, Bt, St) sample points (xyz leading, batch on sublanes,
              samples on lanes)
    out_ref : VMEM (Bt, St)    composed squared TSDF
    """
    px = pts_ref[0]            # (Bt, St)
    py = pts_ref[1]
    pz = pts_ref[2]

    min_tsdf = jnp.full(px.shape, LARGE, dtype=jnp.float32)

    for p in range(P):         # P is small & static -> unrolled VPU loop
        base = _PARAMS_PER_PRIM * p

        def col(k, base=base):
            # (Bt, 1) per-batch column, broadcasts against the (Bt, St) slabs
            return prm_ref[:, base + k:base + k + 1]

        # --- transform points into the primitive's local frame: R^T (p - t) ---
        dx = px - col(9)
        dy = py - col(10)
        dz = pz - col(11)

        lx = col(0) * dx + col(1) * dy + col(2) * dz
        ly = col(3) * dx + col(4) * dy + col(5) * dz
        lz = col(6) * dx + col(7) * dy + col(8) * dz

        # --- squared TSDF to the cuboid [-s, s]^3 ---
        ex = jnp.maximum(jnp.abs(lx) - col(12), 0.0)
        ey = jnp.maximum(jnp.abs(ly) - col(13), 0.0)
        ez = jnp.maximum(jnp.abs(lz) - col(14), 0.0)
        tsdf_p = ex * ex + ey * ey + ez * ez

        # --- mask unused primitives (single select) and compose with min ---
        tsdf_p = jnp.where(col(15) > 0.5, tsdf_p, LARGE)
        min_tsdf = jnp.minimum(min_tsdf, tsdf_p)

    out_ref[...] = min_tsdf


def consistency_loss_forward(shape_rlt, trans_rlt, quat_rlt, batch_sample_point,
                             in_use):
    """JAX/Pallas equivalent of ConsistencyLoss.forward.

    shape_rlt          : (B, P, 3) f32
    trans_rlt          : (B, P, 3) f32
    quat_rlt           : (B, P, 4) f32
    batch_sample_point : (B, S, 3) f32   (the unsqueeze/expand over P is implicit)
    in_use             : (B, P)    f32
    returns (tsdfOut, tsdfGT), each (B, S) f32
    """
    B, S, _ = batch_sample_point.shape
    P = shape_rlt.shape[1]

    # ---- hoisted per-primitive scalar work (over (B, P) only: tiny) ----------
    q = quat_rlt / jnp.sqrt(
        jnp.sum(quat_rlt * quat_rlt, axis=-1, keepdims=True) + 1e-12)
    w, x, y, z = q[..., 0], q[..., 1], q[..., 2], q[..., 3]        # (B, P)
    # rows of R^T, row-major, so that local = R^T (p - t)
    rt = jnp.stack([
        1.0 - 2.0 * (y * y + z * z), 2.0 * (x * y + w * z), 2.0 * (x * z - w * y),
        2.0 * (x * y - w * z), 1.0 - 2.0 * (x * x + z * z), 2.0 * (y * z + w * x),
        2.0 * (x * z + w * y), 2.0 * (y * z - w * x), 1.0 - 2.0 * (x * x + y * y),
    ], axis=-1)                                                    # (B, P, 9)
    params = jnp.concatenate(
        [rt, trans_rlt, shape_rlt, in_use[..., None]], axis=-1)    # (B, P, 16)
    params = params.reshape(B, P * _PARAMS_PER_PRIM).astype(jnp.float32)

    # (B, S, 3) -> (3, B, S).  Ideally the producer emits this layout directly;
    # kept here only because the module's input convention is (B, S, 3).
    pts = jnp.transpose(batch_sample_point, (2, 0, 1)).astype(jnp.float32)

    # ---- tile choices -------------------------------------------------------
    Bt = 8 if (B % 8 == 0) else B          # sublane-dense batch fold
    St = S
    if S > 2048:                           # bound the lane tile for big S
        for cand in (2048, 1024, 512, 256, 128):
            if S % cand == 0:
                St = cand
                break

    kernel = functools.partial(_part_composition_kernel, P)

    tsdf_out = pl.pallas_call(
        kernel,
        out_shape=jax.ShapeDtypeStruct((B, S), jnp.float32),
        grid_spec=pltpu.PrefetchScalarGridSpec(
            num_scalar_prefetch=0,
            grid=(B // Bt, S // St),
            in_specs=[
                pl.BlockSpec((Bt, P * _PARAMS_PER_PRIM), lambda i, j: (i, 0)),
                pl.BlockSpec((3, Bt, St), lambda i, j: (0, i, j)),
            ],
            out_specs=pl.BlockSpec((Bt, St), lambda i, j: (i, j)),
        ),
        compiler_params=pltpu.CompilerParams(
            dimension_semantics=("parallel", "parallel")),
    )(params, pts)

    # TODO(synk): tsdfGT should come from the cellGTSize/celldan GT-grid lookup
    # of the original tf.partComposition; surface-sample convention (zeros) is
    # used instead and is produced in the wrapper (no kernel output needed).
    tsdf_gt = jnp.zeros_like(tsdf_out)
    return tsdf_out, tsdf_gt


def _reference(shape_rlt, trans_rlt, quat_rlt, pts, in_use):
    """Pure-JAX reference for correctness checking."""
    q = quat_rlt / jnp.sqrt(
        jnp.sum(quat_rlt * quat_rlt, axis=-1, keepdims=True) + 1e-12)
    w, x, y, z = q[..., 0], q[..., 1], q[..., 2], q[..., 3]      # (B, P)
    R = jnp.stack([
        jnp.stack([1 - 2 * (y * y + z * z), 2 * (x * y - w * z), 2 * (x * z + w * y)], -1),
        jnp.stack([2 * (x * y + w * z), 1 - 2 * (x * x + z * z), 2 * (y * z - w * x)], -1),
        jnp.stack([2 * (x * z - w * y), 2 * (y * z + w * x), 1 - 2 * (x * x + y * y)], -1),
    ], -2)                                                        # (B, P, 3, 3)
    d = pts[:, None, :, :] - trans_rlt[:, :, None, :]             # (B, P, S, 3)
    local = jnp.einsum('bpji,bpsj->bpsi', R, d)                   # R^T d
    e = jnp.maximum(jnp.abs(local) - shape_rlt[:, :, None, :], 0.0)
    tsdf = jnp.sum(e * e, axis=-1)                                # (B, P, S)
    u = in_use[:, :, None]
    tsdf = tsdf * u + (1.0 - u) * LARGE
    out = jnp.min(tsdf, axis=1)                                   # (B, S)
    return out, jnp.zeros_like(out)


if __name__ == "__main__":
    key = jax.random.PRNGKey(0)
    k1, k2, k3, k4, k5 = jax.random.split(key, 5)

    B, P, S = 8, PRIM_NUM, N_SAMPLES
    shape_rlt = jax.random.uniform(k1, (B, P, 3), jnp.float32, 0.1, 0.4)
    trans_rlt = jax.random.uniform(k2, (B, P, 3), jnp.float32, -0.5, 0.5)
    quat_rlt = jax.random.normal(k3, (B, P, 4), jnp.float32)
    batch_sample_point = jax.random.uniform(k4, (B, S, 3), jnp.float32, -1.0, 1.0)
    in_use = (jax.random.uniform(k5, (B, P)) > 0.3).astype(jnp.float32)
    in_use = in_use.at[:, 0].set(1.0)   # guarantee at least one active primitive

    tsdf_out, tsdf_gt = consistency_loss_forward(
        shape_rlt, trans_rlt, quat_rlt, batch_sample_point, in_use)
    jax.block_until_ready((tsdf_out, tsdf_gt))

    ref_out, ref_gt = _reference(shape_rlt, trans_rlt, quat_rlt,
                                 batch_sample_point, in_use)
    assert tsdf_out.shape == (B, S) and tsdf_gt.shape == (B, S)
    assert jnp.allclose(tsdf_out, ref_out, atol=1e-4, rtol=1e-4), "tsdfOut mismatch"
    assert jnp.allclose(tsdf_gt, ref_gt), "tsdfGT mismatch"

    print("KERNEL_OK")
</pallas_src>

<mosaic_0001>
module attributes {stable_mosaic.version = 11 : i64} {
  func.func @_part_composition_kernel(%arg0: i32, %arg1: i32, %arg2: memref<8x128xf32, #tpu.memory_space<vmem>>, %arg3: memref<3x8x512xf32, #tpu.memory_space<vmem>>, %arg4: memref<8x512xf32, #tpu.memory_space<vmem>>) attributes {dimension_semantics = [#tpu.dimension_semantics<parallel>, #tpu.dimension_semantics<parallel>], iteration_bounds = array<i64: 1, 1>, scalar_prefetch = 0 : i64, scratch_operands = 0 : i64, tpu.core_type = #tpu.core_type<tc>, window_params = [{transform_indices = @transform_0, window_bounds = array<i64: 8, 128>}, {transform_indices = @transform_1, window_bounds = array<i64: 3, 8, 512>}, {transform_indices = @transform_2, window_bounds = array<i64: 8, 512>}]} {
    %c0 = arith.constant 0 : index
    %c0_0 = arith.constant 0 : index
    %c0_1 = arith.constant 0 : index
    %0 = vector.load %arg3[%c0, %c0_0, %c0_1] : memref<3x8x512xf32, #tpu.memory_space<vmem>>, vector<1x8x512xf32>
    %1 = vector.shape_cast %0 : vector<1x8x512xf32> to vector<8x512xf32>
    %c1 = arith.constant 1 : index
    %c0_2 = arith.constant 0 : index
    %c0_3 = arith.constant 0 : index
    %2 = vector.load %arg3[%c1, %c0_2, %c0_3] : memref<3x8x512xf32, #tpu.memory_space<vmem>>, vector<1x8x512xf32>
    %3 = vector.shape_cast %2 : vector<1x8x512xf32> to vector<8x512xf32>
    %c2 = arith.constant 2 : index
    %c0_4 = arith.constant 0 : index
    %c0_5 = arith.constant 0 : index
    %4 = vector.load %arg3[%c2, %c0_4, %c0_5] : memref<3x8x512xf32, #tpu.memory_space<vmem>>, vector<1x8x512xf32>
    %5 = vector.shape_cast %4 : vector<1x8x512xf32> to vector<8x512xf32>
    %cst = arith.constant 1.000000e+08 : f32
    %6 = vector.broadcast %cst : f32 to vector<8x512xf32>
    %c0_6 = arith.constant 0 : index
    %c9 = arith.constant 9 : index
    %7 = vector.load %arg2[%c0_6, %c9] : memref<8x128xf32, #tpu.memory_space<vmem>>, vector<8x1xf32>
    %8 = vector.broadcast %7 : vector<8x1xf32> to vector<8x512xf32>
    %9 = arith.subf %1, %8 : vector<8x512xf32>
    %c0_7 = arith.constant 0 : index
    %c10 = arith.constant 10 : index
    %10 = vector.load %arg2[%c0_7, %c10] : memref<8x128xf32, #tpu.memory_space<vmem>>, vector<8x1xf32>
    %11 = vector.broadcast %10 : vector<8x1xf32> to vector<8x512xf32>
    %12 = arith.subf %3, %11 : vector<8x512xf32>
    %c0_8 = arith.constant 0 : index
    %c11 = arith.constant 11 : index
    %13 = vector.load %arg2[%c0_8, %c11] : memref<8x128xf32, #tpu.memory_space<vmem>>, vector<8x1xf32>
    %14 = vector.broadcast %13 : vector<8x1xf32> to vector<8x512xf32>
    %15 = arith.subf %5, %14 : vector<8x512xf32>
    %c0_9 = arith.constant 0 : index
    %c0_10 = arith.constant 0 : index
    %16 = vector.load %arg2[%c0_9, %c0_10] : memref<8x128xf32, #tpu.memory_space<vmem>>, vector<8x1xf32>
    %17 = vector.broadcast %16 : vector<8x1xf32> to vector<8x512xf32>
    %18 = arith.mulf %17, %9 : vector<8x512xf32>
    %c0_11 = arith.constant 0 : index
    %c1_12 = arith.constant 1 : index
    %19 = vector.load %arg2[%c0_11, %c1_12] : memref<8x128xf32, #tpu.memory_space<vmem>>, vector<8x1xf32>
    %20 = vector.broadcast %19 : vector<8x1xf32> to vector<8x512xf32>
    %21 = arith.mulf %20, %12 : vector<8x512xf32>
    %22 = arith.addf %18, %21 : vector<8x512xf32>
    %c0_13 = arith.constant 0 : index
    %c2_14 = arith.constant 2 : index
    %23 = vector.load %arg2[%c0_13, %c2_14] : memref<8x128xf32, #tpu.memory_space<vmem>>, vector<8x1xf32>
    %24 = vector.broadcast %23 : vector<8x1xf32> to vector<8x512xf32>
    %25 = arith.mulf %24, %15 : vector<8x512xf32>
    %26 = arith.addf %22, %25 : vector<8x512xf32>
    %c0_15 = arith.constant 0 : index
    %c3 = arith.constant 3 : index
    %27 = vector.load %arg2[%c0_15, %c3] : memref<8x128xf32, #tpu.memory_space<vmem>>, vector<8x1xf32>
    %28 = vector.broadcast %27 : vector<8x1xf32> to vector<8x512xf32>
    %29 = arith.mulf %28, %9 : vector<8x512xf32>
    %c0_16 = arith.constant 0 : index
    %c4 = arith.constant 4 : index
    %30 = vector.load %arg2[%c0_16, %c4] : memref<8x128xf32, #tpu.memory_space<vmem>>, vector<8x1xf32>
    %31 = vector.broadcast %30 : vector<8x1xf32> to vector<8x512xf32>
    %32 = arith.mulf %31, %12 : vector<8x512xf32>
    %33 = arith.addf %29, %32 : vector<8x512xf32>
    %c0_17 = arith.constant 0 : index
    %c5 = arith.constant 5 : index
    %34 = vector.load %arg2[%c0_17, %c5] : memref<8x128xf32, #tpu.memory_space<vmem>>, vector<8x1xf32>
    %35 = vector.broadcast %34 : vector<8x1xf32> to vector<8x512xf32>
    %36 = arith.mulf %35, %15 : vector<8x512xf32>
    %37 = arith.addf %33, %36 : vector<8x512xf32>
    %c0_18 = arith.constant 0 : index
    %c6 = arith.constant 6 : index
    %38 = vector.load %arg2[%c0_18, %c6] : memref<8x128xf32, #tpu.memory_space<vmem>>, vector<8x1xf32>
    %39 = vector.broadcast %38 : vector<8x1xf32> to vector<8x512xf32>
    %40 = arith.mulf %39, %9 : vector<8x512xf32>
    %c0_19 = arith.constant 0 : index
    %c7 = arith.constant 7 : index
    %41 = vector.load %arg2[%c0_19, %c7] : memref<8x128xf32, #tpu.memory_space<vmem>>, vector<8x1xf32>
    %42 = vector.broadcast %41 : vector<8x1xf32> to vector<8x512xf32>
    %43 = arith.mulf %42, %12 : vector<8x512xf32>
    %44 = arith.addf %40, %43 : vector<8x512xf32>
    %c0_20 = arith.constant 0 : index
    %c8 = arith.constant 8 : index
    %45 = vector.load %arg2[%c0_20, %c8] : memref<8x128xf32, #tpu.memory_space<vmem>>, vector<8x1xf32>
    %46 = vector.broadcast %45 : vector<8x1xf32> to vector<8x512xf32>
    %47 = arith.mulf %46, %15 : vector<8x512xf32>
    %48 = arith.addf %44, %47 : vector<8x512xf32>
    %49 = math.absf %26 : vector<8x512xf32>
    %c0_21 = arith.constant 0 : index
    %c12 = arith.constant 12 : index
    %50 = vector.load %arg2[%c0_21, %c12] : memref<8x128xf32, #tpu.memory_space<vmem>>, vector<8x1xf32>
    %51 = vector.broadcast %50 : vector<8x1xf32> to vector<8x512xf32>
    %52 = arith.subf %49, %51 : vector<8x512xf32>
    %cst_22 = arith.constant 0.000000e+00 : f32
    %53 = vector.broadcast %cst_22 : f32 to vector<8x512xf32>
    %54 = arith.maximumf %52, %53 : vector<8x512xf32>
    %55 = math.absf %37 : vector<8x512xf32>
    %c0_23 = arith.constant 0 : index
    %c13 = arith.constant 13 : index
    %56 = vector.load %arg2[%c0_23, %c13] : memref<8x128xf32, #tpu.memory_space<vmem>>, vector<8x1xf32>
    %57 = vector.broadcast %56 : vector<8x1xf32> to vector<8x512xf32>
    %58 = arith.subf %55, %57 : vector<8x512xf32>
    %cst_24 = arith.constant 0.000000e+00 : f32
    %59 = vector.broadcast %cst_24 : f32 to vector<8x512xf32>
    %60 = arith.maximumf %58, %59 : vector<8x512xf32>
    %61 = math.absf %48 : vector<8x512xf32>
    %c0_25 = arith.constant 0 : index
    %c14 = arith.constant 14 : index
    %62 = vector.load %arg2[%c0_25, %c14] : memref<8x128xf32, #tpu.memory_space<vmem>>, vector<8x1xf32>
    %63 = vector.broadcast %62 : vector<8x1xf32> to vector<8x512xf32>
    %64 = arith.subf %61, %63 : vector<8x512xf32>
    %cst_26 = arith.constant 0.000000e+00 : f32
    %65 = vector.broadcast %cst_26 : f32 to vector<8x512xf32>
    %66 = arith.maximumf %64, %65 : vector<8x512xf32>
    %67 = arith.mulf %54, %54 : vector<8x512xf32>
    %68 = arith.mulf %60, %60 : vector<8x512xf32>
    %69 = arith.addf %67, %68 : vector<8x512xf32>
    %70 = arith.mulf %66, %66 : vector<8x512xf32>
    %71 = arith.addf %69, %70 : vector<8x512xf32>
    %c0_27 = arith.constant 0 : index
    %c15 = arith.constant 15 : index
    %72 = vector.load %arg2[%c0_27, %c15] : memref<8x128xf32, #tpu.memory_space<vmem>>, vector<8x1xf32>
    %cst_28 = arith.constant 5.000000e-01 : f32
    %73 = vector.broadcast %cst_28 : f32 to vector<8x1xf32>
    %74 = arith.cmpf ogt, %72, %73 : vector<8x1xf32>
    %cst_29 = arith.constant 1.000000e+08 : f32
    %75 = vector.shape_cast %74 : vector<8x1xi1> to vector<8x1xi1>
    %76 = vector.broadcast %75 : vector<8x1xi1> to vector<8x512xi1>
    %77 = vector.broadcast %cst_29 : f32 to vector<8x512xf32>
    %78 = arith.select %76, %71, %77 : vector<8x512xi1>, vector<8x512xf32>
    %79 = arith.minimumf %6, %78 : vector<8x512xf32>
    %c0_30 = arith.constant 0 : index
    %c25 = arith.constant 25 : index
    %80 = vector.load %arg2[%c0_30, %c25] : memref<8x128xf32, #tpu.memory_space<vmem>>, vector<8x1xf32>
    %81 = vector.broadcast %80 : vector<8x1xf32> to vector<8x512xf32>
    %82 = arith.subf %1, %81 : vector<8x512xf32>
    %c0_31 = arith.constant 0 : index
    %c26 = arith.constant 26 : index
    %83 = vector.load %arg2[%c0_31, %c26] : memref<8x128xf32, #tpu.memory_space<vmem>>, vector<8x1xf32>
    %84 = vector.broadcast %83 : vector<8x1xf32> to vector<8x512xf32>
    %85 = arith.subf %3, %84 : vector<8x512xf32>
    %c0_32 = arith.constant 0 : index
    %c27 = arith.constant 27 : index
    %86 = vector.load %arg2[%c0_32, %c27] : memref<8x128xf32, #tpu.memory_space<vmem>>, vector<8x1xf32>
    %87 = vector.broadcast %86 : vector<8x1xf32> to vector<8x512xf32>
    %88 = arith.subf %5, %87 : vector<8x512xf32>
    %c0_33 = arith.constant 0 : index
    %c16 = arith.constant 16 : index
    %89 = vector.load %arg2[%c0_33, %c16] : memref<8x128xf32, #tpu.memory_space<vmem>>, vector<8x1xf32>
    %90 = vector.broadcast %89 : vector<8x1xf32> to vector<8x512xf32>
    %91 = arith.mulf %90, %82 : vector<8x512xf32>
    %c0_34 = arith.constant 0 : index
    %c17 = arith.constant 17 : index
    %92 = vector.load %arg2[%c0_34, %c17] : memref<8x128xf32, #tpu.memory_space<vmem>>, vector<8x1xf32>
    %93 = vector.broadcast %92 : vector<8x1xf32> to vector<8x512xf32>
    %94 = arith.mulf %93, %85 : vector<8x512xf32>
    %95 = arith.addf %91, %94 : vector<8x512xf32>
    %c0_35 = arith.constant 0 : index
    %c18 = arith.constant 18 : index
    %96 = vector.load %arg2[%c0_35, %c18] : memref<8x128xf32, #tpu.memory_space<vmem>>, vector<8x1xf32>
    %97 = vector.broadcast %96 : vector<8x1xf32> to vector<8x512xf32>
    %98 = arith.mulf %97, %88 : vector<8x512xf32>
    %99 = arith.addf %95, %98 : vector<8x512xf32>
    %c0_36 = arith.constant 0 : index
    %c19 = arith.constant 19 : index
    %100 = vector.load %arg2[%c0_36, %c19] : memref<8x128xf32, #tpu.memory_space<vmem>>, vector<8x1xf32>
    %101 = vector.broadcast %100 : vector<8x1xf32> to vector<8x512xf32>
    %102 = arith.mulf %101, %82 : vector<8x512xf32>
    %c0_37 = arith.constant 0 : index
    %c20 = arith.constant 20 : index
    %103 = vector.load %arg2[%c0_37, %c20] : memref<8x128xf32, #tpu.memory_space<vmem>>, vector<8x1xf32>
    %104 = vector.broadcast %103 : vector<8x1xf32> to vector<8x512xf32>
    %105 = arith.mulf %104, %85 : vector<8x512xf32>
    %106 = arith.addf %102, %105 : vector<8x512xf32>
    %c0_38 = arith.constant 0 : index
    %c21 = arith.constant 21 : index
    %107 = vector.load %arg2[%c0_38, %c21] : memref<8x128xf32, #tpu.memory_space<vmem>>, vector<8x1xf32>
    %108 = vector.broadcast %107 : vector<8x1xf32> to vector<8x512xf32>
    %109 = arith.mulf %108, %88 : vector<8x512xf32>
    %110 = arith.addf %106, %109 : vector<8x512xf32>
    %c0_39 = arith.constant 0 : index
    %c22 = arith.constant 22 : index
    %111 = vector.load %arg2[%c0_39, %c22] : memref<8x128xf32, #tpu.memory_space<vmem>>, vector<8x1xf32>
    %112 = vector.broadcast %111 : vector<8x1xf32> to vector<8x512xf32>
    %113 = arith.mulf %112, %82 : vector<8x512xf32>
    %c0_40 = arith.constant 0 : index
    %c23 = arith.constant 23 : index
    %114 = vector.load %arg2[%c0_40, %c23] : memref<8x128xf32, #tpu.memory_space<vmem>>, vector<8x1xf32>
    %115 = vector.broadcast %114 : vector<8x1xf32> to vector<8x512xf32>
    %116 = arith.mulf %115, %85 : vector<8x512xf32>
    %117 = arith.addf %113, %116 : vector<8x512xf32>
    %c0_41 = arith.constant 0 : index
    %c24 = arith.constant 24 : index
    %118 = vector.load %arg2[%c0_41, %c24] : memref<8x128xf32, #tpu.memory_space<vmem>>, vector<8x1xf32>
    %119 = vector.broadcast %118 : vector<8x1xf32> to vector<8x512xf32>
    %120 = arith.mulf %119, %88 : vector<8x512xf32>
    %121 = arith.addf %117, %120 : vector<8x512xf32>
    %122 = math.absf %99 : vector<8x512xf32>
    %c0_42 = arith.constant 0 : index
    %c28 = arith.constant 28 : index
    %123 = vector.load %arg2[%c0_42, %c28] : memref<8x128xf32, #tpu.memory_space<vmem>>, vector<8x1xf32>
    %124 = vector.broadcast %123 : vector<8x1xf32> to vector<8x512xf32>
    %125 = arith.subf %122, %124 : vector<8x512xf32>
    %cst_43 = arith.constant 0.000000e+00 : f32
    %126 = vector.broadcast %cst_43 : f32 to vector<8x512xf32>
    %127 = arith.maximumf %125, %126 : vector<8x512xf32>
    %128 = math.absf %110 : vector<8x512xf32>
    %c0_44 = arith.constant 0 : index
    %c29 = arith.constant 29 : index
    %129 = vector.load %arg2[%c0_44, %c29] : memref<8x128xf32, #tpu.memory_space<vmem>>, vector<8x1xf32>
    %130 = vector.broadcast %129 : vector<8x1xf32> to vector<8x512xf32>
    %131 = arith.subf %128, %130 : vector<8x512xf32>
    %cst_45 = arith.constant 0.000000e+00 : f32
    %132 = vector.broadcast %cst_45 : f32 to vector<8x512xf32>
    %133 = arith.maximumf %131, %132 : vector<8x512xf32>
    %134 = math.absf %121 : vector<8x512xf32>
    %c0_46 = arith.constant 0 : index
    %c30 = arith.constant 30 : index
    %135 = vector.load %arg2[%c0_46, %c30] : memref<8x128xf32, #tpu.memory_space<vmem>>, vector<8x1xf32>
    %136 = vector.broadcast %135 : vector<8x1xf32> to vector<8x512xf32>
    %137 = arith.subf %134, %136 : vector<8x512xf32>
    %cst_47 = arith.constant 0.000000e+00 : f32
    %138 = vector.broadcast %cst_47 : f32 to vector<8x512xf32>
    %139 = arith.maximumf %137, %138 : vector<8x512xf32>
    %140 = arith.mulf %127, %127 : vector<8x512xf32>
    %141 = arith.mulf %133, %133 : vector<8x512xf32>
    %142 = arith.addf %140, %141 : vector<8x512xf32>
    %143 = arith.mulf %139, %139 : vector<8x512xf32>
    %144 = arith.addf %142, %143 : vector<8x512xf32>
    %c0_48 = arith.constant 0 : index
    %c31 = arith.constant 31 : index
    %145 = vector.load %arg2[%c0_48, %c31] : memref<8x128xf32, #tpu.memory_space<vmem>>, vector<8x1xf32>
    %cst_49 = arith.constant 5.000000e-01 : f32
    %146 = vector.broadcast %cst_49 : f32 to vector<8x1xf32>
    %147 = arith.cmpf ogt, %145, %146 : vector<8x1xf32>
    %cst_50 = arith.constant 1.000000e+08 : f32
    %148 = vector.shape_cast %147 : vector<8x1xi1> to vector<8x1xi1>
    %149 = vector.broadcast %148 : vector<8x1xi1> to vector<8x512xi1>
    %150 = vector.broadcast %cst_50 : f32 to vector<8x512xf32>
    %151 = arith.select %149, %144, %150 : vector<8x512xi1>, vector<8x512xf32>
    %152 = arith.minimumf %79, %151 : vector<8x512xf32>
    %c0_51 = arith.constant 0 : index
    %c41 = arith.constant 41 : index
    %153 = vector.load %arg2[%c0_51, %c41] : memref<8x128xf32, #tpu.memory_space<vmem>>, vector<8x1xf32>
    %154 = vector.broadcast %153 : vector<8x1xf32> to vector<8x512xf32>
    %155 = arith.subf %1, %154 : vector<8x512xf32>
    %c0_52 = arith.constant 0 : index
    %c42 = arith.constant 42 : index
    %156 = vector.load %arg2[%c0_52, %c42] : memref<8x128xf32, #tpu.memory_space<vmem>>, vector<8x1xf32>
    %157 = vector.broadcast %156 : vector<8x1xf32> to vector<8x512xf32>
    %158 = arith.subf %3, %157 : vector<8x512xf32>
    %c0_53 = arith.constant 0 : index
    %c43 = arith.constant 43 : index
    %159 = vector.load %arg2[%c0_53, %c43] : memref<8x128xf32, #tpu.memory_space<vmem>>, vector<8x1xf32>
    %160 = vector.broadcast %159 : vector<8x1xf32> to vector<8x512xf32>
    %161 = arith.subf %5, %160 : vector<8x512xf32>
    %c0_54 = arith.constant 0 : index
    %c32 = arith.constant 32 : index
    %162 = vector.load %arg2[%c0_54, %c32] : memref<8x128xf32, #tpu.memory_space<vmem>>, vector<8x1xf32>
    %163 = vector.broadcast %162 : vector<8x1xf32> to vector<8x512xf32>
    %164 = arith.mulf %163, %155 : vector<8x512xf32>
    %c0_55 = arith.constant 0 : index
    %c33 = arith.constant 33 : index
    %165 = vector.load %arg2[%c0_55, %c33] : memref<8x128xf32, #tpu.memory_space<vmem>>, vector<8x1xf32>
    %166 = vector.broadcast %165 : vector<8x1xf32> to vector<8x512xf32>
    %167 = arith.mulf %166, %158 : vector<8x512xf32>
    %168 = arith.addf %164, %167 : vector<8x512xf32>
    %c0_56 = arith.constant 0 : index
    %c34 = arith.constant 34 : index
    %169 = vector.load %arg2[%c0_56, %c34] : memref<8x128xf32, #tpu.memory_space<vmem>>, vector<8x1xf32>
    %170 = vector.broadcast %169 : vector<8x1xf32> to vector<8x512xf32>
    %171 = arith.mulf %170, %161 : vector<8x512xf32>
    %172 = arith.addf %168, %171 : vector<8x512xf32>
    %c0_57 = arith.constant 0 : index
    %c35 = arith.constant 35 : index
    %173 = vector.load %arg2[%c0_57, %c35] : memref<8x128xf32, #tpu.memory_space<vmem>>, vector<8x1xf32>
    %174 = vector.broadcast %173 : vector<8x1xf32> to vector<8x512xf32>
    %175 = arith.mulf %174, %155 : vector<8x512xf32>
    %c0_58 = arith.constant 0 : index
    %c36 = arith.constant 36 : index
    %176 = vector.load %arg2[%c0_58, %c36] : memref<8x128xf32, #tpu.memory_space<vmem>>, vector<8x1xf32>
    %177 = vector.broadcast %176 : vector<8x1xf32> to vector<8x512xf32>
    %178 = arith.mulf %177, %158 : vector<8x512xf32>
    %179 = arith.addf %175, %178 : vector<8x512xf32>
    %c0_59 = arith.constant 0 : index
    %c37 = arith.constant 37 : index
    %180 = vector.load %arg2[%c0_59, %c37] : memref<8x128xf32, #tpu.memory_space<vmem>>, vector<8x1xf32>
    %181 = vector.broadcast %180 : vector<8x1xf32> to vector<8x512xf32>
    %182 = arith.mulf %181, %161 : vector<8x512xf32>
    %183 = arith.addf %179, %182 : vector<8x512xf32>
    %c0_60 = arith.constant 0 : index
    %c38 = arith.constant 38 : index
    %184 = vector.load %arg2[%c0_60, %c38] : memref<8x128xf32, #tpu.memory_space<vmem>>, vector<8x1xf32>
    %185 = vector.broadcast %184 : vector<8x1xf32> to vector<8x512xf32>
    %186 = arith.mulf %185, %155 : vector<8x512xf32>
    %c0_61 = arith.constant 0 : index
    %c39 = arith.constant 39 : index
    %187 = vector.load %arg2[%c0_61, %c39] : memref<8x128xf32, #tpu.memory_space<vmem>>, vector<8x1xf32>
    %188 = vector.broadcast %187 : vector<8x1xf32> to vector<8x512xf32>
    %189 = arith.mulf %188, %158 : vector<8x512xf32>
    %190 = arith.addf %186, %189 : vector<8x512xf32>
    %c0_62 = arith.constant 0 : index
    %c40 = arith.constant 40 : index
    %191 = vector.load %arg2[%c0_62, %c40] : memref<8x128xf32, #tpu.memory_space<vmem>>, vector<8x1xf32>
    %192 = vector.broadcast %191 : vector<8x1xf32> to vector<8x512xf32>
    %193 = arith.mulf %192, %161 : vector<8x512xf32>
    %194 = arith.addf %190, %193 : vector<8x512xf32>
    %195 = math.absf %172 : vector<8x512xf32>
    %c0_63 = arith.constant 0 : index
    %c44 = arith.constant 44 : index
    %196 = vector.load %arg2[%c0_63, %c44] : memref<8x128xf32, #tpu.memory_space<vmem>>, vector<8x1xf32>
    %197 = vector.broadcast %196 : vector<8x1xf32> to vector<8x512xf32>
    %198 = arith.subf %195, %197 : vector<8x512xf32>
    %cst_64 = arith.constant 0.000000e+00 : f32
    %199 = vector.broadcast %cst_64 : f32 to vector<8x512xf32>
    %200 = arith.maximumf %198, %199 : vector<8x512xf32>
    %201 = math.absf %183 : vector<8x512xf32>
    %c0_65 = arith.constant 0 : index
    %c45 = arith.constant 45 : index
    %202 = vector.load %arg2[%c0_65, %c45] : memref<8x128xf32, #tpu.memory_space<vmem>>, vector<8x1xf32>
    %203 = vector.broadcast %202 : vector<8x1xf32> to vector<8x512xf32>
    %204 = arith.subf %201, %203 : vector<8x512xf32>
    %cst_66 = arith.constant 0.000000e+00 : f32
    %205 = vector.broadcast %cst_66 : f32 to vector<8x512xf32>
    %206 = arith.maximumf %204, %205 : vector<8x512xf32>
    %207 = math.absf %194 : vector<8x512xf32>
    %c0_67 = arith.constant 0 : index
    %c46 = arith.constant 46 : index
    %208 = vector.load %arg2[%c0_67, %c46] : memref<8x128xf32, #tpu.memory_space<vmem>>, vector<8x1xf32>
    %209 = vector.broadcast %208 : vector<8x1xf32> to vector<8x512xf32>
    %210 = arith.subf %207, %209 : vector<8x512xf32>
    %cst_68 = arith.constant 0.000000e+00 : f32
    %211 = vector.broadcast %cst_68 : f32 to vector<8x512xf32>
    %212 = arith.maximumf %210, %211 : vector<8x512xf32>
    %213 = arith.mulf %200, %200 : vector<8x512xf32>
    %214 = arith.mulf %206, %206 : vector<8x512xf32>
    %215 = arith.addf %213, %214 : vector<8x512xf32>
    %216 = arith.mulf %212, %212 : vector<8x512xf32>
    %217 = arith.addf %215, %216 : vector<8x512xf32>
    %c0_69 = arith.constant 0 : index
    %c47 = arith.constant 47 : index
    %218 = vector.load %arg2[%c0_69, %c47] : memref<8x128xf32, #tpu.memory_space<vmem>>, vector<8x1xf32>
    %cst_70 = arith.constant 5.000000e-01 : f32
    %219 = vector.broadcast %cst_70 : f32 to vector<8x1xf32>
    %220 = arith.cmpf ogt, %218, %219 : vector<8x1xf32>
    %cst_71 = arith.constant 1.000000e+08 : f32
    %221 = vector.shape_cast %220 : vector<8x1xi1> to vector<8x1xi1>
    %222 = vector.broadcast %221 : vector<8x1xi1> to vector<8x512xi1>
    %223 = vector.broadcast %cst_71 : f32 to vector<8x512xf32>
    %224 = arith.select %222, %217, %223 : vector<8x512xi1>, vector<8x512xf32>
    %225 = arith.minimumf %152, %224 : vector<8x512xf32>
    %c0_72 = arith.constant 0 : index
    %c57 = arith.constant 57 : index
    %226 = vector.load %arg2[%c0_72, %c57] : memref<8x128xf32, #tpu.memory_space<vmem>>, vector<8x1xf32>
    %227 = vector.broadcast %226 : vector<8x1xf32> to vector<8x512xf32>
    %228 = arith.subf %1, %227 : vector<8x512xf32>
    %c0_73 = arith.constant 0 : index
    %c58 = arith.constant 58 : index
    %229 = vector.load %arg2[%c0_73, %c58] : memref<8x128xf32, #tpu.memory_space<vmem>>, vector<8x1xf32>
    %230 = vector.broadcast %229 : vector<8x1xf32> to vector<8x512xf32>
    %231 = arith.subf %3, %230 : vector<8x512xf32>
    %c0_74 = arith.constant 0 : index
    %c59 = arith.constant 59 : index
    %232 = vector.load %arg2[%c0_74, %c59] : memref<8x128xf32, #tpu.memory_space<vmem>>, vector<8x1xf32>
    %233 = vector.broadcast %232 : vector<8x1xf32> to vector<8x512xf32>
    %234 = arith.subf %5, %233 : vector<8x512xf32>
    %c0_75 = arith.constant 0 : index
    %c48 = arith.constant 48 : index
    %235 = vector.load %arg2[%c0_75, %c48] : memref<8x128xf32, #tpu.memory_space<vmem>>, vector<8x1xf32>
    %236 = vector.broadcast %235 : vector<8x1xf32> to vector<8x512xf32>
    %237 = arith.mulf %236, %228 : vector<8x512xf32>
    %c0_76 = arith.constant 0 : index
    %c49 = arith.constant 49 : index
    %238 = vector.load %arg2[%c0_76, %c49] : memref<8x128xf32, #tpu.memory_space<vmem>>, vector<8x1xf32>
    %239 = vector.broadcast %238 : vector<8x1xf32> to vector<8x512xf32>
    %240 = arith.mulf %239, %231 : vector<8x512xf32>
    %241 = arith.addf %237, %240 : vector<8x512xf32>
    %c0_77 = arith.constant 0 : index
    %c50 = arith.constant 50 : index
    %242 = vector.load %arg2[%c0_77, %c50] : memref<8x128xf32, #tpu.memory_space<vmem>>, vector<8x1xf32>
    %243 = vector.broadcast %242 : vector<8x1xf32> to vector<8x512xf32>
    %244 = arith.mulf %243, %234 : vector<8x512xf32>
    %245 = arith.addf %241, %244 : vector<8x512xf32>
    %c0_78 = arith.constant 0 : index
    %c51 = arith.constant 51 : index
    %246 = vector.load %arg2[%c0_78, %c51] : memref<8x128xf32, #tpu.memory_space<vmem>>, vector<8x1xf32>
    %247 = vector.broadcast %246 : vector<8x1xf32> to vector<8x512xf32>
    %248 = arith.mulf %247, %228 : vector<8x512xf32>
    %c0_79 = arith.constant 0 : index
    %c52 = arith.constant 52 : index
    %249 = vector.load %arg2[%c0_79, %c52] : memref<8x128xf32, #tpu.memory_space<vmem>>, vector<8x1xf32>
    %250 = vector.broadcast %249 : vector<8x1xf32> to vector<8x512xf32>
    %251 = arith.mulf %250, %231 : vector<8x512xf32>
    %252 = arith.addf %248, %251 : vector<8x512xf32>
    %c0_80 = arith.constant 0 : index
    %c53 = arith.constant 53 : index
    %253 = vector.load %arg2[%c0_80, %c53] : memref<8x128xf32, #tpu.memory_space<vmem>>, vector<8x1xf32>
    %254 = vector.broadcast %253 : vector<8x1xf32> to vector<8x512xf32>
    %255 = arith.mulf %254, %234 : vector<8x512xf32>
    %256 = arith.addf %252, %255 : vector<8x512xf32>
    %c0_81 = arith.constant 0 : index
    %c54 = arith.constant 54 : index
    %257 = vector.load %arg2[%c0_81, %c54] : memref<8x128xf32, #tpu.memory_space<vmem>>, vector<8x1xf32>
    %258 = vector.broadcast %257 : vector<8x1xf32> to vector<8x512xf32>
    %259 = arith.mulf %258, %228 : vector<8x512xf32>
    %c0_82 = arith.constant 0 : index
    %c55 = arith.constant 55 : index
    %260 = vector.load %arg2[%c0_82, %c55] : memref<8x128xf32, #tpu.memory_space<vmem>>, vector<8x1xf32>
    %261 = vector.broadcast %260 : vector<8x1xf32> to vector<8x512xf32>
    %262 = arith.mulf %261, %231 : vector<8x512xf32>
    %263 = arith.addf %259, %262 : vector<8x512xf32>
    %c0_83 = arith.constant 0 : index
    %c56 = arith.constant 56 : index
    %264 = vector.load %arg2[%c0_83, %c56] : memref<8x128xf32, #tpu.memory_space<vmem>>, vector<8x1xf32>
    %265 = vector.broadcast %264 : vector<8x1xf32> to vector<8x512xf32>
    %266 = arith.mulf %265, %234 : vector<8x512xf32>
    %267 = arith.addf %263, %266 : vector<8x512xf32>
    %268 = math.absf %245 : vector<8x512xf32>
    %c0_84 = arith.constant 0 : index
    %c60 = arith.constant 60 : index
    %269 = vector.load %arg2[%c0_84, %c60] : memref<8x128xf32, #tpu.memory_space<vmem>>, vector<8x1xf32>
    %270 = vector.broadcast %269 : vector<8x1xf32> to vector<8x512xf32>
    %271 = arith.subf %268, %270 : vector<8x512xf32>
    %cst_85 = arith.constant 0.000000e+00 : f32
    %272 = vector.broadcast %cst_85 : f32 to vector<8x512xf32>
    %273 = arith.maximumf %271, %272 : vector<8x512xf32>
    %274 = math.absf %256 : vector<8x512xf32>
    %c0_86 = arith.constant 0 : index
    %c61 = arith.constant 61 : index
    %275 = vector.load %arg2[%c0_86, %c61] : memref<8x128xf32, #tpu.memory_space<vmem>>, vector<8x1xf32>
    %276 = vector.broadcast %275 : vector<8x1xf32> to vector<8x512xf32>
    %277 = arith.subf %274, %276 : vector<8x512xf32>
    %cst_87 = arith.constant 0.000000e+00 : f32
    %278 = vector.broadcast %cst_87 : f32 to vector<8x512xf32>
    %279 = arith.maximumf %277, %278 : vector<8x512xf32>
    %280 = math.absf %267 : vector<8x512xf32>
    %c0_88 = arith.constant 0 : index
    %c62 = arith.constant 62 : index
    %281 = vector.load %arg2[%c0_88, %c62] : memref<8x128xf32, #tpu.memory_space<vmem>>, vector<8x1xf32>
    %282 = vector.broadcast %281 : vector<8x1xf32> to vector<8x512xf32>
    %283 = arith.subf %280, %282 : vector<8x512xf32>
    %cst_89 = arith.constant 0.000000e+00 : f32
    %284 = vector.broadcast %cst_89 : f32 to vector<8x512xf32>
    %285 = arith.maximumf %283, %284 : vector<8x512xf32>
    %286 = arith.mulf %273, %273 : vector<8x512xf32>
    %287 = arith.mulf %279, %279 : vector<8x512xf32>
    %288 = arith.addf %286, %287 : vector<8x512xf32>
    %289 = arith.mulf %285, %285 : vector<8x512xf32>
    %290 = arith.addf %288, %289 : vector<8x512xf32>
    %c0_90 = arith.constant 0 : index
    %c63 = arith.constant 63 : index
    %291 = vector.load %arg2[%c0_90, %c63] : memref<8x128xf32, #tpu.memory_space<vmem>>, vector<8x1xf32>
    %cst_91 = arith.constant 5.000000e-01 : f32
    %292 = vector.broadcast %cst_91 : f32 to vector<8x1xf32>
    %293 = arith.cmpf ogt, %291, %292 : vector<8x1xf32>
    %cst_92 = arith.constant 1.000000e+08 : f32
    %294 = vector.shape_cast %293 : vector<8x1xi1> to vector<8x1xi1>
    %295 = vector.broadcast %294 : vector<8x1xi1> to vector<8x512xi1>
    %296 = vector.broadcast %cst_92 : f32 to vector<8x512xf32>
    %297 = arith.select %295, %290, %296 : vector<8x512xi1>, vector<8x512xf32>
    %298 = arith.minimumf %225, %297 : vector<8x512xf32>
    %c0_93 = arith.constant 0 : index
    %c73 = arith.constant 73 : index
    %299 = vector.load %arg2[%c0_93, %c73] : memref<8x128xf32, #tpu.memory_space<vmem>>, vector<8x1xf32>
    %300 = vector.broadcast %299 : vector<8x1xf32> to vector<8x512xf32>
    %301 = arith.subf %1, %300 : vector<8x512xf32>
    %c0_94 = arith.constant 0 : index
    %c74 = arith.constant 74 : index
    %302 = vector.load %arg2[%c0_94, %c74] : memref<8x128xf32, #tpu.memory_space<vmem>>, vector<8x1xf32>
    %303 = vector.broadcast %302 : vector<8x1xf32> to vector<8x512xf32>
    %304 = arith.subf %3, %303 : vector<8x512xf32>
    %c0_95 = arith.constant 0 : index
    %c75 = arith.constant 75 : index
    %305 = vector.load %arg2[%c0_95, %c75] : memref<8x128xf32, #tpu.memory_space<vmem>>, vector<8x1xf32>
    %306 = vector.broadcast %305 : vector<8x1xf32> to vector<8x512xf32>
    %307 = arith.subf %5, %306 : vector<8x512xf32>
    %c0_96 = arith.constant 0 : index
    %c64 = arith.constant 64 : index
    %308 = vector.load %arg2[%c0_96, %c64] : memref<8x128xf32, #tpu.memory_space<vmem>>, vector<8x1xf32>
    %309 = vector.broadcast %308 : vector<8x1xf32> to vector<8x512xf32>
    %310 = arith.mulf %309, %301 : vector<8x512xf32>
    %c0_97 = arith.constant 0 : index
    %c65 = arith.constant 65 : index
    %311 = vector.load %arg2[%c0_97, %c65] : memref<8x128xf32, #tpu.memory_space<vmem>>, vector<8x1xf32>
    %312 = vector.broadcast %311 : vector<8x1xf32> to vector<8x512xf32>
    %313 = arith.mulf %312, %304 : vector<8x512xf32>
    %314 = arith.addf %310, %313 : vector<8x512xf32>
    %c0_98 = arith.constant 0 : index
    %c66 = arith.constant 66 : index
    %315 = vector.load %arg2[%c0_98, %c66] : memref<8x128xf32, #tpu.memory_space<vmem>>, vector<8x1xf32>
    %316 = vector.broadcast %315 : vector<8x1xf32> to vector<8x512xf32>
    %317 = arith.mulf %316, %307 : vector<8x512xf32>
    %318 = arith.addf %314, %317 : vector<8x512xf32>
    %c0_99 = arith.constant 0 : index
    %c67 = arith.constant 67 : index
    %319 = vector.load %arg2[%c0_99, %c67] : memref<8x128xf32, #tpu.memory_space<vmem>>, vector<8x1xf32>
    %320 = vector.broadcast %319 : vector<8x1xf32> to vector<8x512xf32>
    %321 = arith.mulf %320, %301 : vector<8x512xf32>
    %c0_100 = arith.constant 0 : index
    %c68 = arith.constant 68 : index
    %322 = vector.load %arg2[%c0_100, %c68] : memref<8x128xf32, #tpu.memory_space<vmem>>, vector<8x1xf32>
    %323 = vector.broadcast %322 : vector<8x1xf32> to vector<8x512xf32>
    %324 = arith.mulf %323, %304 : vector<8x512xf32>
    %325 = arith.addf %321, %324 : vector<8x512xf32>
    %c0_101 = arith.constant 0 : index
    %c69 = arith.constant 69 : index
    %326 = vector.load %arg2[%c0_101, %c69] : memref<8x128xf32, #tpu.memory_space<vmem>>, vector<8x1xf32>
    %327 = vector.broadcast %326 : vector<8x1xf32> to vector<8x512xf32>
    %328 = arith.mulf %327, %307 : vector<8x512xf32>
    %329 = arith.addf %325, %328 : vector<8x512xf32>
    %c0_102 = arith.constant 0 : index
    %c70 = arith.constant 70 : index
    %330 = vector.load %arg2[%c0_102, %c70] : memref<8x128xf32, #tpu.memory_space<vmem>>, vector<8x1xf32>
    %331 = vector.broadcast %330 : vector<8x1xf32> to vector<8x512xf32>
    %332 = arith.mulf %331, %301 : vector<8x512xf32>
    %c0_103 = arith.constant 0 : index
    %c71 = arith.constant 71 : index
    %333 = vector.load %arg2[%c0_103, %c71] : memref<8x128xf32, #tpu.memory_space<vmem>>, vector<8x1xf32>
    %334 = vector.broadcast %333 : vector<8x1xf32> to vector<8x512xf32>
    %335 = arith.mulf %334, %304 : vector<8x512xf32>
    %336 = arith.addf %332, %335 : vector<8x512xf32>
    %c0_104 = arith.constant 0 : index
    %c72 = arith.constant 72 : index
    %337 = vector.load %arg2[%c0_104, %c72] : memref<8x128xf32, #tpu.memory_space<vmem>>, vector<8x1xf32>
    %338 = vector.broadcast %337 : vector<8x1xf32> to vector<8x512xf32>
    %339 = arith.mulf %338, %307 : vector<8x512xf32>
    %340 = arith.addf %336, %339 : vector<8x512xf32>
    %341 = math.absf %318 : vector<8x512xf32>
    %c0_105 = arith.constant 0 : index
    %c76 = arith.constant 76 : index
    %342 = vector.load %arg2[%c0_105, %c76] : memref<8x128xf32, #tpu.memory_space<vmem>>, vector<8x1xf32>
    %343 = vector.broadcast %342 : vector<8x1xf32> to vector<8x512xf32>
    %344 = arith.subf %341, %343 : vector<8x512xf32>
    %cst_106 = arith.constant 0.000000e+00 : f32
    %345 = vector.broadcast %cst_106 : f32 to vector<8x512xf32>
    %346 = arith.maximumf %344, %345 : vector<8x512xf32>
    %347 = math.absf %329 : vector<8x512xf32>
    %c0_107 = arith.constant 0 : index
    %c77 = arith.constant 77 : index
    %348 = vector.load %arg2[%c0_107, %c77] : memref<8x128xf32, #tpu.memory_space<vmem>>, vector<8x1xf32>
    %349 = vector.broadcast %348 : vector<8x1xf32> to vector<8x512xf32>
    %350 = arith.subf %347, %349 : vector<8x512xf32>
    %cst_108 = arith.constant 0.000000e+00 : f32
    %351 = vector.broadcast %cst_108 : f32 to vector<8x512xf32>
    %352 = arith.maximumf %350, %351 : vector<8x512xf32>
    %353 = math.absf %340 : vector<8x512xf32>
    %c0_109 = arith.constant 0 : index
    %c78 = arith.constant 78 : index
    %354 = vector.load %arg2[%c0_109, %c78] : memref<8x128xf32, #tpu.memory_space<vmem>>, vector<8x1xf32>
    %355 = vector.broadcast %354 : vector<8x1xf32> to vector<8x512xf32>
    %356 = arith.subf %353, %355 : vector<8x512xf32>
    %cst_110 = arith.constant 0.000000e+00 : f32
    %357 = vector.broadcast %cst_110 : f32 to vector<8x512xf32>
    %358 = arith.maximumf %356, %357 : vector<8x512xf32>
    %359 = arith.mulf %346, %346 : vector<8x512xf32>
    %360 = arith.mulf %352, %352 : vector<8x512xf32>
    %361 = arith.addf %359, %360 : vector<8x512xf32>
    %362 = arith.mulf %358, %358 : vector<8x512xf32>
    %363 = arith.addf %361, %362 : vector<8x512xf32>
    %c0_111 = arith.constant 0 : index
    %c79 = arith.constant 79 : index
    %364 = vector.load %arg2[%c0_111, %c79] : memref<8x128xf32, #tpu.memory_space<vmem>>, vector<8x1xf32>
    %cst_112 = arith.constant 5.000000e-01 : f32
    %365 = vector.broadcast %cst_112 : f32 to vector<8x1xf32>
    %366 = arith.cmpf ogt, %364, %365 : vector<8x1xf32>
    %cst_113 = arith.constant 1.000000e+08 : f32
    %367 = vector.shape_cast %366 : vector<8x1xi1> to vector<8x1xi1>
    %368 = vector.broadcast %367 : vector<8x1xi1> to vector<8x512xi1>
    %369 = vector.broadcast %cst_113 : f32 to vector<8x512xf32>
    %370 = arith.select %368, %363, %369 : vector<8x512xi1>, vector<8x512xf32>
    %371 = arith.minimumf %298, %370 : vector<8x512xf32>
    %c0_114 = arith.constant 0 : index
    %c89 = arith.constant 89 : index
    %372 = vector.load %arg2[%c0_114, %c89] : memref<8x128xf32, #tpu.memory_space<vmem>>, vector<8x1xf32>
    %373 = vector.broadcast %372 : vector<8x1xf32> to vector<8x512xf32>
    %374 = arith.subf %1, %373 : vector<8x512xf32>
    %c0_115 = arith.constant 0 : index
    %c90 = arith.constant 90 : index
    %375 = vector.load %arg2[%c0_115, %c90] : memref<8x128xf32, #tpu.memory_space<vmem>>, vector<8x1xf32>
    %376 = vector.broadcast %375 : vector<8x1xf32> to vector<8x512xf32>
    %377 = arith.subf %3, %376 : vector<8x512xf32>
    %c0_116 = arith.constant 0 : index
    %c91 = arith.constant 91 : index
    %378 = vector.load %arg2[%c0_116, %c91] : memref<8x128xf32, #tpu.memory_space<vmem>>, vector<8x1xf32>
    %379 = vector.broadcast %378 : vector<8x1xf32> to vector<8x512xf32>
    %380 = arith.subf %5, %379 : vector<8x512xf32>
    %c0_117 = arith.constant 0 : index
    %c80 = arith.constant 80 : index
    %381 = vector.load %arg2[%c0_117, %c80] : memref<8x128xf32, #tpu.memory_space<vmem>>, vector<8x1xf32>
    %382 = vector.broadcast %381 : vector<8x1xf32> to vector<8x512xf32>
    %383 = arith.mulf %382, %374 : vector<8x512xf32>
    %c0_118 = arith.constant 0 : index
    %c81 = arith.constant 81 : index
    %384 = vector.load %arg2[%c0_118, %c81] : memref<8x128xf32, #tpu.memory_space<vmem>>, vector<8x1xf32>
    %385 = vector.broadcast %384 : vector<8x1xf32> to vector<8x512xf32>
    %386 = arith.mulf %385, %377 : vector<8x512xf32>
    %387 = arith.addf %383, %386 : vector<8x512xf32>
    %c0_119 = arith.constant 0 : index
    %c82 = arith.constant 82 : index
    %388 = vector.load %arg2[%c0_119, %c82] : memref<8x128xf32, #tpu.memory_space<vmem>>, vector<8x1xf32>
    %389 = vector.broadcast %388 : vector<8x1xf32> to vector<8x512xf32>
    %390 = arith.mulf %389, %380 : vector<8x512xf32>
    %391 = arith.addf %387, %390 : vector<8x512xf32>
    %c0_120 = arith.constant 0 : index
    %c83 = arith.constant 83 : index
    %392 = vector.load %arg2[%c0_120, %c83] : memref<8x128xf32, #tpu.memory_space<vmem>>, vector<8x1xf32>
    %393 = vector.broadcast %392 : vector<8x1xf32> to vector<8x512xf32>
    %394 = arith.mulf %393, %374 : vector<8x512xf32>
    %c0_121 = arith.constant 0 : index
    %c84 = arith.constant 84 : index
    %395 = vector.load %arg2[%c0_121, %c84] : memref<8x128xf32, #tpu.memory_space<vmem>>, vector<8x1xf32>
    %396 = vector.broadcast %395 : vector<8x1xf32> to vector<8x512xf32>
    %397 = arith.mulf %396, %377 : vector<8x512xf32>
    %398 = arith.addf %394, %397 : vector<8x512xf32>
    %c0_122 = arith.constant 0 : index
    %c85 = arith.constant 85 : index
    %399 = vector.load %arg2[%c0_122, %c85] : memref<8x128xf32, #tpu.memory_space<vmem>>, vector<8x1xf32>
    %400 = vector.broadcast %399 : vector<8x1xf32> to vector<8x512xf32>
    %401 = arith.mulf %400, %380 : vector<8x512xf32>
    %402 = arith.addf %398, %401 : vector<8x512xf32>
    %c0_123 = arith.constant 0 : index
    %c86 = arith.constant 86 : index
    %403 = vector.load %arg2[%c0_123, %c86] : memref<8x128xf32, #tpu.memory_space<vmem>>, vector<8x1xf32>
    %404 = vector.broadcast %403 : vector<8x1xf32> to vector<8x512xf32>
    %405 = arith.mulf %404, %374 : vector<8x512xf32>
    %c0_124 = arith.constant 0 : index
    %c87 = arith.constant 87 : index
    %406 = vector.load %arg2[%c0_124, %c87] : memref<8x128xf32, #tpu.memory_space<vmem>>, vector<8x1xf32>
    %407 = vector.broadcast %406 : vector<8x1xf32> to vector<8x512xf32>
    %408 = arith.mulf %407, %377 : vector<8x512xf32>
    %409 = arith.addf %405, %408 : vector<8x512xf32>
    %c0_125 = arith.constant 0 : index
    %c88 = arith.constant 88 : index
    %410 = vector.load %arg2[%c0_125, %c88] : memref<8x128xf32, #tpu.memory_space<vmem>>, vector<8x1xf32>
    %411 = vector.broadcast %410 : vector<8x1xf32> to vector<8x512xf32>
    %412 = arith.mulf %411, %380 : vector<8x512xf32>
    %413 = arith.addf %409, %412 : vector<8x512xf32>
    %414 = math.absf %391 : vector<8x512xf32>
    %c0_126 = arith.constant 0 : index
    %c92 = arith.constant 92 : index
    %415 = vector.load %arg2[%c0_126, %c92] : memref<8x128xf32, #tpu.memory_space<vmem>>, vector<8x1xf32>
    %416 = vector.broadcast %415 : vector<8x1xf32> to vector<8x512xf32>
    %417 = arith.subf %414, %416 : vector<8x512xf32>
    %cst_127 = arith.constant 0.000000e+00 : f32
    %418 = vector.broadcast %cst_127 : f32 to vector<8x512xf32>
    %419 = arith.maximumf %417, %418 : vector<8x512xf32>
    %420 = math.absf %402 : vector<8x512xf32>
    %c0_128 = arith.constant 0 : index
    %c93 = arith.constant 93 : index
    %421 = vector.load %arg2[%c0_128, %c93] : memref<8x128xf32, #tpu.memory_space<vmem>>, vector<8x1xf32>
    %422 = vector.broadcast %421 : vector<8x1xf32> to vector<8x512xf32>
    %423 = arith.subf %420, %422 : vector<8x512xf32>
    %cst_129 = arith.constant 0.000000e+00 : f32
    %424 = vector.broadcast %cst_129 : f32 to vector<8x512xf32>
    %425 = arith.maximumf %423, %424 : vector<8x512xf32>
    %426 = math.absf %413 : vector<8x512xf32>
    %c0_130 = arith.constant 0 : index
    %c94 = arith.constant 94 : index
    %427 = vector.load %arg2[%c0_130, %c94] : memref<8x128xf32, #tpu.memory_space<vmem>>, vector<8x1xf32>
    %428 = vector.broadcast %427 : vector<8x1xf32> to vector<8x512xf32>
    %429 = arith.subf %426, %428 : vector<8x512xf32>
    %cst_131 = arith.constant 0.000000e+00 : f32
    %430 = vector.broadcast %cst_131 : f32 to vector<8x512xf32>
    %431 = arith.maximumf %429, %430 : vector<8x512xf32>
    %432 = arith.mulf %419, %419 : vector<8x512xf32>
    %433 = arith.mulf %425, %425 : vector<8x512xf32>
    %434 = arith.addf %432, %433 : vector<8x512xf32>
    %435 = arith.mulf %431, %431 : vector<8x512xf32>
    %436 = arith.addf %434, %435 : vector<8x512xf32>
    %c0_132 = arith.constant 0 : index
    %c95 = arith.constant 95 : index
    %437 = vector.load %arg2[%c0_132, %c95] : memref<8x128xf32, #tpu.memory_space<vmem>>, vector<8x1xf32>
    %cst_133 = arith.constant 5.000000e-01 : f32
    %438 = vector.broadcast %cst_133 : f32 to vector<8x1xf32>
    %439 = arith.cmpf ogt, %437, %438 : vector<8x1xf32>
    %cst_134 = arith.constant 1.000000e+08 : f32
    %440 = vector.shape_cast %439 : vector<8x1xi1> to vector<8x1xi1>
    %441 = vector.broadcast %440 : vector<8x1xi1> to vector<8x512xi1>
    %442 = vector.broadcast %cst_134 : f32 to vector<8x512xf32>
    %443 = arith.select %441, %436, %442 : vector<8x512xi1>, vector<8x512xf32>
    %444 = arith.minimumf %371, %443 : vector<8x512xf32>
    %c0_135 = arith.constant 0 : index
    %c105 = arith.constant 105 : index
    %445 = vector.load %arg2[%c0_135, %c105] : memref<8x128xf32, #tpu.memory_space<vmem>>, vector<8x1xf32>
    %446 = vector.broadcast %445 : vector<8x1xf32> to vector<8x512xf32>
    %447 = arith.subf %1, %446 : vector<8x512xf32>
    %c0_136 = arith.constant 0 : index
    %c106 = arith.constant 106 : index
    %448 = vector.load %arg2[%c0_136, %c106] : memref<8x128xf32, #tpu.memory_space<vmem>>, vector<8x1xf32>
    %449 = vector.broadcast %448 : vector<8x1xf32> to vector<8x512xf32>
    %450 = arith.subf %3, %449 : vector<8x512xf32>
    %c0_137 = arith.constant 0 : index
    %c107 = arith.constant 107 : index
    %451 = vector.load %arg2[%c0_137, %c107] : memref<8x128xf32, #tpu.memory_space<vmem>>, vector<8x1xf32>
    %452 = vector.broadcast %451 : vector<8x1xf32> to vector<8x512xf32>
    %453 = arith.subf %5, %452 : vector<8x512xf32>
    %c0_138 = arith.constant 0 : index
    %c96 = arith.constant 96 : index
    %454 = vector.load %arg2[%c0_138, %c96] : memref<8x128xf32, #tpu.memory_space<vmem>>, vector<8x1xf32>
    %455 = vector.broadcast %454 : vector<8x1xf32> to vector<8x512xf32>
    %456 = arith.mulf %455, %447 : vector<8x512xf32>
    %c0_139 = arith.constant 0 : index
    %c97 = arith.constant 97 : index
    %457 = vector.load %arg2[%c0_139, %c97] : memref<8x128xf32, #tpu.memory_space<vmem>>, vector<8x1xf32>
    %458 = vector.broadcast %457 : vector<8x1xf32> to vector<8x512xf32>
    %459 = arith.mulf %458, %450 : vector<8x512xf32>
    %460 = arith.addf %456, %459 : vector<8x512xf32>
    %c0_140 = arith.constant 0 : index
    %c98 = arith.constant 98 : index
    %461 = vector.load %arg2[%c0_140, %c98] : memref<8x128xf32, #tpu.memory_space<vmem>>, vector<8x1xf32>
    %462 = vector.broadcast %461 : vector<8x1xf32> to vector<8x512xf32>
    %463 = arith.mulf %462, %453 : vector<8x512xf32>
    %464 = arith.addf %460, %463 : vector<8x512xf32>
    %c0_141 = arith.constant 0 : index
    %c99 = arith.constant 99 : index
    %465 = vector.load %arg2[%c0_141, %c99] : memref<8x128xf32, #tpu.memory_space<vmem>>, vector<8x1xf32>
    %466 = vector.broadcast %465 : vector<8x1xf32> to vector<8x512xf32>
    %467 = arith.mulf %466, %447 : vector<8x512xf32>
    %c0_142 = arith.constant 0 : index
    %c100 = arith.constant 100 : index
    %468 = vector.load %arg2[%c0_142, %c100] : memref<8x128xf32, #tpu.memory_space<vmem>>, vector<8x1xf32>
    %469 = vector.broadcast %468 : vector<8x1xf32> to vector<8x512xf32>
    %470 = arith.mulf %469, %450 : vector<8x512xf32>
    %471 = arith.addf %467, %470 : vector<8x512xf32>
    %c0_143 = arith.constant 0 : index
    %c101 = arith.constant 101 : index
    %472 = vector.load %arg2[%c0_143, %c101] : memref<8x128xf32, #tpu.memory_space<vmem>>, vector<8x1xf32>
    %473 = vector.broadcast %472 : vector<8x1xf32> to vector<8x512xf32>
    %474 = arith.mulf %473, %453 : vector<8x512xf32>
    %475 = arith.addf %471, %474 : vector<8x512xf32>
    %c0_144 = arith.constant 0 : index
    %c102 = arith.constant 102 : index
    %476 = vector.load %arg2[%c0_144, %c102] : memref<8x128xf32, #tpu.memory_space<vmem>>, vector<8x1xf32>
    %477 = vector.broadcast %476 : vector<8x1xf32> to vector<8x512xf32>
    %478 = arith.mulf %477, %447 : vector<8x512xf32>
    %c0_145 = arith.constant 0 : index
    %c103 = arith.constant 103 : index
    %479 = vector.load %arg2[%c0_145, %c103] : memref<8x128xf32, #tpu.memory_space<vmem>>, vector<8x1xf32>
    %480 = vector.broadcast %479 : vector<8x1xf32> to vector<8x512xf32>
    %481 = arith.mulf %480, %450 : vector<8x512xf32>
    %482 = arith.addf %478, %481 : vector<8x512xf32>
    %c0_146 = arith.constant 0 : index
    %c104 = arith.constant 104 : index
    %483 = vector.load %arg2[%c0_146, %c104] : memref<8x128xf32, #tpu.memory_space<vmem>>, vector<8x1xf32>
    %484 = vector.broadcast %483 : vector<8x1xf32> to vector<8x512xf32>
    %485 = arith.mulf %484, %453 : vector<8x512xf32>
    %486 = arith.addf %482, %485 : vector<8x512xf32>
    %487 = math.absf %464 : vector<8x512xf32>
    %c0_147 = arith.constant 0 : index
    %c108 = arith.constant 108 : index
    %488 = vector.load %arg2[%c0_147, %c108] : memref<8x128xf32, #tpu.memory_space<vmem>>, vector<8x1xf32>
    %489 = vector.broadcast %488 : vector<8x1xf32> to vector<8x512xf32>
    %490 = arith.subf %487, %489 : vector<8x512xf32>
    %cst_148 = arith.constant 0.000000e+00 : f32
    %491 = vector.broadcast %cst_148 : f32 to vector<8x512xf32>
    %492 = arith.maximumf %490, %491 : vector<8x512xf32>
    %493 = math.absf %475 : vector<8x512xf32>
    %c0_149 = arith.constant 0 : index
    %c109 = arith.constant 109 : index
    %494 = vector.load %arg2[%c0_149, %c109] : memref<8x128xf32, #tpu.memory_space<vmem>>, vector<8x1xf32>
    %495 = vector.broadcast %494 : vector<8x1xf32> to vector<8x512xf32>
    %496 = arith.subf %493, %495 : vector<8x512xf32>
    %cst_150 = arith.constant 0.000000e+00 : f32
    %497 = vector.broadcast %cst_150 : f32 to vector<8x512xf32>
    %498 = arith.maximumf %496, %497 : vector<8x512xf32>
    %499 = math.absf %486 : vector<8x512xf32>
    %c0_151 = arith.constant 0 : index
    %c110 = arith.constant 110 : index
    %500 = vector.load %arg2[%c0_151, %c110] : memref<8x128xf32, #tpu.memory_space<vmem>>, vector<8x1xf32>
    %501 = vector.broadcast %500 : vector<8x1xf32> to vector<8x512xf32>
    %502 = arith.subf %499, %501 : vector<8x512xf32>
    %cst_152 = arith.constant 0.000000e+00 : f32
    %503 = vector.broadcast %cst_152 : f32 to vector<8x512xf32>
    %504 = arith.maximumf %502, %503 : vector<8x512xf32>
    %505 = arith.mulf %492, %492 : vector<8x512xf32>
    %506 = arith.mulf %498, %498 : vector<8x512xf32>
    %507 = arith.addf %505, %506 : vector<8x512xf32>
    %508 = arith.mulf %504, %504 : vector<8x512xf32>
    %509 = arith.addf %507, %508 : vector<8x512xf32>
    %c0_153 = arith.constant 0 : index
    %c111 = arith.constant 111 : index
    %510 = vector.load %arg2[%c0_153, %c111] : memref<8x128xf32, #tpu.memory_space<vmem>>, vector<8x1xf32>
    %cst_154 = arith.constant 5.000000e-01 : f32
    %511 = vector.broadcast %cst_154 : f32 to vector<8x1xf32>
    %512 = arith.cmpf ogt, %510, %511 : vector<8x1xf32>
    %cst_155 = arith.constant 1.000000e+08 : f32
    %513 = vector.shape_cast %512 : vector<8x1xi1> to vector<8x1xi1>
    %514 = vector.broadcast %513 : vector<8x1xi1> to vector<8x512xi1>
    %515 = vector.broadcast %cst_155 : f32 to vector<8x512xf32>
    %516 = arith.select %514, %509, %515 : vector<8x512xi1>, vector<8x512xf32>
    %517 = arith.minimumf %444, %516 : vector<8x512xf32>
    %c0_156 = arith.constant 0 : index
    %c121 = arith.constant 121 : index
    %518 = vector.load %arg2[%c0_156, %c121] : memref<8x128xf32, #tpu.memory_space<vmem>>, vector<8x1xf32>
    %519 = vector.broadcast %518 : vector<8x1xf32> to vector<8x512xf32>
    %520 = arith.subf %1, %519 : vector<8x512xf32>
    %c0_157 = arith.constant 0 : index
    %c122 = arith.constant 122 : index
    %521 = vector.load %arg2[%c0_157, %c122] : memref<8x128xf32, #tpu.memory_space<vmem>>, vector<8x1xf32>
    %522 = vector.broadcast %521 : vector<8x1xf32> to vector<8x512xf32>
    %523 = arith.subf %3, %522 : vector<8x512xf32>
    %c0_158 = arith.constant 0 : index
    %c123 = arith.constant 123 : index
    %524 = vector.load %arg2[%c0_158, %c123] : memref<8x128xf32, #tpu.memory_space<vmem>>, vector<8x1xf32>
    %525 = vector.broadcast %524 : vector<8x1xf32> to vector<8x512xf32>
    %526 = arith.subf %5, %525 : vector<8x512xf32>
    %c0_159 = arith.constant 0 : index
    %c112 = arith.constant 112 : index
    %527 = vector.load %arg2[%c0_159, %c112] : memref<8x128xf32, #tpu.memory_space<vmem>>, vector<8x1xf32>
    %528 = vector.broadcast %527 : vector<8x1xf32> to vector<8x512xf32>
    %529 = arith.mulf %528, %520 : vector<8x512xf32>
    %c0_160 = arith.constant 0 : index
    %c113 = arith.constant 113 : index
    %530 = vector.load %arg2[%c0_160, %c113] : memref<8x128xf32, #tpu.memory_space<vmem>>, vector<8x1xf32>
    %531 = vector.broadcast %530 : vector<8x1xf32> to vector<8x512xf32>
    %532 = arith.mulf %531, %523 : vector<8x512xf32>
    %533 = arith.addf %529, %532 : vector<8x512xf32>
    %c0_161 = arith.constant 0 : index
    %c114 = arith.constant 114 : index
    %534 = vector.load %arg2[%c0_161, %c114] : memref<8x128xf32, #tpu.memory_space<vmem>>, vector<8x1xf32>
    %535 = vector.broadcast %534 : vector<8x1xf32> to vector<8x512xf32>
    %536 = arith.mulf %535, %526 : vector<8x512xf32>
    %537 = arith.addf %533, %536 : vector<8x512xf32>
    %c0_162 = arith.constant 0 : index
    %c115 = arith.constant 115 : index
    %538 = vector.load %arg2[%c0_162, %c115] : memref<8x128xf32, #tpu.memory_space<vmem>>, vector<8x1xf32>
    %539 = vector.broadcast %538 : vector<8x1xf32> to vector<8x512xf32>
    %540 = arith.mulf %539, %520 : vector<8x512xf32>
    %c0_163 = arith.constant 0 : index
    %c116 = arith.constant 116 : index
    %541 = vector.load %arg2[%c0_163, %c116] : memref<8x128xf32, #tpu.memory_space<vmem>>, vector<8x1xf32>
    %542 = vector.broadcast %541 : vector<8x1xf32> to vector<8x512xf32>
    %543 = arith.mulf %542, %523 : vector<8x512xf32>
    %544 = arith.addf %540, %543 : vector<8x512xf32>
    %c0_164 = arith.constant 0 : index
    %c117 = arith.constant 117 : index
    %545 = vector.load %arg2[%c0_164, %c117] : memref<8x128xf32, #tpu.memory_space<vmem>>, vector<8x1xf32>
    %546 = vector.broadcast %545 : vector<8x1xf32> to vector<8x512xf32>
    %547 = arith.mulf %546, %526 : vector<8x512xf32>
    %548 = arith.addf %544, %547 : vector<8x512xf32>
    %c0_165 = arith.constant 0 : index
    %c118 = arith.constant 118 : index
    %549 = vector.load %arg2[%c0_165, %c118] : memref<8x128xf32, #tpu.memory_space<vmem>>, vector<8x1xf32>
    %550 = vector.broadcast %549 : vector<8x1xf32> to vector<8x512xf32>
    %551 = arith.mulf %550, %520 : vector<8x512xf32>
    %c0_166 = arith.constant 0 : index
    %c119 = arith.constant 119 : index
    %552 = vector.load %arg2[%c0_166, %c119] : memref<8x128xf32, #tpu.memory_space<vmem>>, vector<8x1xf32>
    %553 = vector.broadcast %552 : vector<8x1xf32> to vector<8x512xf32>
    %554 = arith.mulf %553, %523 : vector<8x512xf32>
    %555 = arith.addf %551, %554 : vector<8x512xf32>
    %c0_167 = arith.constant 0 : index
    %c120 = arith.constant 120 : index
    %556 = vector.load %arg2[%c0_167, %c120] : memref<8x128xf32, #tpu.memory_space<vmem>>, vector<8x1xf32>
    %557 = vector.broadcast %556 : vector<8x1xf32> to vector<8x512xf32>
    %558 = arith.mulf %557, %526 : vector<8x512xf32>
    %559 = arith.addf %555, %558 : vector<8x512xf32>
    %560 = math.absf %537 : vector<8x512xf32>
    %c0_168 = arith.constant 0 : index
    %c124 = arith.constant 124 : index
    %561 = vector.load %arg2[%c0_168, %c124] : memref<8x128xf32, #tpu.memory_space<vmem>>, vector<8x1xf32>
    %562 = vector.broadcast %561 : vector<8x1xf32> to vector<8x512xf32>
    %563 = arith.subf %560, %562 : vector<8x512xf32>
    %cst_169 = arith.constant 0.000000e+00 : f32
    %564 = vector.broadcast %cst_169 : f32 to vector<8x512xf32>
    %565 = arith.maximumf %563, %564 : vector<8x512xf32>
    %566 = math.absf %548 : vector<8x512xf32>
    %c0_170 = arith.constant 0 : index
    %c125 = arith.constant 125 : index
    %567 = vector.load %arg2[%c0_170, %c125] : memref<8x128xf32, #tpu.memory_space<vmem>>, vector<8x1xf32>
    %568 = vector.broadcast %567 : vector<8x1xf32> to vector<8x512xf32>
    %569 = arith.subf %566, %568 : vector<8x512xf32>
    %cst_171 = arith.constant 0.000000e+00 : f32
    %570 = vector.broadcast %cst_171 : f32 to vector<8x512xf32>
    %571 = arith.maximumf %569, %570 : vector<8x512xf32>
    %572 = math.absf %559 : vector<8x512xf32>
    %c0_172 = arith.constant 0 : index
    %c126 = arith.constant 126 : index
    %573 = vector.load %arg2[%c0_172, %c126] : memref<8x128xf32, #tpu.memory_space<vmem>>, vector<8x1xf32>
    %574 = vector.broadcast %573 : vector<8x1xf32> to vector<8x512xf32>
    %575 = arith.subf %572, %574 : vector<8x512xf32>
    %cst_173 = arith.constant 0.000000e+00 : f32
    %576 = vector.broadcast %cst_173 : f32 to vector<8x512xf32>
    %577 = arith.maximumf %575, %576 : vector<8x512xf32>
    %578 = arith.mulf %565, %565 : vector<8x512xf32>
    %579 = arith.mulf %571, %571 : vector<8x512xf32>
    %580 = arith.addf %578, %579 : vector<8x512xf32>
    %581 = arith.mulf %577, %577 : vector<8x512xf32>
    %582 = arith.addf %580, %581 : vector<8x512xf32>
    %c0_174 = arith.constant 0 : index
    %c127 = arith.constant 127 : index
    %583 = vector.load %arg2[%c0_174, %c127] : memref<8x128xf32, #tpu.memory_space<vmem>>, vector<8x1xf32>
    %cst_175 = arith.constant 5.000000e-01 : f32
    %584 = vector.broadcast %cst_175 : f32 to vector<8x1xf32>
    %585 = arith.cmpf ogt, %583, %584 : vector<8x1xf32>
    %cst_176 = arith.constant 1.000000e+08 : f32
    %586 = vector.shape_cast %585 : vector<8x1xi1> to vector<8x1xi1>
    %587 = vector.broadcast %586 : vector<8x1xi1> to vector<8x512xi1>
    %588 = vector.broadcast %cst_176 : f32 to vector<8x512xf32>
    %589 = arith.select %587, %582, %588 : vector<8x512xi1>, vector<8x512xf32>
    %590 = arith.minimumf %517, %589 : vector<8x512xf32>
    %c0_177 = arith.constant 0 : index
    %c0_178 = arith.constant 0 : index
    %591 = vector.load %arg4[%c0_177, %c0_178] : memref<8x512xf32, #tpu.memory_space<vmem>>, vector<8x512xf32>
    tpu.vector_store %arg4[%c0_177, %c0_178], %590 {strides = array<i32>} : memref<8x512xf32, #tpu.memory_space<vmem>>, vector<8x512xf32>,
    return
  }
  func.func @transform_0(%arg0: i32, %arg1: i32) -> (i32, i32) {
    %c0_i32 = arith.constant 0 : i32
    %c0_i32_0 = arith.constant 0 : i32
    return %arg0, %c0_i32 : i32, i32
  }
  func.func @transform_1(%arg0: i32, %arg1: i32) -> (i32, i32, i32) {
    %c0_i32 = arith.constant 0 : i32
    %c0_i32_0 = arith.constant 0 : i32
    return %c0_i32, %arg0, %arg1 : i32, i32, i32
  }
  func.func @transform_2(%arg0: i32, %arg1: i32) -> (i32, i32) {
    %c0_i32 = arith.constant 0 : i32
    return %arg0, %arg1 : i32, i32
  }
}

</mosaic_0001>

<bundles_post_ra>
// kernel: tpu_custom_call.1
= control target key start
LH: loop header
LB: loop body
LE: loop exit
PB: predicated region body
PF: predicated region fallthrough
CT: control target
= control target key end

     0   :  { %7 = vsyncpa [#allocation3], 0  ;;  %s3283_s0 = inlined_call_operand.hbm [shape: f32[8,128], index: 0, kind: input, shape index: {}]   ;;  %s3284_s1 = inlined_call_operand.hbm [shape: f32[3,8,512], index: 1, kind: input, shape index: {}]   ;;  %s3285_s2 = inlined_call_operand.hbm [shape: f32[8,512], index: 2, kind: output, shape index: {}]  }
   0x1   :  { %8 = vsyncpa [#allocation6], 0 }
   0x2   :  { %9 = vsyncpa [#allocation4], 0  ;;  %s2032_s9 = smov [#allocation2]   ;;  %s2033_s11 = smov [#allocation5]  }
   0x3   :  { %s16_s10 = sshll.u32 %s2032_s9, 4  ;;  %s25_s12 = sshll.u32 %s2033_s11, 4  ;;  %s17_s10 = int_to_ptr.vmem [resolvable:$true] %s16_s10  ;;  %s2180_s12 = int_to_ptr.vmem [resolvable:$true] %s25_s12 }
   0x4   :  { %s1960_s15 = scalar_lea.hbm %s3283_s0, 128 }
   0x5   :  { %p1961_p0 = scmp.ne.s32.totalorder %s3283_s0, %s1960_s15  ;;  %p1964_p1 = scmp.lt.u32.totalorder %s1960_s15, %s3283_s0 }
   0x7   :  { %p1966_p2 = pnand %p1964_p1, %p1961_p0 }
   0x9   :  { %1969 = shalt.err (!%p1966_p2)
}
   0xa   :  { %s1970_s20 = scalar_lea.vmem %s17_s10, 128  ;;  %p1975_p4 = scmp.lt.s32.totalorder %s17_s10, %s17_s10 }
   0xb   :  { %p1971_p3 = scmp.ne.s32.totalorder %s17_s10, %s1970_s20  ;;  %p1976_p5 = scmp.lt.s32.totalorder %s1970_s20, %s1970_s20 }
   0xd   :  { %p1977_p6 = por %p1976_p5, %p1975_p4 }
   0xf   :  { %p1978_p7 = pnand %p1977_p6, %p1971_p3 }
  0x11   :  { %1981 = shalt.err (!%p1978_p7)
}
  0x12   :  { %19 = dma.hbm_to_vmem [thread:$0]  %s3283_s0, 128, %s17_s10, [#allocation3]  }
  0x13   :  { %s1982_s25 = scalar_lea.hbm %s3284_s1, 1536 }
  0x14   :  { %p1983_p8 = scmp.ne.s32.totalorder %s3284_s1, %s1982_s25  ;;  %p1986_p9 = scmp.lt.u32.totalorder %s1982_s25, %s3284_s1 }
  0x16   :  { %p1988_p10 = pnand %p1986_p9, %p1983_p8 }
  0x18   :  { %1991 = shalt.err (!%p1988_p10)
}
  0x19   :  { %s1992_s30 = scalar_lea.vmem %s2180_s12, 1536  ;;  %p1997_p12 = scmp.lt.s32.totalorder %s2180_s12, %s2180_s12 }
  0x1a   :  { %p1993_p11 = scmp.ne.s32.totalorder %s2180_s12, %s1992_s30  ;;  %p1998_p13 = scmp.lt.s32.totalorder %s1992_s30, %s1992_s30 }
  0x1c   :  { %p1999_p0 = por %p1998_p13, %p1997_p12 }
  0x1e   :  { %p2000_p1 = pnand %p1999_p0, %p1993_p11 }
  0x20   :  { %2003 = shalt.err (!%p2000_p1)
}
  0x21   :  { %s2034_s0 = smov 512   ;;  %s2035_s3 = smov 32  }
  0x22   :  { %31 = dma.hbm_to_vmem [thread:$0]  %s3284_s1, 1536, %s2180_s12, [#allocation6], %s2034_s0, %s2034_s0, %s2035_s3  }
  0x23   :  { %2026 = dma.done.wait [#allocation3], 128  }
  0x24   :  { %2027 = vsyncadd [#allocation3], 4294967168 }
  0x25   :  { %2028 = dma.done.wait [#allocation6], 1536  }
  0x26   :  { %2029 = vsyncadd [#allocation6], 4294965760  ;;  %v2036_v0 = vmov 11   ;;  %v2037_v1 = vmov 9   ;;  %v2211_v2 = vld [vmem:[#allocation2] sm:$0xff]  ;;  %v2038_v3 = vmov 0  }
  0x27   :  { %1811 = vset.pattern.permute.xlu1 %v2036_v0  ;;  %1809 = vset.pattern.permute.xlu0 %v2037_v1  ;;  %v2039_v4 = vmov 10   ;;  %v2040_v5 = vmov 1   ;;  %v2041_v6 = vmov 2   ;;  %v2042_v7 = vmov 3   ;;  %v2268_v56 = vld [vmem:[#allocation5] sm:$0xff]  ;;  %v2270_v57 = vld [vmem:[#allocation5 + $0x8] sm:$0xff] }
  0x28   :  { %71 = vperm.xlu1 %1811, %v2211_v2   ;;  %55 = vperm.xlu0 %1809, %v2211_v2   ;;  %v2043_v8 = vmov 5   ;;  %v2044_v9 = vmov 4   ;;  %v2045_v10 = vmov 8   ;;  %v2046_v11 = vmov 6   ;;  %v2272_v59 = vld [vmem:[#allocation5 + $0x10] sm:$0xff]  ;;  %v2274_v60 = vld [vmem:[#allocation5 + $0x18] sm:$0xff] }
  0x29   :  { %v2047_v12 = vmov 14   ;;  %v2048_v13 = vmov 7   ;;  %v2049_v14 = vmov 26   ;;  %v2050_v15 = vmov 12   ;;  %v2277_v61 = vld [vmem:[#allocation5 + $0x20] sm:$0xff]  ;;  %v2279_v63 = vld [vmem:[#allocation5 + $0x28] sm:$0xff] }
  0x2a   :  { %v2051_v16 = vmov 17   ;;  %vm242_vm0 = vcmp.gt.f32.partialorder %v2211_v2, 0.5  ;;  %v2052_v17 = vmov 13   ;;  %v2053_v18 = vmov 20   ;;  %v2281_v0 = vld [vmem:[#allocation5 + $0x30] sm:$0xff]  ;;  %v2283_v1 = vld [vmem:[#allocation5 + $0x38] sm:$0xff] }
  0x2b   :  { %v2232_v19 = vsel %vm242_vm0, 1, %v2038_v3  ;;  %v2054_v20 = vmov 15   ;;  %v2055_v21 = vmov 23   ;;  %v2056_v22 = vmov 25   ;;  %s2164_s1 = smov [#allocation7]  }
  0x2c   :  { %1812 = vset.pattern.permute.xlu1 %v2038_v3  ;;  %1810 = vset.pattern.permute.xlu0 %v2039_v4  ;;  %3291 = vst [vmem:[#allocation11_spill] sm:$0xff] %v2232_v19  ;;  %v2057_v23 = vmov 29   ;;  %v2058_v24 = vmov 27   ;;  %v2059_v25 = vmov 41   ;;  %v2060_v26 = vmov 16   ;;  %v2286_v3 = vld [vmem:[#allocation5 + $0x40] sm:$0xff] }
  0x2d   :  { %79 = vperm.xlu1 %1812, %v2211_v2   ;;  %63 = vperm.xlu0 %1810, %v2211_v2   ;;  %v2061_v27 = vmov 32   ;;  %v2062_v28 = vmov 18   ;;  %v2063_v29 = vmov 35   ;;  %v2064_v30 = vmov 19   ;;  %s1666_s6 = sshll.u32 %s2164_s1, 4  ;;  %s1667_s6 = int_to_ptr.vmem [resolvable:$true] %s1666_s6 }
  0x2e   :  { %v2065_v31 = vmov 38   ;;  %v2066_v32 = vmov 21   ;;  %v2067_v33 = vmov 44   ;;  %v2068_v34 = vmov 22   ;;  %s2004_s7 = scalar_lea.vmem %s1667_s6, 512  ;;  %p2009_p3 = scmp.lt.s32.totalorder %s1667_s6, %s1667_s6 }
  0x2f   :  { %v2069_v35 = vmov 47   ;;  %v2070_v36 = vmov 24   ;;  %v2071_v37 = vmov 59   ;;  %v2072_v38 = vmov 28   ;;  %p2005_p2 = scmp.ne.s32.totalorder %s1667_s6, %s2004_s7  ;;  %p2010_p4 = scmp.lt.s32.totalorder %s2004_s7, %s2004_s7 }
  0x30   :  { %v2073_v39 = vmov 50   ;;  %v2074_v40 = vmov 30   ;;  %v2075_v41 = vmov 53   ;;  %v2076_v42 = vmov 31  }
  0x31   :  { %1813 = vset.pattern.permute.xlu1 %v2040_v5  ;;  %1814 = vset.pattern.permute.xlu0 %v2041_v6  ;;  %v2077_v43 = vmov 56   ;;  %v2078_v44 = vmov 42   ;;  %v2079_v45 = vmov 62   ;;  %v2080_v46 = vmov 43   ;;  %p2011_p5 = por %p2010_p4, %p2009_p3 }
  0x32   :  { %87 = vperm.xlu1 %1813, %v2211_v2   ;;  %99 = vperm.xlu0 %1814, %v2211_v2   ;;  %v2081_v47 = vmov 74   ;;  %v2082_v48 = vmov 33   ;;  %v2083_v49 = vmov 65   ;;  %v2084_v50 = vmov 34  }
  0x33   :  { %v2085_v51 = vmov 68   ;;  %v2086_v52 = vmov 36   ;;  %v2087_v53 = vmov 71   ;;  %v2088_v58 = vmov 37   ;;  %p2012_p6 = pnand %p2011_p5, %p2005_p2 }
  0x34   :  { %v2089_v62 = vmov 77  }
  0x36   :  { %1815 = vset.pattern.permute.xlu1 %v2042_v7  ;;  %1817 = vset.pattern.permute.xlu0 %v2043_v8  ;;  %v2291_v7 = vld [vmem:[#allocation5 + $0x48] sm:$0xff]  ;;  %v2293_v8 = vld [vmem:[#allocation5 + $0x50] sm:$0xff] }
  0x37   :  { %111 = vperm.xlu1 %1815, %v2211_v2   ;;  %131 = vperm.xlu0 %1817, %v2211_v2  }
  0x3b   :  { %1816 = vset.pattern.permute.xlu1 %v2044_v9  ;;  %1820 = vset.pattern.permute.xlu0 %v2045_v10  ;;  %v2295_v9 = vld [vmem:[#allocation5 + $0x58] sm:$0xff] }
  0x3c   :  { %119 = vperm.xlu1 %1816, %v2211_v2   ;;  %163 = vperm.xlu0 %1820, %v2211_v2  }
  0x40   :  { %1818 = vset.pattern.permute.xlu1 %v2046_v11  ;;  %1823 = vset.pattern.permute.xlu0 %v2047_v12 }
  0x41   :  { %143 = vperm.xlu1 %1818, %v2211_v2   ;;  %211 = vperm.xlu0 %1823, %v2211_v2  }
  0x45   :  { %1819 = vset.pattern.permute.xlu1 %v2048_v13  ;;  %1826 = vset.pattern.permute.xlu0 %v2049_v14 }
  0x46   :  { %151 = vperm.xlu1 %1819, %v2211_v2   ;;  %265 = vperm.xlu0 %1826, %v2211_v2  }
  0x4a   :  { %1821 = vset.pattern.permute.xlu1 %v2050_v15  ;;  %1829 = vset.pattern.permute.xlu0 %v2051_v16 }
  0x4b   :  { %179 = vperm.xlu1 %1821, %v2211_v2   ;;  %289 = vperm.xlu0 %1829, %v2211_v2  }
  0x4f   :  { %1822 = vset.pattern.permute.xlu1 %v2052_v17  ;;  %1832 = vset.pattern.permute.xlu0 %v2053_v18  ;;  %v2090_v17 = vmov 39  }
  0x50   :  { %195 = vperm.xlu1 %1822, %v2211_v2   ;;  %321 = vperm.xlu0 %1832, %v2211_v2  }
  0x54   :  { %1824 = vset.pattern.permute.xlu1 %v2054_v20  ;;  %1835 = vset.pattern.permute.xlu0 %v2055_v21 }
  0x55   :  { %245 = vperm.xlu1 %1824, %v2232_v19   ;;  %353 = vperm.xlu0 %1835, %v2211_v2  }
  0x59   :  { %1825 = vset.pattern.permute.xlu1 %v2056_v22  ;;  %1838 = vset.pattern.permute.xlu0 %v2057_v23 }
  0x5a   :  { %257 = vperm.xlu1 %1825, %v2211_v2   ;;  %397 = vperm.xlu0 %1838, %v2211_v2  }
  0x5e   :  { %1827 = vset.pattern.permute.xlu1 %v2058_v24  ;;  %1841 = vset.pattern.permute.xlu0 %v2059_v25 }
  0x5f   :  { %273 = vperm.xlu1 %1827, %v2211_v2   ;;  %457 = vperm.xlu0 %1841, %v2211_v2  }
  0x63   :  { %1828 = vset.pattern.permute.xlu1 %v2060_v26  ;;  %1844 = vset.pattern.permute.xlu0 %v2061_v27 }
  0x64   :  { %281 = vperm.xlu1 %1828, %v2211_v2   ;;  %481 = vperm.xlu0 %1844, %v2211_v2  }
  0x68   :  { %1830 = vset.pattern.permute.xlu1 %v2062_v28  ;;  %1847 = vset.pattern.permute.xlu0 %v2063_v29 }
  0x69   :  { %301 = vperm.xlu1 %1830, %v2211_v2   ;;  %513 = vperm.xlu0 %1847, %v2211_v2  }
  0x6d   :  { %1831 = vset.pattern.permute.xlu1 %v2064_v30  ;;  %1850 = vset.pattern.permute.xlu0 %v2065_v31 }
  0x6e   :  { %313 = vperm.xlu1 %1831, %v2211_v2   ;;  %545 = vperm.xlu0 %1850, %v2211_v2  }
  0x72   :  { %1833 = vset.pattern.permute.xlu1 %v2066_v32  ;;  %1853 = vset.pattern.permute.xlu0 %v2067_v33  ;;  %v2091_v33 = vmov 89  }
  0x73   :  { %333 = vperm.xlu1 %1833, %v2211_v2   ;;  %581 = vperm.xlu0 %1853, %v2211_v2  }
  0x77   :  { %1834 = vset.pattern.permute.xlu1 %v2068_v34  ;;  %1856 = vset.pattern.permute.xlu0 %v2069_v35 }
  0x78   :  { %345 = vperm.xlu1 %1834, %v2211_v2   ;;  %645 = vperm.xlu0 %1856, %v2232_v19  }
  0x7c   :  { %1836 = vset.pattern.permute.xlu1 %v2070_v36  ;;  %1859 = vset.pattern.permute.xlu0 %v2071_v37 }
  0x7d   :  { %365 = vperm.xlu1 %1836, %v2211_v2   ;;  %673 = vperm.xlu0 %1859, %v2211_v2  }
  0x81   :  { %1837 = vset.pattern.permute.xlu1 %v2072_v38  ;;  %1862 = vset.pattern.permute.xlu0 %v2073_v39  ;;  %v2092_v38 = vmov 40  }
  0x82   :  { %381 = vperm.xlu1 %1837, %v2211_v2   ;;  %701 = vperm.xlu0 %1862, %v2211_v2  }
  0x86   :  { %1839 = vset.pattern.permute.xlu1 %v2074_v40  ;;  %1865 = vset.pattern.permute.xlu0 %v2075_v41 }
  0x87   :  { %413 = vperm.xlu1 %1839, %v2211_v2   ;;  %733 = vperm.xlu0 %1865, %v2211_v2  }
  0x8b   :  { %1840 = vset.pattern.permute.xlu1 %v2076_v42  ;;  %1868 = vset.pattern.permute.xlu0 %v2077_v43 }
  0x8c   :  { %445 = vperm.xlu1 %1840, %v2232_v19   ;;  %765 = vperm.xlu0 %1868, %v2211_v2  }
  0x90   :  { %1842 = vset.pattern.permute.xlu1 %v2078_v44  ;;  %1871 = vset.pattern.permute.xlu0 %v2079_v45 }
  0x91   :  { %465 = vperm.xlu1 %1842, %v2211_v2   ;;  %813 = vperm.xlu0 %1871, %v2211_v2  }
  0x95   :  { %1843 = vset.pattern.permute.xlu1 %v2080_v46  ;;  %1874 = vset.pattern.permute.xlu0 %v2081_v47 }
  0x96   :  { %473 = vperm.xlu1 %1843, %v2211_v2   ;;  %865 = vperm.xlu0 %1874, %v2211_v2  }
  0x9a   :  { %1845 = vset.pattern.permute.xlu1 %v2082_v48  ;;  %1877 = vset.pattern.permute.xlu0 %v2083_v49  ;;  %v2093_v49 = vmov 45  }
  0x9b   :  { %489 = vperm.xlu1 %1845, %v2211_v2   ;;  %889 = vperm.xlu0 %1877, %v2211_v2  }
  0x9f   :  { %1846 = vset.pattern.permute.xlu1 %v2084_v50  ;;  %1880 = vset.pattern.permute.xlu0 %v2085_v51 }
  0xa0   :  { %501 = vperm.xlu1 %1846, %v2211_v2   ;;  %921 = vperm.xlu0 %1880, %v2211_v2  }
  0xa4   :  { %1848 = vset.pattern.permute.xlu1 %v2086_v52  ;;  %1883 = vset.pattern.permute.xlu0 %v2087_v53 }
  0xa5   :  { %521 = vperm.xlu1 %1848, %v2211_v2   ;;  %953 = vperm.xlu0 %1883, %v2211_v2  }
  0xa7   :  { %v72_v54 = vpop.permute.xlu1 %71  ;;  %v56_v55 = vpop.permute.xlu0 %55 }
  0xa8   :  { %v2289_v4 = vsub.f32 %v2268_v56, %v56_v55  ;;  %v2298_v10 = vsub.f32 %v2270_v57, %v56_v55  ;;  %v2301_v11 = vsub.f32 %v2272_v59, %v56_v55  ;;  %v2304_v12 = vsub.f32 %v2274_v60, %v56_v55 }
  0xa9   :  { %1849 = vset.pattern.permute.xlu1 %v2088_v58  ;;  %1886 = vset.pattern.permute.xlu0 %v2089_v62  ;;  %v2319_v18 = vsub.f32 %v2286_v3, %v72_v54  ;;  %v2323_v20 = vsub.f32 %v2291_v7, %v72_v54  ;;  %v2326_v21 = vsub.f32 %v2293_v8, %v72_v54  ;;  %v2094_v55 = vmov 80  }
  0xaa   :  { %533 = vperm.xlu1 %1849, %v2211_v2   ;;  %997 = vperm.xlu0 %1886, %v2211_v2   ;;  %v2329_v22 = vsub.f32 %v2295_v9, %v72_v54 }
  0xac   :  { %v80_v5 = vpop.permute.xlu1 %79  ;;  %v64_v6 = vpop.permute.xlu0 %63 }
  0xad   :  { %v2307_v13 = vsub.f32 %v2277_v61, %v64_v6  ;;  %v2310_v14 = vsub.f32 %v2279_v63, %v64_v6  ;;  %v2313_v15 = vsub.f32 %v2281_v0, %v64_v6  ;;  %v2316_v16 = vsub.f32 %v2283_v1, %v64_v6 }
  0xae   :  { %1851 = vset.pattern.permute.xlu1 %v2090_v17  ;;  %v82_v23 = vmul.f32 %v80_v5, %v2289_v4  ;;  %v83_v24 = vmul.f32 %v80_v5, %v2298_v10  ;;  %v84_v25 = vmul.f32 %v80_v5, %v2301_v11  ;;  %v85_v26 = vmul.f32 %v80_v5, %v2304_v12 }
  0xaf   :  { %553 = vperm.xlu1 %1851, %v2211_v2   ;;  %1889 = vset.pattern.permute.xlu0 %v2091_v33 }
  0xb0   :  { %1057 = vperm.xlu0 %1889, %v2211_v2  }
  0xb1   :  { %v88_v27 = vpop.permute.xlu1 %87  ;;  %v100_v28 = vpop.permute.xlu0 %99 }
  0xb2   :  { %v90_v29 = vmul.f32 %v88_v27, %v2307_v13  ;;  %v91_v30 = vmul.f32 %v88_v27, %v2310_v14  ;;  %v92_v31 = vmul.f32 %v88_v27, %v2313_v15  ;;  %v93_v32 = vmul.f32 %v88_v27, %v2316_v16 }
  0xb3   :  { %v102_v34 = vmul.f32 %v100_v28, %v2319_v18  ;;  %v103_v35 = vmul.f32 %v100_v28, %v2323_v20  ;;  %v104_v36 = vmul.f32 %v100_v28, %v2326_v21  ;;  %v105_v37 = vmul.f32 %v100_v28, %v2329_v22  ;;  %1852 = vset.pattern.permute.xlu1 %v2092_v38 }
  0xb4   :  { %v94_v39 = vadd.f32 %v90_v29, %v82_v23  ;;  %v95_v40 = vadd.f32 %v91_v30, %v83_v24  ;;  %v96_v41 = vadd.f32 %v92_v31, %v84_v25  ;;  %v97_v42 = vadd.f32 %v93_v32, %v85_v26  ;;  %565 = vperm.xlu1 %1852, %v2211_v2  }
  0xb5   :  { %1892 = vset.pattern.permute.xlu0 %v2094_v55  ;;  %v2095_v27 = vmov 46  }
  0xb6   :  { %v2345_v43 = vadd.f32 %v102_v34, %v94_v39  ;;  %v2347_v44 = vadd.f32 %v103_v35, %v95_v40  ;;  %v2349_v45 = vadd.f32 %v104_v36, %v96_v41  ;;  %v2351_v46 = vadd.f32 %v105_v37, %v97_v42  ;;  %v112_v47 = vpop.permute.xlu1 %111  ;;  %v132_v48 = vpop.permute.xlu0 %131  ;;  %1081 = vperm.xlu0 %1892, %v2211_v2  }
  0xb7   :  { %v114_v50 = vmul.f32 %v112_v47, %v2289_v4  ;;  %v115_v51 = vmul.f32 %v112_v47, %v2298_v10  ;;  %v116_v52 = vmul.f32 %v112_v47, %v2301_v11  ;;  %v117_v53 = vmul.f32 %v112_v47, %v2304_v12 }
  0xb8   :  { %1854 = vset.pattern.permute.xlu1 %v2093_v49  ;;  %v134_v17 = vmul.f32 %v132_v48, %v2319_v18  ;;  %v135_v23 = vmul.f32 %v132_v48, %v2323_v20  ;;  %v136_v24 = vmul.f32 %v132_v48, %v2326_v21  ;;  %v137_v25 = vmul.f32 %v132_v48, %v2329_v22 }
  0xb9   :  { %597 = vperm.xlu1 %1854, %v2211_v2   ;;  %v2096_v37 = vmov 83   ;;  %v174_v39 = vand.u32 2147483647, %v2345_v43  ;;  %v2097_v40 = vmov 57   ;;  %v175_v41 = vand.u32 2147483647, %v2347_v44 }
  0xba   :  { %1895 = vset.pattern.permute.xlu0 %v2096_v37  ;;  %v176_v42 = vand.u32 2147483647, %v2349_v45  ;;  %v177_v47 = vand.u32 2147483647, %v2351_v46 }
  0xbb   :  { %v120_v54 = vpop.permute.xlu1 %119  ;;  %v164_v26 = vpop.permute.xlu0 %163  ;;  %1113 = vperm.xlu0 %1895, %v2211_v2  }
  0xbc   :  { %v122_v58 = vmul.f32 %v120_v54, %v2307_v13  ;;  %v123_v62 = vmul.f32 %v120_v54, %v2310_v14  ;;  %v124_v5 = vmul.f32 %v120_v54, %v2313_v15  ;;  %v125_v6 = vmul.f32 %v120_v54, %v2316_v16 }
  0xbd   :  { %1855 = vset.pattern.permute.xlu1 %v2095_v27  ;;  %v166_v48 = vmul.f32 %v164_v26, %v2319_v18  ;;  %v167_v49 = vmul.f32 %v164_v26, %v2323_v20  ;;  %v2098_v54 = vmov 86   ;;  %v2100_v27 = vmov 92  }
  0xbe   :  { %v126_v28 = vadd.f32 %v122_v58, %v114_v50  ;;  %v127_v29 = vadd.f32 %v123_v62, %v115_v51  ;;  %v128_v30 = vadd.f32 %v124_v5, %v116_v52  ;;  %v129_v31 = vadd.f32 %v125_v6, %v117_v53  ;;  %613 = vperm.xlu1 %1855, %v2211_v2  }
  0xbf   :  { %v168_v50 = vmul.f32 %v164_v26, %v2326_v21  ;;  %v169_v51 = vmul.f32 %v164_v26, %v2329_v22  ;;  %1898 = vset.pattern.permute.xlu0 %v2098_v54 }
  0xc0   :  { %v144_v32 = vpop.permute.xlu1 %143  ;;  %v2368_v33 = vadd.f32 %v134_v17, %v126_v28  ;;  %v2370_v34 = vadd.f32 %v135_v23, %v127_v29  ;;  %v2372_v35 = vadd.f32 %v136_v24, %v128_v30  ;;  %v2374_v36 = vadd.f32 %v137_v25, %v129_v31  ;;  %v2376_v38 = vpop.permute.xlu0 %211  ;;  %1145 = vperm.xlu0 %1898, %v2211_v2  }
  0xc1   :  { %v146_v43 = vmul.f32 %v144_v32, %v2289_v4  ;;  %v147_v52 = vmul.f32 %v144_v32, %v2298_v10  ;;  %v148_v44 = vmul.f32 %v144_v32, %v2301_v11  ;;  %v149_v45 = vmul.f32 %v144_v32, %v2304_v12 }
  0xc2   :  { %1857 = vset.pattern.permute.xlu1 %v2097_v40  ;;  %v2099_v4 = vmov 58   ;;  %v190_v10 = vand.u32 2147483647, %v2368_v33  ;;  %v191_v11 = vand.u32 2147483647, %v2370_v34  ;;  %v2101_v32 = vmov 48  }
  0xc3   :  { %657 = vperm.xlu1 %1857, %v2211_v2   ;;  %v192_v12 = vand.u32 2147483647, %v2372_v35 }
  0xc4   :  { %1901 = vset.pattern.permute.xlu0 %v2100_v27 }
  0xc5   :  { %v152_v53 = vpop.permute.xlu1 %151  ;;  %v266_v46 = vpop.permute.xlu0 %265  ;;  %1181 = vperm.xlu0 %1901, %v2211_v2  }
  0xc6   :  { %v154_v18 = vmul.f32 %v152_v53, %v2307_v13  ;;  %v155_v20 = vmul.f32 %v152_v53, %v2310_v14  ;;  %v156_v21 = vmul.f32 %v152_v53, %v2313_v15  ;;  %v157_v22 = vmul.f32 %v152_v53, %v2316_v16 }
  0xc7   :  { %1858 = vset.pattern.permute.xlu1 %v2099_v4  ;;  %v2401_v55 = vsub.f32 %v2277_v61, %v266_v46  ;;  %v193_v16 = vand.u32 2147483647, %v2374_v36  ;;  %v2406_v62 = vsub.f32 %v2279_v63, %v266_v46  ;;  %v2409_v5 = vsub.f32 %v2281_v0, %v266_v46 }
  0xc8   :  { %665 = vperm.xlu1 %1858, %v2211_v2   ;;  %v158_v13 = vadd.f32 %v154_v18, %v146_v43  ;;  %v159_v14 = vadd.f32 %v155_v20, %v147_v52  ;;  %v160_v15 = vadd.f32 %v156_v21, %v148_v44  ;;  %v161_v58 = vadd.f32 %v157_v22, %v149_v45 }
  0xc9   :  { %v271_v44 = vsub.f32 %v2283_v1, %v266_v46 }
  0xca   :  { %v180_v6 = vpop.permute.xlu1 %179  ;;  %v170_v17 = vadd.f32 %v166_v48, %v158_v13  ;;  %v171_v23 = vadd.f32 %v167_v49, %v159_v14  ;;  %v172_v24 = vadd.f32 %v168_v50, %v160_v15  ;;  %v173_v25 = vadd.f32 %v169_v51, %v161_v58  ;;  %v290_v26 = vpop.permute.xlu0 %289 }
  0xcb   :  { %v182_v28 = vsub.f32 %v174_v39, %v180_v6  ;;  %v183_v29 = vsub.f32 %v175_v41, %v180_v6  ;;  %v184_v30 = vsub.f32 %v176_v42, %v180_v6  ;;  %v185_v31 = vsub.f32 %v177_v47, %v180_v6 }
  0xcc   :  { %1860 = vset.pattern.permute.xlu1 %v2101_v32  ;;  %v206_v33 = vand.u32 2147483647, %v170_v17  ;;  %v207_v34 = vand.u32 2147483647, %v171_v23  ;;  %v208_v35 = vand.u32 2147483647, %v172_v24  ;;  %v2413_v36 = vmul.f32 %v290_v26, %v2401_v55 }
  0xcd   :  { %v186_v37 = vmax.f32 %v182_v28, 0.0  ;;  %v187_v40 = vmax.f32 %v183_v29, 0.0  ;;  %v188_v48 = vmax.f32 %v184_v30, 0.0  ;;  %v189_v49 = vmax.f32 %v185_v31, 0.0  ;;  %681 = vperm.xlu1 %1860, %v2211_v2  }
  0xce   :  { %v209_v39 = vand.u32 2147483647, %v173_v25  ;;  %v214_v41 = vsub.f32 %v206_v33, %v2376_v38  ;;  %v215_v42 = vsub.f32 %v207_v34, %v2376_v38  ;;  %v216_v47 = vsub.f32 %v208_v35, %v2376_v38 }
  0xcf   :  { %v222_v50 = vmul.f32 %v186_v37, %v186_v37  ;;  %v223_v51 = vmul.f32 %v187_v40, %v187_v40  ;;  %v224_v43 = vmul.f32 %v188_v48, %v188_v48  ;;  %v196_v52 = vpop.permute.xlu1 %195  ;;  %v322_v20 = vpop.permute.xlu0 %321  ;;  %v2102_v14 = vmov 49  }
  0xd0   :  { %v217_v45 = vsub.f32 %v209_v39, %v2376_v38  ;;  %v218_v53 = vmax.f32 %v214_v41, 0.0  ;;  %v219_v54 = vmax.f32 %v215_v42, 0.0  ;;  %v220_v18 = vmax.f32 %v216_v47, 0.0 }
  0xd1   :  { %v198_v21 = vsub.f32 %v190_v10, %v196_v52  ;;  %v199_v22 = vsub.f32 %v191_v11, %v196_v52  ;;  %v200_v4 = vsub.f32 %v192_v12, %v196_v52  ;;  %v201_v13 = vsub.f32 %v193_v16, %v196_v52  ;;  %1861 = vset.pattern.permute.xlu1 %v2102_v14 }
  0xd2   :  { %v225_v15 = vmul.f32 %v189_v49, %v189_v49  ;;  %v221_v58 = vmax.f32 %v217_v45, 0.0  ;;  %v234_v6 = vmul.f32 %v218_v53, %v218_v53  ;;  %v235_v17 = vmul.f32 %v219_v54, %v219_v54  ;;  %689 = vperm.xlu1 %1861, %v2211_v2  }
  0xd3   :  { %v202_v23 = vmax.f32 %v198_v21, 0.0  ;;  %v203_v46 = vmax.f32 %v199_v22, 0.0  ;;  %v204_v24 = vmax.f32 %v200_v4, 0.0  ;;  %v205_v38 = vmax.f32 %v201_v13, 0.0 }
  0xd4   :  { %v236_v25 = vmul.f32 %v220_v18, %v220_v18  ;;  %v2422_v27 = vpop.permute.xlu1 %245  ;;  %v2425_v10 = vmul.f32 %v290_v26, %v2406_v62  ;;  %v2428_v11 = vmul.f32 %v290_v26, %v2409_v5  ;;  %v2430_v12 = vmul.f32 %v290_v26, %v271_v44  ;;  %v354_v16 = vpop.permute.xlu0 %353 }
  0xd5   :  { %v226_v28 = vmul.f32 %v202_v23, %v202_v23  ;;  %v227_v29 = vmul.f32 %v203_v46, %v203_v46  ;;  %v228_v30 = vmul.f32 %v204_v24, %v204_v24  ;;  %v229_v31 = vmul.f32 %v205_v38, %v205_v38 }
  0xd6   :  { %v237_v32 = vmul.f32 %v221_v58, %v221_v58  ;;  %v2103_v33 = vmov 51   ;;  %v2433_v34 = vmul.f32 %v322_v20, %v2401_v55  ;;  %v2436_v35 = vmul.f32 %v322_v20, %v2406_v62 }
  0xd7   :  { %1863 = vset.pattern.permute.xlu1 %v2103_v33  ;;  %v2439_v37 = vmul.f32 %v322_v20, %v2409_v5  ;;  %v230_v40 = vadd.f32 %v226_v28, %v222_v50  ;;  %v231_v26 = vadd.f32 %v227_v29, %v223_v51  ;;  %v232_v48 = vadd.f32 %v228_v30, %v224_v43 }
  0xd8   :  { %v233_v49 = vadd.f32 %v229_v31, %v225_v15  ;;  %713 = vperm.xlu1 %1863, %v2211_v2   ;;  %v2442_v39 = vmul.f32 %v322_v20, %v271_v44  ;;  %v2445_v41 = vmul.f32 %v354_v16, %v2401_v55  ;;  %v2448_v42 = vmul.f32 %v354_v16, %v2406_v62 }
  0xd9   :  { %v2451_v47 = vmul.f32 %v354_v16, %v2409_v5  ;;  %v238_v52 = vadd.f32 %v234_v6, %v230_v40  ;;  %v239_v45 = vadd.f32 %v235_v17, %v231_v26  ;;  %v240_v53 = vadd.f32 %v236_v25, %v232_v48  ;;  %v258_v51 = vpop.permute.xlu1 %257  ;;  %v2453_v43 = vpop.permute.xlu0 %397 }
  0xda   :  { %v241_v50 = vadd.f32 %v237_v32, %v233_v49  ;;  %v2104_v54 = vmov 52   ;;  %v2455_v18 = vmul.f32 %v354_v16, %v271_v44  ;;  %v2105_v62 = vmov 54  }
  0xdb   :  { %v2106_v44 = vmov 95   ;;  %v2107_v15 = vmov 55   ;;  %vm247_vm1 = vcmp.eq.s32.totalorder %v2422_v27, 1  ;;  %v2483_v16 = vsub.f32 %v2268_v56, %v258_v51 }
  0xdc   :  { %1864 = vset.pattern.permute.xlu1 %v2104_v54  ;;  %1904 = vset.pattern.permute.xlu0 %v2106_v44  ;;  %v2476_v38 = vsel %vm247_vm1, %v238_v52, 1e+08  ;;  %v2480_v25 = vsel %vm247_vm1, %v239_v45, 1e+08  ;;  %v2108_v28 = vmov 60   ;;  %v2498_v40 = vsub.f32 %v2270_v57, %v258_v51 }
  0xdd   :  { %721 = vperm.xlu1 %1864, %v2211_v2   ;;  %1245 = vperm.xlu0 %1904, %v2232_v19   ;;  %v2495_v33 = vsel %vm247_vm1, %v240_v53, 1e+08  ;;  %v2504_v26 = vsub.f32 %v2274_v60, %v258_v51  ;;  %v2509_v48 = vsel %vm247_vm1, %v241_v50, 1e+08  ;;  %v2109_v44 = vmov 61  }
  0xde   :  { %v274_v55 = vpop.permute.xlu1 %273  ;;  %v458_v20 = vpop.permute.xlu0 %457 }
  0xdf   :  { %v460_v5 = vsub.f32 %v2268_v56, %v458_v20  ;;  %v461_v21 = vsub.f32 %v2270_v57, %v458_v20  ;;  %v462_v22 = vsub.f32 %v2272_v59, %v458_v20  ;;  %v463_v4 = vsub.f32 %v2274_v60, %v458_v20 }
  0xe0   :  { %v2501_v56 = vsub.f32 %v2272_v59, %v258_v51  ;;  %v2514_v45 = vsub.f32 %v2286_v3, %v274_v55  ;;  %v2517_v57 = vsub.f32 %v2291_v7, %v274_v55  ;;  %v2520_v59 = vsub.f32 %v2293_v8, %v274_v55 }
  0xe1   :  { %1866 = vset.pattern.permute.xlu1 %v2105_v62  ;;  %v2523_v60 = vsub.f32 %v2295_v9, %v274_v55 }
  0xe2   :  { %745 = vperm.xlu1 %1866, %v2211_v2  }
  0xe3   :  { %v282_v13 = vpop.permute.xlu1 %281  ;;  %v482_v14 = vpop.permute.xlu0 %481 }
  0xe4   :  { %v2463_v58 = vmul.f32 %v482_v14, %v460_v5  ;;  %v2465_v6 = vmul.f32 %v482_v14, %v461_v21  ;;  %v2467_v17 = vmul.f32 %v482_v14, %v462_v22  ;;  %v2469_v23 = vmul.f32 %v482_v14, %v463_v4 }
  0xe5   :  { %v284_v27 = vmul.f32 %v282_v13, %v2483_v16  ;;  %v285_v14 = vmul.f32 %v282_v13, %v2498_v40  ;;  %v287_v52 = vmul.f32 %v282_v13, %v2504_v26 }
  0xe6   :  { %1867 = vset.pattern.permute.xlu1 %v2107_v15 }
  0xe7   :  { %753 = vperm.xlu1 %1867, %v2211_v2  }
  0xe8   :  { %v302_v46 = vpop.permute.xlu1 %301  ;;  %v514_v24 = vpop.permute.xlu0 %513 }
  0xe9   :  { %v2485_v29 = vmul.f32 %v514_v24, %v460_v5  ;;  %v2487_v30 = vmul.f32 %v514_v24, %v461_v21  ;;  %v2489_v31 = vmul.f32 %v514_v24, %v462_v22  ;;  %v2491_v32 = vmul.f32 %v514_v24, %v463_v4 }
  0xea   :  { %v304_v49 = vmul.f32 %v302_v46, %v2514_v45 }
  0xeb   :  { %1869 = vset.pattern.permute.xlu1 %v2108_v28  ;;  %3292 = vst [vmem:[#allocation12_spill] sm:$0xff] %v2485_v29  ;;  %3293 = vst [vmem:[#allocation13_spill] sm:$0xff] %v2487_v30  ;;  %v286_v28 = vmul.f32 %v282_v13, %v2501_v56 }
  0xec   :  { %3294 = vst [vmem:[#allocation14_spill] sm:$0xff] %v2489_v31  ;;  %3295 = vst [vmem:[#allocation15_spill] sm:$0xff] %v2491_v32  ;;  %781 = vperm.xlu1 %1869, %v2211_v2   ;;  %v305_v32 = vmul.f32 %v302_v46, %v2517_v57 }
  0xed   :  { %v314_v53 = vpop.permute.xlu1 %313  ;;  %v546_v62 = vpop.permute.xlu0 %545 }
  0xee   :  { %v316_v50 = vmul.f32 %v314_v53, %v2483_v16  ;;  %v317_v51 = vmul.f32 %v314_v53, %v2498_v40  ;;  %v318_v54 = vmul.f32 %v314_v53, %v2501_v56  ;;  %v319_v20 = vmul.f32 %v314_v53, %v2504_v26 }
  0xef   :  { %v2531_v15 = vmul.f32 %v546_v62, %v460_v5  ;;  %v2533_v55 = vmul.f32 %v546_v62, %v461_v21  ;;  %v2535_v24 = vmul.f32 %v546_v62, %v462_v22  ;;  %v306_v53 = vmul.f32 %v302_v46, %v2520_v59 }
  0xf0   :  { %1870 = vset.pattern.permute.xlu1 %v2109_v44  ;;  %v307_v44 = vmul.f32 %v302_v46, %v2523_v60  ;;  %v2544_v5 = vmul.f32 %v546_v62, %v463_v4  ;;  %v328_v22 = vadd.f32 %v2433_v34, %v316_v50  ;;  %v331_v13 = vadd.f32 %v2442_v39, %v319_v20 }
  0xf1   :  { %3296 = vst [vmem:[#allocation16_spill] sm:$0xff] %v2531_v15  ;;  %3297 = vst [vmem:[#allocation17_spill] sm:$0xff] %v2533_v55  ;;  %797 = vperm.xlu1 %1870, %v2211_v2   ;;  %v330_v55 = vadd.f32 %v2439_v37, %v318_v54  ;;  %v2110_v15 = vmov 107   ;;  %v296_v34 = vadd.f32 %v2413_v36, %v284_v27  ;;  %v298_v37 = vadd.f32 %v2428_v11, %v286_v28 }
  0xf2   :  { %3298 = vst [vmem:[#allocation18_spill] sm:$0xff] %v2535_v24  ;;  %v334_v21 = vpop.permute.xlu1 %333  ;;  %v329_v24 = vadd.f32 %v2436_v35, %v317_v51  ;;  %1907 = vset.pattern.permute.xlu0 %v2110_v15  ;;  %v297_v35 = vadd.f32 %v2425_v10, %v285_v14  ;;  %v299_v39 = vadd.f32 %v2430_v12, %v287_v52  ;;  %v2111_v46 = vmov 63   ;;  %v2559_v50 = vpop.permute.xlu0 %581 }
  0xf3   :  { %v336_v31 = vmul.f32 %v334_v21, %v2514_v45  ;;  %v337_v30 = vmul.f32 %v334_v21, %v2517_v57  ;;  %v338_v29 = vmul.f32 %v334_v21, %v2520_v59  ;;  %v339_v4 = vmul.f32 %v334_v21, %v2523_v60  ;;  %1273 = vperm.xlu0 %1907, %v2211_v2  }
  0xf4   :  { %v2562_v15 = vadd.f32 %v304_v49, %v296_v34  ;;  %v2564_v21 = vadd.f32 %v305_v32, %v297_v35  ;;  %v2566_v36 = vadd.f32 %v306_v53, %v298_v37  ;;  %v2568_v10 = vadd.f32 %v307_v44, %v299_v39 }
  0xf5   :  { %1872 = vset.pattern.permute.xlu1 %v2111_v46  ;;  %v340_v51 = vadd.f32 %v336_v31, %v328_v22  ;;  %v341_v54 = vadd.f32 %v337_v30, %v329_v24  ;;  %v342_v20 = vadd.f32 %v338_v29, %v330_v55  ;;  %v343_v62 = vadd.f32 %v339_v4, %v331_v13 }
  0xf6   :  { %845 = vperm.xlu1 %1872, %v2232_v19   ;;  %v2112_v14 = vmov 98   ;;  %v2113_v44 = vmov 73   ;;  %v379_v39 = vand.u32 2147483647, %v2568_v10 }
  0xf7   :  { %v346_v11 = vpop.permute.xlu1 %345  ;;  %v392_v12 = vand.u32 2147483647, %v340_v51  ;;  %v393_v52 = vand.u32 2147483647, %v341_v54  ;;  %v394_v27 = vand.u32 2147483647, %v342_v20  ;;  %1910 = vset.pattern.permute.xlu0 %v2112_v14  ;;  %v2574_v32 = vpop.permute.xlu0 %645 }
  0xf8   :  { %v348_v28 = vmul.f32 %v346_v11, %v2483_v16  ;;  %v349_v30 = vmul.f32 %v346_v11, %v2498_v40  ;;  %v350_v29 = vmul.f32 %v346_v11, %v2501_v56  ;;  %v351_v31 = vmul.f32 %v346_v11, %v2504_v26  ;;  %1301 = vperm.xlu0 %1910, %v2211_v2  }
  0xf9   :  { %v395_v49 = vand.u32 2147483647, %v343_v62  ;;  %v400_v55 = vsub.f32 %v392_v12, %v2453_v43  ;;  %v401_v24 = vsub.f32 %v393_v52, %v2453_v43  ;;  %v402_v53 = vsub.f32 %v394_v27, %v2453_v43 }
  0xfa   :  { %1873 = vset.pattern.permute.xlu1 %v2113_v44  ;;  %v376_v16 = vand.u32 2147483647, %v2562_v15  ;;  %v377_v40 = vand.u32 2147483647, %v2564_v21  ;;  %v378_v56 = vand.u32 2147483647, %v2566_v36  ;;  %v360_v34 = vadd.f32 %v2445_v41, %v348_v28 }
  0xfb   :  { %857 = vperm.xlu1 %1873, %v2211_v2   ;;  %v403_v26 = vsub.f32 %v395_v49, %v2453_v43  ;;  %v404_v22 = vmax.f32 %v400_v55, 0.0  ;;  %v405_v13 = vmax.f32 %v401_v24, 0.0  ;;  %v406_v4 = vmax.f32 %v402_v53, 0.0 }
  0xfc   :  { %v361_v35 = vadd.f32 %v2448_v42, %v349_v30  ;;  %v366_v37 = vpop.permute.xlu1 %365  ;;  %v674_v46 = vpop.permute.xlu0 %673  ;;  %v362_v2 = vadd.f32 %v2451_v47, %v350_v29  ;;  %v363_v51 = vadd.f32 %v2455_v18, %v351_v31  ;;  %v2114_v62 = vmov 101   ;;  %v2594_v47 = vld [vmem:[#allocation2] sm:$0xff] }
  0xfd   :  { %v407_v54 = vmax.f32 %v403_v26, 0.0  ;;  %v428_v20 = vmul.f32 %v404_v22, %v404_v22  ;;  %1913 = vset.pattern.permute.xlu0 %v2114_v62  ;;  %v368_v43 = vmul.f32 %v366_v37, %v2514_v45  ;;  %v369_v15 = vmul.f32 %v366_v37, %v2517_v57 }
  0xfe   :  { %v370_v41 = vmul.f32 %v366_v37, %v2520_v59  ;;  %v371_v42 = vmul.f32 %v366_v37, %v2523_v60  ;;  %v2115_v21 = vmov 75   ;;  %v429_v36 = vmul.f32 %v405_v13, %v405_v13  ;;  %1333 = vperm.xlu0 %1913, %v2594_v47  }
  0xff   :  { %1875 = vset.pattern.permute.xlu1 %v2115_v21  ;;  %v430_v10 = vmul.f32 %v406_v4, %v406_v4  ;;  %v431_v11 = vmul.f32 %v407_v54, %v407_v54  ;;  %v2598_v18 = vsub.f32 %v2286_v3, %v674_v46  ;;  %v372_v12 = vadd.f32 %v368_v43, %v360_v34 }
 0x100   :  { %873 = vperm.xlu1 %1875, %v2594_v47   ;;  %v373_v45 = vadd.f32 %v369_v15, %v361_v35  ;;  %v374_v52 = vadd.f32 %v370_v41, %v362_v2  ;;  %v677_v57 = vsub.f32 %v2291_v7, %v674_v46  ;;  %v375_v59 = vadd.f32 %v371_v42, %v363_v51 }
 0x101   :  { %v382_v60 = vpop.permute.xlu1 %381  ;;  %v678_v27 = vsub.f32 %v2293_v8, %v674_v46  ;;  %v2604_v14 = vsub.f32 %v2295_v9, %v674_v46  ;;  %v702_v28 = vpop.permute.xlu0 %701  ;;  %v2116_v55 = vmov 64   ;;  %v408_v24 = vand.u32 2147483647, %v372_v12 }
 0x102   :  { %v384_v30 = vsub.f32 %v376_v16, %v382_v60  ;;  %v385_v29 = vsub.f32 %v377_v40, %v382_v60  ;;  %v386_v31 = vsub.f32 %v378_v56, %v382_v60  ;;  %v387_v49 = vsub.f32 %v379_v39, %v382_v60 }
 0x103   :  { %v409_v53 = vand.u32 2147483647, %v373_v45  ;;  %v410_v44 = vand.u32 2147483647, %v374_v52  ;;  %v2607_v26 = vmul.f32 %v702_v28, %v2598_v18  ;;  %v2117_v35 = vmov 122  }
 0x104   :  { %1876 = vset.pattern.permute.xlu1 %v2116_v55  ;;  %v388_v22 = vmax.f32 %v384_v30, 0.0  ;;  %v389_v13 = vmax.f32 %v385_v29, 0.0  ;;  %v390_v4 = vmax.f32 %v386_v31, 0.0  ;;  %v391_v34 = vmax.f32 %v387_v49, 0.0  ;;  %1916 = vset.pattern.permute.xlu0 %v2117_v35 }
 0x105   :  { %881 = vperm.xlu1 %1876, %v2594_v47   ;;  %v411_v16 = vand.u32 2147483647, %v375_v59  ;;  %v2610_v40 = vmul.f32 %v702_v28, %v677_v57  ;;  %v2612_v56 = vmul.f32 %v702_v28, %v678_v27  ;;  %v2615_v37 = vmul.f32 %v702_v28, %v2604_v14  ;;  %1465 = vperm.xlu0 %1916, %v2594_v47  }
 0x106   :  { %v424_v39 = vmul.f32 %v388_v22, %v388_v22  ;;  %v425_v46 = vmul.f32 %v389_v13, %v389_v13  ;;  %v426_v2 = vmul.f32 %v390_v4, %v390_v4  ;;  %v427_v51 = vmul.f32 %v391_v34, %v391_v34  ;;  %v414_v54 = vpop.permute.xlu1 %413  ;;  %v734_v42 = vpop.permute.xlu0 %733 }
 0x107   :  { %v416_v62 = vsub.f32 %v408_v24, %v414_v54  ;;  %v417_v43 = vsub.f32 %v409_v53, %v414_v54  ;;  %v418_v15 = vsub.f32 %v410_v44, %v414_v54  ;;  %v419_v41 = vsub.f32 %v411_v16, %v414_v54 }
 0x108   :  { %v2118_v21 = vmov 66   ;;  %v432_v12 = vadd.f32 %v428_v20, %v424_v39  ;;  %v433_v45 = vadd.f32 %v429_v36, %v425_v46  ;;  %v434_v52 = vadd.f32 %v430_v10, %v426_v2 }
 0x109   :  { %1878 = vset.pattern.permute.xlu1 %v2118_v21  ;;  %v435_v59 = vadd.f32 %v431_v11, %v427_v51  ;;  %v420_v60 = vmax.f32 %v416_v62, 0.0  ;;  %v421_v28 = vmax.f32 %v417_v43, 0.0  ;;  %v422_v30 = vmax.f32 %v418_v15, 0.0 }
 0x10a   :  { %v423_v29 = vmax.f32 %v419_v41, 0.0  ;;  %901 = vperm.xlu1 %1878, %v2594_v47   ;;  %v2620_v31 = vmul.f32 %v734_v42, %v2598_v18  ;;  %v2622_v49 = vmul.f32 %v734_v42, %v677_v57  ;;  %v2624_v55 = vmul.f32 %v734_v42, %v678_v27 }
 0x10b   :  { %v2627_v24 = vmul.f32 %v734_v42, %v2604_v14  ;;  %v436_v20 = vmul.f32 %v420_v60, %v420_v60  ;;  %v437_v36 = vmul.f32 %v421_v28, %v421_v28  ;;  %v438_v10 = vmul.f32 %v422_v30, %v422_v30  ;;  %v446_v53 = vpop.permute.xlu1 %445  ;;  %v766_v44 = vpop.permute.xlu0 %765 }
 0x10c   :  { %v439_v11 = vmul.f32 %v423_v29, %v423_v29  ;;  %v254_v22 = vmin.f32 %v2495_v33, 1e+08  ;;  %v2631_v13 = vmul.f32 %v766_v44, %v2598_v18  ;;  %v2633_v4 = vmul.f32 %v766_v44, %v677_v57 }
 0x10d   :  { %v2635_v34 = vmul.f32 %v766_v44, %v678_v27  ;;  %v440_v35 = vadd.f32 %v436_v20, %v432_v12  ;;  %v441_v16 = vadd.f32 %v437_v36, %v433_v45  ;;  %v442_v39 = vadd.f32 %v438_v10, %v434_v52 }
 0x10e   :  { %v443_v46 = vadd.f32 %v439_v11, %v435_v59  ;;  %v2119_v2 = vmov 67   ;;  %v255_v51 = vmin.f32 %v2509_v48, 1e+08  ;;  %vm447_vm2 = vcmp.eq.s32.totalorder %v446_v53, 1 }
 0x10f   :  { %1879 = vset.pattern.permute.xlu1 %v2119_v2  ;;  %v2640_v33 = vmul.f32 %v766_v44, %v2604_v14  ;;  %v448_v18 = vsel %vm447_vm2, %v440_v35, 1e+08  ;;  %v449_v54 = vsel %vm447_vm2, %v441_v16, 1e+08  ;;  %v450_v57 = vsel %vm447_vm2, %v442_v39, 1e+08 }
 0x110   :  { %913 = vperm.xlu1 %1879, %v2594_v47   ;;  %v2120_v62 = vmov 112   ;;  %v451_v27 = vsel %vm447_vm2, %v443_v46, 1e+08  ;;  %v3299_v43 = vmin.f32 %v2476_v38, 1e+08  ;;  %v2650_v48 = vmin.f32 %v254_v22, %v450_v57  ;;  %v466_v21 = vpop.permute.xlu1 %465 }
 0x111   :  { %1919 = vset.pattern.permute.xlu0 %v2120_v62  ;;  %v3300_v41 = vmin.f32 %v2480_v25, 1e+08  ;;  %v2653_v14 = vmin.f32 %v255_v51, %v451_v27  ;;  %v2121_v12 = vmov 69   ;;  %v2122_v45 = vmov 116  }
 0x112   :  { %v2644_v15 = vmin.f32 %v3299_v43, %v448_v18  ;;  %1481 = vperm.xlu0 %1919, %v2594_v47   ;;  %v2123_v52 = vmov 70   ;;  %v2659_v25 = vsub.f32 %v2277_v61, %v466_v21  ;;  %v2662_v59 = vsub.f32 %v2279_v63, %v466_v21 }
 0x113   :  { %v2648_v42 = vmin.f32 %v3300_v41, %v449_v54  ;;  %v2665_v60 = vsub.f32 %v2281_v0, %v466_v21  ;;  %v2668_v28 = vsub.f32 %v2283_v1, %v466_v21  ;;  %v2124_v30 = vmov 117  }
 0x114   :  { %1881 = vset.pattern.permute.xlu1 %v2121_v12  ;;  %v2125_v10 = vmov 72   ;;  %v2126_v44 = vmov 120   ;;  %v2127_v2 = vmov 76   ;;  %v2128_v21 = vmov 78  }
 0x115   :  { %933 = vperm.xlu1 %1881, %v2594_v47   ;;  %v474_v38 = vpop.permute.xlu1 %473  ;;  %vm647_vm3 = vcmp.eq.s32.totalorder %v2574_v32, 1 }
 0x116   :  { %1922 = vset.pattern.permute.xlu0 %v2122_v45  ;;  %v2677_v0 = vsub.f32 %v2286_v3, %v474_v38  ;;  %v2680_v1 = vsub.f32 %v2291_v7, %v474_v38  ;;  %v2683_v11 = vsub.f32 %v2293_v8, %v474_v38  ;;  %v2686_v53 = vsub.f32 %v2295_v9, %v474_v38 }
 0x117   :  { %1521 = vperm.xlu0 %1922, %v2594_v47  }
 0x119   :  { %1882 = vset.pattern.permute.xlu1 %v2123_v52  ;;  %v2129_v52 = vmov 79  }
 0x11a   :  { %945 = vperm.xlu1 %1882, %v2594_v47   ;;  %v490_v29 = vpop.permute.xlu1 %489 }
 0x11b   :  { %1925 = vset.pattern.permute.xlu0 %v2124_v30  ;;  %v492_v20 = vmul.f32 %v490_v29, %v2659_v25  ;;  %v493_v36 = vmul.f32 %v490_v29, %v2662_v59  ;;  %v494_v61 = vmul.f32 %v490_v29, %v2665_v60  ;;  %v495_v63 = vmul.f32 %v490_v29, %v2668_v28 }
 0x11c   :  { %1533 = vperm.xlu0 %1925, %v2594_v47  }
 0x11d   :  { %v496_v35 = vadd.f32 %v492_v20, %v2463_v58  ;;  %v497_v16 = vadd.f32 %v493_v36, %v2465_v6  ;;  %v498_v39 = vadd.f32 %v494_v61, %v2467_v17  ;;  %v499_v3 = vadd.f32 %v495_v63, %v2469_v23 }
 0x11e   :  { %1884 = vset.pattern.permute.xlu1 %v2125_v10  ;;  %v2130_v61 = vmov 110   ;;  %v3301_v10 = vld [vmem:[#allocation12_spill] sm:$0xff] }
 0x11f   :  { %965 = vperm.xlu1 %1884, %v2594_v47   ;;  %v502_v22 = vpop.permute.xlu1 %501 }
 0x120   :  { %1928 = vset.pattern.permute.xlu0 %v2126_v44  ;;  %v504_v7 = vmul.f32 %v502_v22, %v2677_v0  ;;  %v505_v8 = vmul.f32 %v502_v22, %v2680_v1  ;;  %v506_v9 = vmul.f32 %v502_v22, %v2683_v11  ;;  %v507_v46 = vmul.f32 %v502_v22, %v2686_v53 }
 0x121   :  { %1565 = vperm.xlu0 %1928, %v2594_v47  }
 0x122   :  { %v508_v58 = vadd.f32 %v504_v7, %v496_v35  ;;  %v509_v6 = vadd.f32 %v505_v8, %v497_v16  ;;  %v510_v51 = vadd.f32 %v506_v9, %v498_v39  ;;  %v511_v17 = vadd.f32 %v507_v46, %v499_v3  ;;  %v3302_v39 = vld [vmem:[#allocation13_spill] sm:$0xff]  ;;  %v3303_v8 = vld [vmem:[#allocation14_spill] sm:$0xff]  ;;  %v3304_v46 = vld [vmem:[#allocation15_spill] sm:$0xff] }
 0x123   :  { %1885 = vset.pattern.permute.xlu1 %v2127_v2  ;;  %v2131_v7 = vmov 90  }
 0x124   :  { %981 = vperm.xlu1 %1885, %v2594_v47   ;;  %v522_v18 = vpop.permute.xlu1 %521  ;;  %v576_v23 = vand.u32 2147483647, %v508_v58  ;;  %v577_v54 = vand.u32 2147483647, %v509_v6  ;;  %v578_v57 = vand.u32 2147483647, %v510_v51 }
 0x125   :  { %v579_v62 = vand.u32 2147483647, %v511_v17  ;;  %v524_v38 = vmul.f32 %v522_v18, %v2659_v25  ;;  %v525_v30 = vmul.f32 %v522_v18, %v2662_v59  ;;  %v526_v29 = vmul.f32 %v522_v18, %v2665_v60  ;;  %1931 = vset.pattern.permute.xlu0 %v2130_v61 }
 0x126   :  { %v2699_v27 = vsub.f32 %v576_v23, %v2559_v50  ;;  %v2702_v43 = vsub.f32 %v577_v54, %v2559_v50  ;;  %v2705_v41 = vsub.f32 %v578_v57, %v2559_v50  ;;  %v527_v20 = vmul.f32 %v522_v18, %v2668_v28  ;;  %1413 = vperm.xlu0 %1931, %v2594_v47   ;;  %v3305_v54 = vld [vmem:[#allocation16_spill] sm:$0xff] }
 0x127   :  { %v2709_v12 = vsub.f32 %v579_v62, %v2559_v50  ;;  %v528_v44 = vadd.f32 %v524_v38, %v3301_v10  ;;  %v529_v3 = vadd.f32 %v525_v30, %v3302_v39  ;;  %v530_v9 = vadd.f32 %v526_v29, %v3303_v8 }
 0x128   :  { %1887 = vset.pattern.permute.xlu1 %v2128_v21  ;;  %v531_v2 = vadd.f32 %v527_v20, %v3304_v46  ;;  %v2132_v30 = vmov 126   ;;  %v2133_v29 = vmov 91  }
 0x129   :  { %1013 = vperm.xlu1 %1887, %v2594_v47   ;;  %v534_v45 = vpop.permute.xlu1 %533 }
 0x12a   :  { %v536_v36 = vmul.f32 %v534_v45, %v2677_v0  ;;  %v537_v50 = vmul.f32 %v534_v45, %v2680_v1  ;;  %v538_v22 = vmul.f32 %v534_v45, %v2683_v11  ;;  %v539_v35 = vmul.f32 %v534_v45, %v2686_v53  ;;  %1934 = vset.pattern.permute.xlu0 %v2132_v30 }
 0x12b   :  { %1613 = vperm.xlu0 %1934, %v2594_v47  }
 0x12c   :  { %v540_v58 = vadd.f32 %v536_v36, %v528_v44  ;;  %v541_v6 = vadd.f32 %v537_v50, %v529_v3  ;;  %v542_v23 = vadd.f32 %v538_v22, %v530_v9  ;;  %v3306_v36 = vld [vmem:[#allocation17_spill] sm:$0xff]  ;;  %v2134_v9 = vmov 81  }
 0x12d   :  { %1888 = vset.pattern.permute.xlu1 %v2129_v52 }
 0x12e   :  { %1045 = vperm.xlu1 %1888, %v2232_v19   ;;  %v554_v63 = vpop.permute.xlu1 %553  ;;  %v592_v20 = vand.u32 2147483647, %v540_v58 }
 0x12f   :  { %v556_v16 = vmul.f32 %v554_v63, %v2659_v25  ;;  %v557_v51 = vmul.f32 %v554_v63, %v2662_v59  ;;  %v558_v17 = vmul.f32 %v554_v63, %v2665_v60  ;;  %v559_v18 = vmul.f32 %v554_v63, %v2668_v28 }
 0x130   :  { %v543_v25 = vadd.f32 %v539_v35, %v531_v2  ;;  %v588_v59 = vmax.f32 %v2699_v27, 0.0  ;;  %v589_v60 = vmax.f32 %v2702_v43, 0.0  ;;  %v590_v28 = vmax.f32 %v2705_v41, 0.0 }
 0x131   :  { %v560_v57 = vadd.f32 %v556_v16, %v3305_v54  ;;  %v561_v61 = vadd.f32 %v557_v51, %v3306_v36  ;;  %v594_v63 = vand.u32 2147483647, %v542_v23  ;;  %v591_v27 = vmax.f32 %v2709_v12, 0.0 }
 0x132   :  { %1890 = vset.pattern.permute.xlu1 %v2131_v7  ;;  %v595_v10 = vand.u32 2147483647, %v543_v25  ;;  %v624_v7 = vmul.f32 %v588_v59, %v588_v59  ;;  %v626_v8 = vmul.f32 %v590_v28, %v590_v28  ;;  %v2135_v59 = vmov 82  }
 0x133   :  { %1065 = vperm.xlu1 %1890, %v2594_v47   ;;  %v566_v62 = vpop.permute.xlu1 %565  ;;  %v627_v12 = vmul.f32 %v591_v27, %v591_v27 }
 0x134   :  { %v568_v21 = vmul.f32 %v566_v62, %v2677_v0  ;;  %v569_v45 = vmul.f32 %v566_v62, %v2680_v1  ;;  %v570_v38 = vmul.f32 %v566_v62, %v2683_v11  ;;  %v571_v52 = vmul.f32 %v566_v62, %v2686_v53  ;;  %v3307_v0 = vld [vmem:[#allocation18_spill] sm:$0xff] }
 0x135   :  { %v562_v50 = vadd.f32 %v558_v17, %v3307_v0  ;;  %v563_v1 = vadd.f32 %v559_v18, %v2544_v5  ;;  %v593_v53 = vand.u32 2147483647, %v541_v6  ;;  %v625_v5 = vmul.f32 %v589_v60, %v589_v60 }
 0x136   :  { %v572_v11 = vadd.f32 %v568_v21, %v560_v57  ;;  %v573_v43 = vadd.f32 %v569_v45, %v561_v61 }
 0x137   :  { %1891 = vset.pattern.permute.xlu1 %v2133_v29  ;;  %v574_v41 = vadd.f32 %v570_v38, %v562_v50  ;;  %v575_v44 = vadd.f32 %v571_v52, %v563_v1 }
 0x138   :  { %1073 = vperm.xlu1 %1891, %v2594_v47   ;;  %v598_v22 = vpop.permute.xlu1 %597  ;;  %v608_v46 = vand.u32 2147483647, %v572_v11  ;;  %v609_v17 = vand.u32 2147483647, %v573_v43 }
 0x139   :  { %v600_v35 = vsub.f32 %v592_v20, %v598_v22  ;;  %v601_v16 = vsub.f32 %v593_v53, %v598_v22  ;;  %v602_v39 = vsub.f32 %v594_v63, %v598_v22  ;;  %v603_v3 = vsub.f32 %v595_v10, %v598_v22 }
 0x13a   :  { %v610_v18 = vand.u32 2147483647, %v574_v41  ;;  %v611_v23 = vand.u32 2147483647, %v575_v44  ;;  %v2136_v22 = vmov 84  }
 0x13b   :  { %v604_v2 = vmax.f32 %v600_v35, 0.0  ;;  %v605_v58 = vmax.f32 %v601_v16, 0.0  ;;  %v606_v6 = vmax.f32 %v602_v39, 0.0  ;;  %v607_v51 = vmax.f32 %v603_v3, 0.0 }
 0x13c   :  { %1893 = vset.pattern.permute.xlu1 %v2134_v9 }
 0x13d   :  { %1089 = vperm.xlu1 %1893, %v2594_v47   ;;  %v628_v25 = vmul.f32 %v604_v2, %v604_v2  ;;  %v629_v54 = vmul.f32 %v605_v58, %v605_v58  ;;  %v630_v57 = vmul.f32 %v606_v6, %v606_v6  ;;  %v631_v62 = vmul.f32 %v607_v51, %v607_v51  ;;  %v614_v21 = vpop.permute.xlu1 %613 }
 0x13e   :  { %v616_v45 = vsub.f32 %v608_v46, %v614_v21  ;;  %v617_v38 = vsub.f32 %v609_v17, %v614_v21  ;;  %v618_v52 = vsub.f32 %v610_v18, %v614_v21  ;;  %v619_v30 = vsub.f32 %v611_v23, %v614_v21  ;;  %v2768_v18 = vld [vmem:[#allocation5 + $0x20] sm:$0xff]  ;;  %v2779_v21 = vld [vmem:[#allocation5 + $0x38] sm:$0xff] }
 0x13f   :  { %v632_v60 = vadd.f32 %v628_v25, %v624_v7  ;;  %v633_v28 = vadd.f32 %v629_v54, %v625_v5  ;;  %v634_v29 = vadd.f32 %v630_v57, %v626_v8  ;;  %v635_v20 = vadd.f32 %v631_v62, %v627_v12  ;;  %v2773_v25 = vld [vmem:[#allocation5 + $0x28] sm:$0xff]  ;;  %v2776_v57 = vld [vmem:[#allocation5 + $0x30] sm:$0xff] }
 0x140   :  { %v620_v36 = vmax.f32 %v616_v45, 0.0  ;;  %v621_v61 = vmax.f32 %v617_v38, 0.0  ;;  %v622_v0 = vmax.f32 %v618_v52, 0.0  ;;  %v623_v50 = vmax.f32 %v619_v30, 0.0  ;;  %v2782_v52 = vld [vmem:[#allocation5] sm:$0xff] }
 0x141   :  { %1894 = vset.pattern.permute.xlu1 %v2135_v59  ;;  %v2137_v46 = vmov 85   ;;  %v2138_v58 = vmov 87   ;;  %v3286_v6 = vmov 127   ;;  %v2140_v12 = vmov 88   ;;  %v2785_v59 = vld [vmem:[#allocation5 + $0x8] sm:$0xff] }
 0x142   :  { %1101 = vperm.xlu1 %1894, %v2594_v47   ;;  %v658_v1 = vpop.permute.xlu1 %657  ;;  %v636_v11 = vmul.f32 %v620_v36, %v620_v36  ;;  %v637_v53 = vmul.f32 %v621_v61, %v621_v61  ;;  %v638_v63 = vmul.f32 %v622_v0, %v622_v0  ;;  %v639_v10 = vmul.f32 %v623_v50, %v623_v50 }
 0x143   :  { %1937 = vset.pattern.permute.xlu0 %v3286_v6  ;;  %v2141_v38 = vmov 93   ;;  %v660_v30 = vsub.f32 %v2782_v52, %v658_v1 }
 0x144   :  { %v640_v27 = vadd.f32 %v636_v11, %v632_v60  ;;  %v641_v43 = vadd.f32 %v637_v53, %v633_v28  ;;  %v642_v41 = vadd.f32 %v638_v63, %v634_v29  ;;  %v643_v44 = vadd.f32 %v639_v10, %v635_v20  ;;  %v2788_v28 = vld [vmem:[#allocation5 + $0x10] sm:$0xff]  ;;  %v2791_v20 = vld [vmem:[#allocation5 + $0x18] sm:$0xff] }
 0x145   :  { %v661_v60 = vsub.f32 %v2785_v59, %v658_v1  ;;  %v662_v29 = vsub.f32 %v2788_v28, %v658_v1  ;;  %3308 = vst [vmem:[#allocation12_spill] sm:$0xff] %v2791_v20  ;;  %v663_v36 = vsub.f32 %v2791_v20, %v658_v1 }
 0x146   :  { %1896 = vset.pattern.permute.xlu1 %v2136_v22  ;;  %v2748_v35 = vsel %vm647_vm3, %v640_v27, 1e+08  ;;  %v2750_v16 = vsel %vm647_vm3, %v641_v43, 1e+08  ;;  %v2752_v39 = vsel %vm647_vm3, %v642_v41, 1e+08 }
 0x147   :  { %1121 = vperm.xlu1 %1896, %v2594_v47   ;;  %v2754_v3 = vsel %vm647_vm3, %v643_v44, 1e+08  ;;  %v666_v8 = vpop.permute.xlu1 %665 }
 0x148   :  { %v2771_v23 = vsub.f32 %v2768_v18, %v666_v8  ;;  %v669_v54 = vsub.f32 %v2773_v25, %v666_v8  ;;  %v670_v62 = vsub.f32 %v2776_v57, %v666_v8  ;;  %v671_v45 = vsub.f32 %v2779_v21, %v666_v8 }
 0x14b   :  { %1897 = vset.pattern.permute.xlu1 %v2137_v46 }
 0x14c   :  { %1133 = vperm.xlu1 %1897, %v2594_v47   ;;  %v682_v2 = vpop.permute.xlu1 %681 }
 0x14d   :  { %v684_v46 = vmul.f32 %v682_v2, %v660_v30  ;;  %v686_v1 = vmul.f32 %v682_v2, %v662_v29 }
 0x150   :  { %1899 = vset.pattern.permute.xlu1 %v2138_v58  ;;  %v685_v58 = vmul.f32 %v682_v2, %v661_v60 }
 0x151   :  { %1153 = vperm.xlu1 %1899, %v2594_v47   ;;  %v690_v51 = vpop.permute.xlu1 %689 }
 0x152   :  { %v692_v61 = vmul.f32 %v690_v51, %v2771_v23  ;;  %v693_v0 = vmul.f32 %v690_v51, %v669_v54  ;;  %v694_v50 = vmul.f32 %v690_v51, %v670_v62  ;;  %v695_v11 = vmul.f32 %v690_v51, %v671_v45 }
 0x154   :  { %v696_v32 = vadd.f32 %v692_v61, %v684_v46  ;;  %v698_v7 = vadd.f32 %v694_v50, %v686_v1  ;;  %v814_v46 = vpop.permute.xlu0 %813 }
 0x155   :  { %1900 = vset.pattern.permute.xlu1 %v2140_v12  ;;  %v687_v12 = vmul.f32 %v682_v2, %v663_v36 }
 0x156   :  { %1165 = vperm.xlu1 %1900, %v2594_v47   ;;  %v708_v61 = vadd.f32 %v2607_v26, %v696_v32 }
 0x157   :  { %v714_v17 = vpop.permute.xlu1 %713  ;;  %v699_v19 = vadd.f32 %v695_v11, %v687_v12 }
 0x158   :  { %v716_v53 = vmul.f32 %v714_v17, %v660_v30  ;;  %v717_v63 = vmul.f32 %v714_v17, %v661_v60  ;;  %v718_v10 = vmul.f32 %v714_v17, %v662_v29  ;;  %v719_v27 = vmul.f32 %v714_v17, %v663_v36 }
 0x159   :  { %v697_v17 = vadd.f32 %v693_v0, %v685_v58  ;;  %v776_v26 = vand.u32 2147483647, %v708_v61  ;;  %v2145_v58 = vmov 96  }
 0x15a   :  { %1902 = vset.pattern.permute.xlu1 %v2141_v38  ;;  %v2142_v38 = vmov 94  }
 0x15b   :  { %1197 = vperm.xlu1 %1902, %v2594_v47   ;;  %v709_v0 = vadd.f32 %v2610_v40, %v697_v17 }
 0x15c   :  { %v722_v43 = vpop.permute.xlu1 %721 }
 0x15d   :  { %v724_v41 = vmul.f32 %v722_v43, %v2771_v23  ;;  %v725_v44 = vmul.f32 %v722_v43, %v669_v54  ;;  %v726_v22 = vmul.f32 %v722_v43, %v670_v62  ;;  %v727_v8 = vmul.f32 %v722_v43, %v671_v45 }
 0x15f   :  { %1903 = vset.pattern.permute.xlu1 %v2142_v38  ;;  %v728_v6 = vadd.f32 %v724_v41, %v716_v53  ;;  %v729_v9 = vadd.f32 %v725_v44, %v717_v63  ;;  %v730_v5 = vadd.f32 %v726_v22, %v718_v10  ;;  %v731_v51 = vadd.f32 %v727_v8, %v719_v27 }
 0x160   :  { %1213 = vperm.xlu1 %1903, %v2594_v47   ;;  %v2143_v10 = vmov 105   ;;  %v2144_v44 = vmov 106  }
 0x161   :  { %v2799_v20 = vadd.f32 %v2620_v31, %v728_v6  ;;  %v2802_v43 = vadd.f32 %v2622_v49, %v729_v9  ;;  %v2805_v2 = vadd.f32 %v2624_v55, %v730_v5  ;;  %v2808_v53 = vadd.f32 %v2627_v24, %v731_v51  ;;  %v746_v63 = vpop.permute.xlu1 %745 }
 0x162   :  { %v710_v31 = vadd.f32 %v2612_v56, %v698_v7  ;;  %v711_v49 = vadd.f32 %v2615_v37, %v699_v19  ;;  %v748_v9 = vmul.f32 %v746_v63, %v660_v30  ;;  %v749_v6 = vmul.f32 %v746_v63, %v661_v60 }
 0x163   :  { %v750_v55 = vmul.f32 %v746_v63, %v662_v29  ;;  %v751_v5 = vmul.f32 %v746_v63, %v663_v36  ;;  %v777_v19 = vand.u32 2147483647, %v709_v0  ;;  %v794_v61 = vand.u32 2147483647, %v2805_v2 }
 0x164   :  { %1905 = vset.pattern.permute.xlu1 %v2143_v10  ;;  %v778_v56 = vand.u32 2147483647, %v710_v31  ;;  %v779_v37 = vand.u32 2147483647, %v711_v49  ;;  %v795_v0 = vand.u32 2147483647, %v2808_v53 }
 0x165   :  { %1257 = vperm.xlu1 %1905, %v2594_v47  }
 0x166   :  { %v754_v50 = vpop.permute.xlu1 %753 }
 0x167   :  { %v756_v24 = vmul.f32 %v754_v50, %v2771_v23  ;;  %v757_v11 = vmul.f32 %v754_v50, %v669_v54  ;;  %v758_v27 = vmul.f32 %v754_v50, %v670_v62  ;;  %v759_v41 = vmul.f32 %v754_v50, %v671_v45 }
 0x169   :  { %1906 = vset.pattern.permute.xlu1 %v2144_v44  ;;  %v760_v32 = vadd.f32 %v756_v24, %v748_v9  ;;  %v761_v22 = vadd.f32 %v757_v11, %v749_v6  ;;  %v762_v40 = vadd.f32 %v758_v27, %v750_v55  ;;  %v763_v8 = vadd.f32 %v759_v41, %v751_v5 }
 0x16a   :  { %1265 = vperm.xlu1 %1906, %v2594_v47   ;;  %v2146_v24 = vmov 97  }
 0x16b   :  { %v772_v7 = vadd.f32 %v2631_v13, %v760_v32  ;;  %v773_v30 = vadd.f32 %v2633_v4, %v761_v22  ;;  %v774_v23 = vadd.f32 %v2635_v34, %v762_v40  ;;  %v775_v54 = vadd.f32 %v2640_v33, %v763_v8  ;;  %v782_v62 = vpop.permute.xlu1 %781 }
 0x16c   :  { %v784_v45 = vsub.f32 %v776_v26, %v782_v62  ;;  %v785_v60 = vsub.f32 %v777_v19, %v782_v62  ;;  %v786_v29 = vsub.f32 %v778_v56, %v782_v62  ;;  %v787_v36 = vsub.f32 %v779_v37, %v782_v62 }
 0x16d   :  { %v808_v1 = vand.u32 2147483647, %v772_v7  ;;  %v809_v12 = vand.u32 2147483647, %v773_v30  ;;  %v810_v38 = vand.u32 2147483647, %v774_v23 }
 0x16e   :  { %1908 = vset.pattern.permute.xlu1 %v2145_v58  ;;  %v792_v13 = vand.u32 2147483647, %v2799_v20  ;;  %v793_v4 = vand.u32 2147483647, %v2802_v43  ;;  %v811_v34 = vand.u32 2147483647, %v775_v54 }
 0x16f   :  { %1281 = vperm.xlu1 %1908, %v2594_v47   ;;  %v816_v51 = vsub.f32 %v808_v1, %v814_v46  ;;  %v817_v33 = vsub.f32 %v809_v12, %v814_v46  ;;  %v818_v17 = vsub.f32 %v810_v38, %v814_v46  ;;  %v788_v63 = vmax.f32 %v784_v45, 0.0 }
 0x170   :  { %v798_v10 = vpop.permute.xlu1 %797  ;;  %v789_v31 = vmax.f32 %v785_v60, 0.0  ;;  %v790_v49 = vmax.f32 %v786_v29, 0.0  ;;  %v791_v9 = vmax.f32 %v787_v36, 0.0  ;;  %v819_v6 = vsub.f32 %v811_v34, %v814_v46  ;;  %v866_v34 = vpop.permute.xlu0 %865 }
 0x171   :  { %v800_v55 = vsub.f32 %v792_v13, %v798_v10  ;;  %v801_v5 = vsub.f32 %v793_v4, %v798_v10  ;;  %v802_v50 = vsub.f32 %v794_v61, %v798_v10  ;;  %v803_v20 = vsub.f32 %v795_v0, %v798_v10 }
 0x172   :  { %v820_v43 = vmax.f32 %v816_v51, 0.0  ;;  %v821_v11 = vmax.f32 %v817_v33, 0.0  ;;  %v822_v27 = vmax.f32 %v818_v17, 0.0  ;;  %v823_v41 = vmax.f32 %v819_v6, 0.0 }
 0x173   :  { %1909 = vset.pattern.permute.xlu1 %v2146_v24  ;;  %v804_v44 = vmax.f32 %v800_v55, 0.0  ;;  %v805_v2 = vmax.f32 %v801_v5, 0.0  ;;  %v806_v26 = vmax.f32 %v802_v50, 0.0  ;;  %v807_v53 = vmax.f32 %v803_v20, 0.0  ;;  %v3313_v24 = vld [vmem:[#allocation12_spill] sm:$0xff] }
 0x174   :  { %1289 = vperm.xlu1 %1909, %v2594_v47   ;;  %v824_v32 = vmul.f32 %v788_v63, %v788_v63  ;;  %v825_v22 = vmul.f32 %v789_v31, %v789_v31  ;;  %v826_v40 = vmul.f32 %v790_v49, %v790_v49  ;;  %v827_v8 = vmul.f32 %v791_v9, %v791_v9  ;;  %v890_v50 = vpop.permute.xlu0 %889 }
 0x175   :  { %v846_v19 = vpop.permute.xlu1 %845  ;;  %v828_v56 = vmul.f32 %v804_v44, %v804_v44  ;;  %v829_v37 = vmul.f32 %v805_v2, %v805_v2  ;;  %v830_v7 = vmul.f32 %v806_v26, %v806_v26  ;;  %v831_v30 = vmul.f32 %v807_v53, %v807_v53 }
 0x176   :  { %v836_v23 = vmul.f32 %v820_v43, %v820_v43  ;;  %v837_v54 = vmul.f32 %v821_v11, %v821_v11  ;;  %v838_v62 = vmul.f32 %v822_v27, %v822_v27  ;;  %v839_v45 = vmul.f32 %v823_v41, %v823_v41 }
 0x177   :  { %v2147_v60 = vmov 99   ;;  %v832_v29 = vadd.f32 %v828_v56, %v824_v32  ;;  %v833_v36 = vadd.f32 %v829_v37, %v825_v22  ;;  %v834_v46 = vadd.f32 %v830_v7, %v826_v40  ;;  %v2888_v56 = vld [vmem:[#allocation5 + $0x48] sm:$0xff]  ;;  %v2893_v7 = vld [vmem:[#allocation5 + $0x50] sm:$0xff] }
 0x178   :  { %1911 = vset.pattern.permute.xlu1 %v2147_v60  ;;  %v835_v58 = vadd.f32 %v831_v30, %v827_v8  ;;  %vm847_vm4 = vcmp.eq.s32.totalorder %v846_v19, 1  ;;  %v2148_v63 = vmov 100   ;;  %v3309_v61 = vmin.f32 %v2644_v15, %v2748_v35  ;;  %v2883_v8 = vld [vmem:[#allocation5 + $0x40] sm:$0xff] }
 0x179   :  { %1313 = vperm.xlu1 %1911, %v2594_v47   ;;  %v840_v1 = vadd.f32 %v836_v23, %v832_v29  ;;  %v841_v12 = vadd.f32 %v837_v54, %v833_v36  ;;  %v842_v38 = vadd.f32 %v838_v62, %v834_v46  ;;  %v3310_v31 = vmin.f32 %v2648_v42, %v2750_v16  ;;  %v2898_v23 = vld [vmem:[#allocation5 + $0x58] sm:$0xff] }
 0x17a   :  { %v843_v13 = vadd.f32 %v839_v45, %v835_v58  ;;  %v858_v4 = vpop.permute.xlu1 %857  ;;  %v3311_v9 = vmin.f32 %v2650_v48, %v2752_v39  ;;  %v3312_v55 = vmin.f32 %v2653_v14, %v2754_v3  ;;  %v2850_v35 = vsub.f32 %v2768_v18, %v866_v34 }
 0x17b   :  { %v848_v51 = vsel %vm847_vm4, %v840_v1, 1e+08  ;;  %v849_v33 = vsel %vm847_vm4, %v841_v12, 1e+08  ;;  %v850_v17 = vsel %vm847_vm4, %v842_v38, 1e+08  ;;  %v2853_v42 = vsub.f32 %v2773_v25, %v866_v34 }
 0x17c   :  { %v851_v10 = vsel %vm847_vm4, %v843_v13, 1e+08  ;;  %v2831_v0 = vmin.f32 %v3309_v61, %v848_v51  ;;  %v2836_v49 = vmin.f32 %v3310_v31, %v849_v33  ;;  %v2841_v6 = vmin.f32 %v3311_v9, %v850_v17  ;;  %v922_v13 = vpop.permute.xlu0 %921 }
 0x17d   :  { %1912 = vset.pattern.permute.xlu1 %v2148_v63  ;;  %v2847_v5 = vmin.f32 %v3312_v55, %v851_v10  ;;  %v2856_v16 = vsub.f32 %v2776_v57, %v866_v34  ;;  %v2859_v48 = vsub.f32 %v2779_v21, %v866_v34  ;;  %v2149_v39 = vmov 102  }
 0x17e   :  { %1321 = vperm.xlu1 %1912, %v2594_v47   ;;  %v2863_v14 = vsub.f32 %v2782_v52, %v858_v4  ;;  %v2866_v3 = vsub.f32 %v2785_v59, %v858_v4  ;;  %v2869_v20 = vsub.f32 %v2788_v28, %v858_v4  ;;  %v2872_v43 = vsub.f32 %v3313_v24, %v858_v4 }
 0x17f   :  { %v874_v15 = vpop.permute.xlu1 %873  ;;  %v892_v11 = vmul.f32 %v890_v50, %v2850_v35  ;;  %v893_v27 = vmul.f32 %v890_v50, %v2853_v42  ;;  %v894_v41 = vmul.f32 %v890_v50, %v2856_v16  ;;  %v895_v44 = vmul.f32 %v890_v50, %v2859_v48 }
 0x180   :  { %v2150_v40 = vmov 121   ;;  %v2886_v19 = vsub.f32 %v2883_v8, %v874_v15  ;;  %v2891_v37 = vsub.f32 %v2888_v56, %v874_v15  ;;  %v2896_v30 = vsub.f32 %v2893_v7, %v874_v15 }
 0x181   :  { %v2901_v54 = vsub.f32 %v2898_v23, %v874_v15  ;;  %v2151_v38 = vmov 103   ;;  %v924_v17 = vmul.f32 %v922_v13, %v2850_v35  ;;  %v925_v63 = vmul.f32 %v922_v13, %v2853_v42 }
 0x182   :  { %1914 = vset.pattern.permute.xlu1 %v2149_v39  ;;  %v926_v10 = vmul.f32 %v922_v13, %v2856_v16  ;;  %v927_v61 = vmul.f32 %v922_v13, %v2859_v48  ;;  %v2152_v50 = vmov 123  }
 0x183   :  { %1345 = vperm.xlu1 %1914, %v2594_v47  }
 0x184   :  { %v882_v2 = vpop.permute.xlu1 %881 }
 0x185   :  { %v884_v26 = vmul.f32 %v882_v2, %v2863_v14  ;;  %v885_v53 = vmul.f32 %v882_v2, %v2866_v3  ;;  %v886_v32 = vmul.f32 %v882_v2, %v2869_v20  ;;  %v887_v22 = vmul.f32 %v882_v2, %v2872_v43 }
 0x187   :  { %1915 = vset.pattern.permute.xlu1 %v2150_v40  ;;  %v896_v62 = vadd.f32 %v892_v11, %v884_v26  ;;  %v897_v45 = vadd.f32 %v893_v27, %v885_v53  ;;  %v898_v60 = vadd.f32 %v894_v41, %v886_v32  ;;  %v899_v29 = vadd.f32 %v895_v44, %v887_v22  ;;  %v954_v26 = vpop.permute.xlu0 %953 }
 0x188   :  { %1457 = vperm.xlu1 %1915, %v2594_v47  }
 0x189   :  { %v902_v36 = vpop.permute.xlu1 %901 }
 0x18a   :  { %v904_v46 = vmul.f32 %v902_v36, %v2886_v19  ;;  %v905_v58 = vmul.f32 %v902_v36, %v2891_v37  ;;  %v906_v1 = vmul.f32 %v902_v36, %v2896_v30  ;;  %v907_v12 = vmul.f32 %v902_v36, %v2901_v54 }
 0x18c   :  { %1917 = vset.pattern.permute.xlu1 %v2151_v38  ;;  %v2907_v4 = vadd.f32 %v904_v46, %v896_v62  ;;  %v2909_v34 = vadd.f32 %v905_v58, %v897_v45  ;;  %v2911_v51 = vadd.f32 %v906_v1, %v898_v60  ;;  %v2913_v33 = vadd.f32 %v907_v12, %v899_v29 }
 0x18d   :  { %1353 = vperm.xlu1 %1917, %v2594_v47   ;;  %v2153_v62 = vmov 113   ;;  %v956_v46 = vmul.f32 %v954_v26, %v2850_v35 }
 0x18f   :  { %v914_v31 = vpop.permute.xlu1 %913 }
 0x190   :  { %v916_v9 = vmul.f32 %v914_v31, %v2863_v14  ;;  %v917_v55 = vmul.f32 %v914_v31, %v2866_v3  ;;  %v918_v15 = vmul.f32 %v914_v31, %v2869_v20  ;;  %v919_v39 = vmul.f32 %v914_v31, %v2872_v43 }
 0x191   :  { %1918 = vset.pattern.permute.xlu1 %v2152_v50  ;;  %v957_v31 = vmul.f32 %v954_v26, %v2853_v42  ;;  %v977_v42 = vand.u32 2147483647, %v2909_v34  ;;  %v979_v34 = vand.u32 2147483647, %v2913_v33 }
 0x192   :  { %1473 = vperm.xlu1 %1918, %v2594_v47   ;;  %v928_v11 = vadd.f32 %v924_v17, %v916_v9  ;;  %v929_v27 = vadd.f32 %v925_v63, %v917_v55  ;;  %v930_v41 = vadd.f32 %v926_v10, %v918_v15  ;;  %v931_v44 = vadd.f32 %v927_v61, %v919_v39  ;;  %v998_v61 = vpop.permute.xlu0 %997  ;;  %v2938_v15 = vld [vmem:[#allocation2] sm:$0xff] }
 0x193   :  { %v958_v9 = vmul.f32 %v954_v26, %v2856_v16  ;;  %v2154_v55 = vmov 115   ;;  %v978_v16 = vand.u32 2147483647, %v2911_v51 }
 0x194   :  { %v934_v2 = vpop.permute.xlu1 %933 }
 0x195   :  { %v936_v53 = vmul.f32 %v934_v2, %v2886_v19  ;;  %v937_v32 = vmul.f32 %v934_v2, %v2891_v37  ;;  %v938_v22 = vmul.f32 %v934_v2, %v2896_v30  ;;  %v939_v40 = vmul.f32 %v934_v2, %v2901_v54 }
 0x196   :  { %1920 = vset.pattern.permute.xlu1 %v2153_v62 }
 0x197   :  { %v940_v45 = vadd.f32 %v936_v53, %v928_v11  ;;  %v941_v60 = vadd.f32 %v937_v32, %v929_v27  ;;  %v942_v29 = vadd.f32 %v938_v22, %v930_v41  ;;  %v943_v36 = vadd.f32 %v939_v40, %v931_v44  ;;  %1489 = vperm.xlu1 %1920, %v2594_v47  }
 0x198   :  { %v959_v47 = vmul.f32 %v954_v26, %v2859_v48  ;;  %v2155_v32 = vmov 104  }
 0x199   :  { %v946_v58 = vpop.permute.xlu1 %945  ;;  %v992_v1 = vand.u32 2147483647, %v940_v45  ;;  %v993_v12 = vand.u32 2147483647, %v941_v60  ;;  %v994_v38 = vand.u32 2147483647, %v942_v29 }
 0x19a   :  { %v948_v13 = vmul.f32 %v946_v58, %v2863_v14  ;;  %v949_v17 = vmul.f32 %v946_v58, %v2866_v3  ;;  %v950_v63 = vmul.f32 %v946_v58, %v2869_v20  ;;  %v951_v10 = vmul.f32 %v946_v58, %v2872_v43 }
 0x19b   :  { %v995_v35 = vand.u32 2147483647, %v943_v36  ;;  %1921 = vset.pattern.permute.xlu1 %v2154_v55  ;;  %v1000_v14 = vsub.f32 %v992_v1, %v998_v61  ;;  %v1001_v3 = vsub.f32 %v993_v12, %v998_v61  ;;  %v1002_v39 = vsub.f32 %v994_v38, %v998_v61 }
 0x19c   :  { %1513 = vperm.xlu1 %1921, %v2938_v15   ;;  %v960_v20 = vadd.f32 %v956_v46, %v948_v13  ;;  %v976_v43 = vand.u32 2147483647, %v2907_v4  ;;  %v961_v11 = vadd.f32 %v957_v31, %v949_v17  ;;  %v962_v48 = vadd.f32 %v958_v9, %v950_v63 }
 0x19d   :  { %v963_v27 = vadd.f32 %v959_v47, %v951_v10  ;;  %v1003_v41 = vsub.f32 %v995_v35, %v998_v61  ;;  %v1004_v22 = vmax.f32 %v1000_v14, 0.0  ;;  %v1005_v4 = vmax.f32 %v1001_v3, 0.0 }
 0x19e   :  { %v966_v50 = vpop.permute.xlu1 %965  ;;  %v1006_v40 = vmax.f32 %v1002_v39, 0.0  ;;  %v2156_v12 = vmov 114  }
 0x19f   :  { %v968_v44 = vmul.f32 %v966_v50, %v2886_v19  ;;  %v969_v2 = vmul.f32 %v966_v50, %v2891_v37  ;;  %v970_v26 = vmul.f32 %v966_v50, %v2896_v30  ;;  %v971_v53 = vmul.f32 %v966_v50, %v2901_v54 }
 0x1a0   :  { %1923 = vset.pattern.permute.xlu1 %v2155_v32  ;;  %v1007_v19 = vmax.f32 %v1003_v41, 0.0  ;;  %v1028_v54 = vmul.f32 %v1004_v22, %v1004_v22  ;;  %v1029_v58 = vmul.f32 %v1005_v4, %v1005_v4  ;;  %v1030_v1 = vmul.f32 %v1006_v40, %v1006_v40 }
 0x1a1   :  { %1365 = vperm.xlu1 %1923, %v2938_v15   ;;  %v972_v51 = vadd.f32 %v968_v44, %v960_v20  ;;  %v973_v62 = vadd.f32 %v969_v2, %v961_v11  ;;  %v974_v45 = vadd.f32 %v970_v26, %v962_v48  ;;  %v975_v60 = vadd.f32 %v971_v53, %v963_v27 }
 0x1a2   :  { %v1031_v10 = vmul.f32 %v1007_v19, %v1007_v19 }
 0x1a3   :  { %v982_v29 = vpop.permute.xlu1 %981  ;;  %v1008_v38 = vand.u32 2147483647, %v972_v51  ;;  %v1009_v61 = vand.u32 2147483647, %v973_v62  ;;  %v1010_v31 = vand.u32 2147483647, %v974_v45 }
 0x1a4   :  { %v984_v37 = vsub.f32 %v976_v43, %v982_v29  ;;  %v985_v36 = vsub.f32 %v977_v42, %v982_v29  ;;  %v986_v30 = vsub.f32 %v978_v16, %v982_v29  ;;  %v987_v46 = vsub.f32 %v979_v34, %v982_v29 }
 0x1a5   :  { %1924 = vset.pattern.permute.xlu1 %v2156_v12  ;;  %v1011_v9 = vand.u32 2147483647, %v975_v60  ;;  %v2157_v42 = vmov 118   ;;  %v2158_v60 = vmov 119   ;;  %v1058_v12 = vpop.permute.xlu0 %1057 }
 0x1a6   :  { %v988_v13 = vmax.f32 %v984_v37, 0.0  ;;  %v989_v17 = vmax.f32 %v985_v36, 0.0  ;;  %v990_v63 = vmax.f32 %v986_v30, 0.0  ;;  %v991_v33 = vmax.f32 %v987_v46, 0.0  ;;  %1501 = vperm.xlu1 %1924, %v2938_v15  }
 0x1a8   :  { %v1024_v47 = vmul.f32 %v988_v13, %v988_v13  ;;  %v1025_v35 = vmul.f32 %v989_v17, %v989_v17  ;;  %v1026_v55 = vmul.f32 %v990_v63, %v990_v63  ;;  %v1027_v14 = vmul.f32 %v991_v33, %v991_v33  ;;  %v1014_v3 = vpop.permute.xlu1 %1013 }
 0x1a9   :  { %v1016_v39 = vsub.f32 %v1008_v38, %v1014_v3  ;;  %v1017_v20 = vsub.f32 %v1009_v61, %v1014_v3  ;;  %v1018_v50 = vsub.f32 %v1010_v31, %v1014_v3  ;;  %v1019_v43 = vsub.f32 %v1011_v9, %v1014_v3  ;;  %v1082_v31 = vpop.permute.xlu0 %1081 }
 0x1aa   :  { %1926 = vset.pattern.permute.xlu1 %v2157_v42  ;;  %v1032_v16 = vadd.f32 %v1028_v54, %v1024_v47  ;;  %v1033_v11 = vadd.f32 %v1029_v58, %v1025_v35  ;;  %v1034_v48 = vadd.f32 %v1030_v1, %v1026_v55  ;;  %v1035_v27 = vadd.f32 %v1031_v10, %v1027_v14 }
 0x1ab   :  { %v1020_v41 = vmax.f32 %v1016_v39, 0.0  ;;  %v1021_v44 = vmax.f32 %v1017_v20, 0.0  ;;  %v1022_v2 = vmax.f32 %v1018_v50, 0.0  ;;  %v1023_v26 = vmax.f32 %v1019_v43, 0.0  ;;  %1545 = vperm.xlu1 %1926, %v2938_v15  }
 0x1ac   :  { %v2159_v38 = vmov 108   ;;  %v2971_v17 = vsub.f32 %v2782_v52, %v1058_v12  ;;  %v2974_v63 = vsub.f32 %v2785_v59, %v1058_v12  ;;  %v2977_v33 = vsub.f32 %v2788_v28, %v1058_v12 }
 0x1ad   :  { %v1036_v53 = vmul.f32 %v1020_v41, %v1020_v41  ;;  %v1037_v32 = vmul.f32 %v1021_v44, %v1021_v44  ;;  %v1038_v22 = vmul.f32 %v1022_v2, %v1022_v2  ;;  %v1039_v4 = vmul.f32 %v1023_v26, %v1023_v26  ;;  %v1046_v40 = vpop.permute.xlu1 %1045 }
 0x1ae   :  { %vm1047_vm5 = vcmp.eq.s32.totalorder %v1046_v40, 1  ;;  %v2980_v10 = vsub.f32 %v3313_v24, %v1058_v12  ;;  %v2160_v61 = vmov 109   ;;  %v1084_v24 = vmul.f32 %v1082_v31, %v2971_v17 }
 0x1af   :  { %v1040_v34 = vadd.f32 %v1036_v53, %v1032_v16  ;;  %v1041_v51 = vadd.f32 %v1037_v32, %v1033_v11  ;;  %v1042_v62 = vadd.f32 %v1038_v22, %v1034_v48  ;;  %v1043_v45 = vadd.f32 %v1039_v4, %v1035_v27  ;;  %1927 = vset.pattern.permute.xlu1 %v2158_v60  ;;  %v1114_v32 = vpop.permute.xlu0 %1113 }
 0x1b0   :  { %1553 = vperm.xlu1 %1927, %v2938_v15   ;;  %v1085_v47 = vmul.f32 %v1082_v31, %v2974_v63  ;;  %v1086_v35 = vmul.f32 %v1082_v31, %v2977_v33  ;;  %v1087_v55 = vmul.f32 %v1082_v31, %v2980_v10  ;;  %v2161_v39 = vmov 124  }
 0x1b1   :  { %v2953_v19 = vsel %vm1047_vm5, %v1040_v34, 1e+08  ;;  %v2955_v29 = vsel %vm1047_vm5, %v1041_v51, 1e+08  ;;  %v2957_v37 = vsel %vm1047_vm5, %v1042_v62, 1e+08  ;;  %v1116_v12 = vmul.f32 %v1114_v32, %v2971_v17 }
 0x1b2   :  { %v2959_v36 = vsel %vm1047_vm5, %v1043_v45, 1e+08  ;;  %v1052_v30 = vmin.f32 %v2831_v0, %v2953_v19  ;;  %v1053_v46 = vmin.f32 %v2836_v49, %v2955_v29  ;;  %v1054_v54 = vmin.f32 %v2841_v6, %v2957_v37  ;;  %v1066_v58 = vpop.permute.xlu1 %1065 }
 0x1b3   :  { %v1055_v1 = vmin.f32 %v2847_v5, %v2959_v36  ;;  %v2984_v9 = vsub.f32 %v2768_v18, %v1066_v58  ;;  %v2987_v52 = vsub.f32 %v2773_v25, %v1066_v58  ;;  %v2990_v59 = vsub.f32 %v2776_v57, %v1066_v58 }
 0x1b4   :  { %1929 = vset.pattern.permute.xlu1 %v2159_v38  ;;  %v2993_v28 = vsub.f32 %v2779_v21, %v1066_v58  ;;  %v2162_v53 = vmov 125   ;;  %v1117_v38 = vmul.f32 %v1114_v32, %v2974_v63  ;;  %v2163_v31 = vmov 111  }
 0x1b5   :  { %1381 = vperm.xlu1 %1929, %v2938_v15  }
 0x1b7   :  { %v1074_v13 = vpop.permute.xlu1 %1073 }
 0x1b8   :  { %v3005_v21 = vsub.f32 %v2883_v8, %v1074_v13  ;;  %v3008_v20 = vsub.f32 %v2888_v56, %v1074_v13  ;;  %v3011_v50 = vsub.f32 %v2893_v7, %v1074_v13  ;;  %v3014_v43 = vsub.f32 %v2898_v23, %v1074_v13 }
 0x1b9   :  { %1930 = vset.pattern.permute.xlu1 %v2160_v61  ;;  %v1118_v13 = vmul.f32 %v1114_v32, %v2977_v33  ;;  %v1119_v61 = vmul.f32 %v1114_v32, %v2980_v10 }
 0x1ba   :  { %1397 = vperm.xlu1 %1930, %v2938_v15  }
 0x1bc   :  { %v1090_v14 = vpop.permute.xlu1 %1089 }
 0x1bd   :  { %v1092_v18 = vmul.f32 %v1090_v14, %v2984_v9  ;;  %v1093_v25 = vmul.f32 %v1090_v14, %v2987_v52  ;;  %v1094_v3 = vmul.f32 %v1090_v14, %v2990_v59  ;;  %v1095_v57 = vmul.f32 %v1090_v14, %v2993_v28 }
 0x1be   :  { %1932 = vset.pattern.permute.xlu1 %v2161_v39 }
 0x1bf   :  { %1581 = vperm.xlu1 %1932, %v2938_v15   ;;  %v1096_v42 = vadd.f32 %v1092_v18, %v1084_v24  ;;  %v1097_v16 = vadd.f32 %v1093_v25, %v1085_v47  ;;  %v1098_v11 = vadd.f32 %v1094_v3, %v1086_v35  ;;  %v1099_v48 = vadd.f32 %v1095_v57, %v1087_v55  ;;  %v1146_v24 = vpop.permute.xlu0 %1145 }
 0x1c0   :  { %v1150_v32 = vmul.f32 %v1146_v24, %v2977_v33 }
 0x1c1   :  { %v1102_v27 = vpop.permute.xlu1 %1101 }
 0x1c2   :  { %v1104_v41 = vmul.f32 %v1102_v27, %v3005_v21  ;;  %v1105_v44 = vmul.f32 %v1102_v27, %v3008_v20  ;;  %v1106_v2 = vmul.f32 %v1102_v27, %v3011_v50  ;;  %v1107_v26 = vmul.f32 %v1102_v27, %v3014_v43 }
 0x1c3   :  { %1933 = vset.pattern.permute.xlu1 %v2162_v53  ;;  %v1149_v53 = vmul.f32 %v1146_v24, %v2974_v63 }
 0x1c4   :  { %v1108_v22 = vadd.f32 %v1104_v41, %v1096_v42  ;;  %v1109_v4 = vadd.f32 %v1105_v44, %v1097_v16  ;;  %v1110_v40 = vadd.f32 %v1106_v2, %v1098_v11  ;;  %v1111_v34 = vadd.f32 %v1107_v26, %v1099_v48  ;;  %1597 = vperm.xlu1 %1933, %v2938_v15   ;;  %v3314_v15 = vld [vmem:[#allocation11_spill] sm:$0xff] }
 0x1c5   :  { %v3315_v42 = vmov 127   ;;  %v1148_v16 = vmul.f32 %v1146_v24, %v2971_v17 }
 0x1c6   :  { %v1122_v51 = vpop.permute.xlu1 %1121  ;;  %v1176_v11 = vand.u32 2147483647, %v1108_v22  ;;  %v1177_v48 = vand.u32 2147483647, %v1109_v4  ;;  %v1178_v27 = vand.u32 2147483647, %v1110_v40 }
 0x1c7   :  { %v1124_v62 = vmul.f32 %v1122_v51, %v2984_v9  ;;  %v1125_v45 = vmul.f32 %v1122_v51, %v2987_v52  ;;  %v1126_v60 = vmul.f32 %v1122_v51, %v2990_v59  ;;  %v1127_v58 = vmul.f32 %v1122_v51, %v2993_v28 }
 0x1c8   :  { %1935 = vset.pattern.permute.xlu1 %v2163_v31  ;;  %v1151_v51 = vmul.f32 %v1146_v24, %v2980_v10 }
 0x1c9   :  { %1445 = vperm.xlu1 %1935, %v3314_v15   ;;  %v1128_v35 = vadd.f32 %v1124_v62, %v1116_v12  ;;  %v1129_v55 = vadd.f32 %v1125_v45, %v1117_v38  ;;  %v1130_v14 = vadd.f32 %v1126_v60, %v1118_v13  ;;  %v1131_v18 = vadd.f32 %v1127_v58, %v1119_v61  ;;  %v1182_v62 = vpop.permute.xlu0 %1181 }
 0x1ca   :  { %v1179_v45 = vand.u32 2147483647, %v1111_v34  ;;  %v1184_v58 = vsub.f32 %v1176_v11, %v1182_v62  ;;  %v1185_v12 = vsub.f32 %v1177_v48, %v1182_v62  ;;  %v1186_v38 = vsub.f32 %v1178_v27, %v1182_v62 }
 0x1cb   :  { %v1134_v47 = vpop.permute.xlu1 %1133 }
 0x1cc   :  { %v1136_v25 = vmul.f32 %v1134_v47, %v3005_v21  ;;  %v1137_v3 = vmul.f32 %v1134_v47, %v3008_v20  ;;  %v1138_v57 = vmul.f32 %v1134_v47, %v3011_v50  ;;  %v1139_v39 = vmul.f32 %v1134_v47, %v3014_v43 }
 0x1cd   :  { %1936 = vset.pattern.permute.xlu1 %v3315_v42  ;;  %v1187_v13 = vsub.f32 %v1179_v45, %v1182_v62  ;;  %v1189_v24 = vmax.f32 %v1185_v12, 0.0 }
 0x1ce   :  { %1645 = vperm.xlu1 %1936, %v3314_v15   ;;  %v1140_v41 = vadd.f32 %v1136_v25, %v1128_v35  ;;  %v1141_v44 = vadd.f32 %v1137_v3, %v1129_v55  ;;  %v1142_v2 = vadd.f32 %v1138_v57, %v1130_v14  ;;  %v1143_v26 = vadd.f32 %v1139_v39, %v1131_v18 }
 0x1cf   :  { %v1191_v39 = vmax.f32 %v1187_v13, 0.0  ;;  %v1225_v48 = vmul.f32 %v1189_v24, %v1189_v24 }
 0x1d0   :  { %v1154_v60 = vpop.permute.xlu1 %1153  ;;  %v1192_v47 = vand.u32 2147483647, %v1140_v41  ;;  %v1193_v25 = vand.u32 2147483647, %v1141_v44  ;;  %v1194_v3 = vand.u32 2147483647, %v1142_v2 }
 0x1d1   :  { %v1156_v17 = vmul.f32 %v1154_v60, %v2984_v9  ;;  %v1157_v22 = vmul.f32 %v1154_v60, %v2987_v52  ;;  %v1158_v4 = vmul.f32 %v1154_v60, %v2990_v59  ;;  %v1159_v40 = vmul.f32 %v1154_v60, %v2993_v28 }
 0x1d2   :  { %v1188_v59 = vmax.f32 %v1184_v58, 0.0  ;;  %v1190_v28 = vmax.f32 %v1186_v38, 0.0  ;;  %v1195_v57 = vand.u32 2147483647, %v1143_v26  ;;  %v1227_v62 = vmul.f32 %v1191_v39, %v1191_v39 }
 0x1d3   :  { %v1160_v63 = vadd.f32 %v1156_v17, %v1148_v16  ;;  %v1161_v61 = vadd.f32 %v1157_v22, %v1149_v53  ;;  %v1162_v33 = vadd.f32 %v1158_v4, %v1150_v32  ;;  %v1163_v31 = vadd.f32 %v1159_v40, %v1151_v51 }
 0x1d5   :  { %v1166_v10 = vpop.permute.xlu1 %1165 }
 0x1d6   :  { %v1168_v34 = vmul.f32 %v1166_v10, %v3005_v21  ;;  %v1169_v15 = vmul.f32 %v1166_v10, %v3008_v20  ;;  %v1170_v9 = vmul.f32 %v1166_v10, %v3011_v50  ;;  %v1171_v52 = vmul.f32 %v1166_v10, %v3014_v43 }
 0x1d7   :  { %v1224_v50 = vmul.f32 %v1188_v59, %v1188_v59  ;;  %v1226_v43 = vmul.f32 %v1190_v28, %v1190_v28 }
 0x1d8   :  { %v1172_v35 = vadd.f32 %v1168_v34, %v1160_v63  ;;  %v1173_v55 = vadd.f32 %v1169_v15, %v1161_v61  ;;  %v1174_v14 = vadd.f32 %v1170_v9, %v1162_v33  ;;  %v1175_v18 = vadd.f32 %v1171_v52, %v1163_v31  ;;  %v1246_v9 = vpop.permute.xlu0 %1245 }
 0x1d9   :  { %vm1247_vm6 = vcmp.eq.s32.totalorder %v1246_v9, 1 }
 0x1da   :  { %v1198_v42 = vpop.permute.xlu1 %1197  ;;  %v1208_v27 = vand.u32 2147483647, %v1172_v35  ;;  %v1209_v45 = vand.u32 2147483647, %v1173_v55  ;;  %v1210_v60 = vand.u32 2147483647, %v1174_v14 }
 0x1db   :  { %v1200_v21 = vsub.f32 %v1192_v47, %v1198_v42  ;;  %v1201_v16 = vsub.f32 %v1193_v25, %v1198_v42  ;;  %v1202_v20 = vsub.f32 %v1194_v3, %v1198_v42  ;;  %v1203_v11 = vsub.f32 %v1195_v57, %v1198_v42 }
 0x1dc   :  { %v1211_v44 = vand.u32 2147483647, %v1175_v18 }
 0x1dd   :  { %v1204_v53 = vmax.f32 %v1200_v21, 0.0  ;;  %v1205_v32 = vmax.f32 %v1201_v16, 0.0  ;;  %v1206_v41 = vmax.f32 %v1202_v20, 0.0  ;;  %v1207_v51 = vmax.f32 %v1203_v11, 0.0 }
 0x1df   :  { %v1228_v2 = vmul.f32 %v1204_v53, %v1204_v53  ;;  %v1229_v26 = vmul.f32 %v1205_v32, %v1205_v32  ;;  %v1230_v17 = vmul.f32 %v1206_v41, %v1206_v41  ;;  %v1231_v22 = vmul.f32 %v1207_v51, %v1207_v51  ;;  %v1214_v4 = vpop.permute.xlu1 %1213  ;;  %v1953_v53 = vld [vmem:[#allocation5 + $0x28] sm:$0xff] }
 0x1e0   :  { %v1216_v40 = vsub.f32 %v1208_v27, %v1214_v4  ;;  %v1217_v58 = vsub.f32 %v1209_v45, %v1214_v4  ;;  %v1218_v12 = vsub.f32 %v1210_v60, %v1214_v4  ;;  %v1219_v38 = vsub.f32 %v1211_v44, %v1214_v4  ;;  %v1955_v60 = vld [vmem:[#allocation5 + $0x38] sm:$0xff]  ;;  %v3100_v4 = vld [vmem:[#allocation5 + $0x8] sm:$0xff] }
 0x1e1   :  { %v1232_v13 = vadd.f32 %v1228_v2, %v1224_v50  ;;  %v1233_v63 = vadd.f32 %v1229_v26, %v1225_v48  ;;  %v1234_v61 = vadd.f32 %v1230_v17, %v1226_v43  ;;  %v1235_v33 = vadd.f32 %v1231_v22, %v1227_v62  ;;  %v1954_v62 = vld [vmem:[#allocation5 + $0x30] sm:$0xff]  ;;  %v3097_v17 = vld [vmem:[#allocation5] sm:$0xff] }
 0x1e2   :  { %v1220_v31 = vmax.f32 %v1216_v40, 0.0  ;;  %v1221_v10 = vmax.f32 %v1217_v58, 0.0  ;;  %v1222_v34 = vmax.f32 %v1218_v12, 0.0  ;;  %v1223_v15 = vmax.f32 %v1219_v38, 0.0  ;;  %v1958_v38 = vld [vmem:[#allocation5 + $0x10] sm:$0xff] }
 0x1e4   :  { %v1236_v52 = vmul.f32 %v1220_v31, %v1220_v31  ;;  %v1237_v59 = vmul.f32 %v1221_v10, %v1221_v10  ;;  %v1238_v24 = vmul.f32 %v1222_v34, %v1222_v34  ;;  %v1239_v28 = vmul.f32 %v1223_v15, %v1223_v15  ;;  %v1258_v47 = vpop.permute.xlu1 %1257 }
 0x1e5   :  { %v1260_v22 = vsub.f32 %v3097_v17, %v1258_v47  ;;  %v1261_v40 = vsub.f32 %v3100_v4, %v1258_v47 }
 0x1e6   :  { %v1240_v35 = vadd.f32 %v1236_v52, %v1232_v13  ;;  %v1241_v55 = vadd.f32 %v1237_v59, %v1233_v63  ;;  %v1242_v14 = vadd.f32 %v1238_v24, %v1234_v61  ;;  %v1243_v18 = vadd.f32 %v1239_v28, %v1235_v33  ;;  %v3105_v63 = vld [vmem:[#allocation5 + $0x18] sm:$0xff] }
 0x1e7   :  { %v1262_v13 = vsub.f32 %v1958_v38, %v1258_v47  ;;  %v1263_v61 = vsub.f32 %v3105_v63, %v1258_v47 }
 0x1e8   :  { %v1248_v25 = vsel %vm1247_vm6, %v1240_v35, 1e+08  ;;  %v1249_v3 = vsel %vm1247_vm6, %v1241_v55, 1e+08  ;;  %v1250_v57 = vsel %vm1247_vm6, %v1242_v14, 1e+08 }
 0x1e9   :  { %v1251_v39 = vsel %vm1247_vm6, %v1243_v18, 1e+08  ;;  %v3051_v42 = vmin.f32 %v1052_v30, %v1248_v25  ;;  %v3056_v21 = vmin.f32 %v1053_v46, %v1249_v3  ;;  %v3061_v16 = vmin.f32 %v1054_v54, %v1250_v57  ;;  %v1266_v20 = vpop.permute.xlu1 %1265  ;;  %v1274_v30 = vpop.permute.xlu0 %1273 }
 0x1ea   :  { %v3066_v11 = vmin.f32 %v1055_v1, %v1251_v39  ;;  %v3073_v6 = vsub.f32 %v2883_v8, %v1274_v30  ;;  %v3076_v37 = vsub.f32 %v2888_v56, %v1274_v30  ;;  %v3079_v5 = vsub.f32 %v2893_v7, %v1274_v30  ;;  %v1952_v1 = vld [vmem:[#allocation5 + $0x20] sm:$0xff] }
 0x1eb   :  { %3316 = vst [vmem:[#allocation13_spill] sm:$0xff] %v3056_v21  ;;  %3317 = vst [vmem:[#allocation14_spill] sm:$0xff] %v3061_v16  ;;  %v3083_v27 = vsub.f32 %v1952_v1, %v1266_v20  ;;  %v3085_v32 = vsub.f32 %v1953_v53, %v1266_v20  ;;  %v3088_v41 = vsub.f32 %v2898_v23, %v1274_v30 }
 0x1ec   :  { %3318 = vst [vmem:[#allocation15_spill] sm:$0xff] %v3066_v11  ;;  %v3091_v45 = vsub.f32 %v1954_v62, %v1266_v20  ;;  %v3093_v44 = vsub.f32 %v1955_v60, %v1266_v20 }
 0x1ed   :  { %v1302_v43 = vpop.permute.xlu0 %1301 }
 0x1ee   :  { %v1282_v50 = vpop.permute.xlu1 %1281  ;;  %v1304_v51 = vmul.f32 %v1302_v43, %v3073_v6  ;;  %v1305_v2 = vmul.f32 %v1302_v43, %v3076_v37  ;;  %v1306_v26 = vmul.f32 %v1302_v43, %v3079_v5  ;;  %v1307_v15 = vmul.f32 %v1302_v43, %v3088_v41 }
 0x1ef   :  { %v1284_v10 = vmul.f32 %v1282_v50, %v1260_v22  ;;  %v1285_v34 = vmul.f32 %v1282_v50, %v1261_v40  ;;  %v1286_v59 = vmul.f32 %v1282_v50, %v1262_v13  ;;  %v1287_v24 = vmul.f32 %v1282_v50, %v1263_v61 }
 0x1f1   :  { %v1334_v29 = vpop.permute.xlu0 %1333 }
 0x1f2   :  { %v1336_v9 = vmul.f32 %v1334_v29, %v3073_v6  ;;  %v1337_v50 = vmul.f32 %v1334_v29, %v3076_v37  ;;  %v1338_v43 = vmul.f32 %v1334_v29, %v3079_v5  ;;  %v1339_v21 = vmul.f32 %v1334_v29, %v3088_v41 }
 0x1f3   :  { %v1290_v0 = vpop.permute.xlu1 %1289 }
 0x1f4   :  { %v1292_v58 = vmul.f32 %v1290_v0, %v3083_v27  ;;  %v1293_v12 = vmul.f32 %v1290_v0, %v3085_v32  ;;  %v1294_v33 = vmul.f32 %v1290_v0, %v3091_v45  ;;  %v1295_v31 = vmul.f32 %v1290_v0, %v3093_v44 }
 0x1f5   :  { %v1466_v36 = vpop.permute.xlu0 %1465 }
 0x1f6   :  { %v1296_v47 = vadd.f32 %v1292_v58, %v1284_v10  ;;  %v1297_v14 = vadd.f32 %v1293_v12, %v1285_v34  ;;  %v1298_v3 = vadd.f32 %v1294_v33, %v1286_v59  ;;  %v1299_v57 = vadd.f32 %v1295_v31, %v1287_v24 }
 0x1f7   :  { %v3123_v58 = vsub.f32 %v1952_v1, %v1466_v36  ;;  %v3129_v31 = vsub.f32 %v1953_v53, %v1466_v36  ;;  %v3137_v24 = vsub.f32 %v1954_v62, %v1466_v36  ;;  %v3139_v29 = vsub.f32 %v1955_v60, %v1466_v36 }
 0x1f8   :  { %v1314_v19 = vpop.permute.xlu1 %1313  ;;  %v3127_v10 = vadd.f32 %v1304_v51, %v1296_v47  ;;  %v3131_v34 = vadd.f32 %v1305_v2, %v1297_v14  ;;  %v3135_v59 = vadd.f32 %v1307_v15, %v1299_v57 }
 0x1f9   :  { %v3116_v55 = vpop.permute.xlu0 %1481  ;;  %v1316_v39 = vmul.f32 %v1314_v19, %v1260_v22  ;;  %v1317_v20 = vmul.f32 %v1314_v19, %v1261_v40  ;;  %v1318_v0 = vmul.f32 %v1314_v19, %v1262_v13  ;;  %v1319_v30 = vmul.f32 %v1314_v19, %v1263_v61 }
 0x1fa   :  { %v3133_v19 = vadd.f32 %v1306_v26, %v1298_v3  ;;  %v1376_v36 = vand.u32 2147483647, %v3127_v10 }
 0x1fd   :  { %v1322_v48 = vpop.permute.xlu1 %1321 }
 0x1fe   :  { %v1324_v28 = vmul.f32 %v1322_v48, %v3083_v27  ;;  %v1325_v35 = vmul.f32 %v1322_v48, %v3085_v32  ;;  %v1326_v18 = vmul.f32 %v1322_v48, %v3091_v45  ;;  %v1327_v25 = vmul.f32 %v1322_v48, %v3093_v44 }
 0x200   :  { %v1328_v11 = vadd.f32 %v1324_v28, %v1316_v39  ;;  %v1329_v16 = vadd.f32 %v1325_v35, %v1317_v20  ;;  %v1330_v48 = vadd.f32 %v1326_v18, %v1318_v0  ;;  %v1331_v33 = vadd.f32 %v1327_v25, %v1319_v30  ;;  %v1522_v28 = vpop.permute.xlu0 %1521 }
 0x201   :  { %v1524_v1 = vmul.f32 %v1522_v28, %v3123_v58  ;;  %v1525_v53 = vmul.f32 %v1522_v28, %v3129_v31  ;;  %v1526_v2 = vmul.f32 %v1522_v28, %v3137_v24  ;;  %v1527_v62 = vmul.f32 %v1522_v28, %v3139_v29 }
 0x202   :  { %v3068_v49 = vpop.permute.xlu1 %1345  ;;  %v3142_v35 = vadd.f32 %v1336_v9, %v1328_v11  ;;  %v3144_v51 = vadd.f32 %v1337_v50, %v1329_v16  ;;  %v3148_v47 = vadd.f32 %v1338_v43, %v1330_v48  ;;  %v3150_v26 = vadd.f32 %v1339_v21, %v1331_v33 }
 0x203   :  { %v1348_v60 = vmul.f32 %v3068_v49, %v1260_v22  ;;  %v1349_v14 = vmul.f32 %v3068_v49, %v1261_v40  ;;  %v1350_v18 = vmul.f32 %v3068_v49, %v1262_v13  ;;  %v1351_v21 = vmul.f32 %v3068_v49, %v1263_v61 }
 0x207   :  { %v3070_v46 = vpop.permute.xlu1 %1457 }
 0x208   :  { %v3163_v25 = vsub.f32 %v3097_v17, %v3070_v46  ;;  %v3167_v3 = vsub.f32 %v3100_v4, %v3070_v46  ;;  %v3170_v22 = vsub.f32 %v1958_v38, %v3070_v46  ;;  %v3176_v40 = vsub.f32 %v3105_v63, %v3070_v46  ;;  %v1534_v63 = vpop.permute.xlu0 %1533 }
 0x20a   :  { %v1485_v43 = vmul.f32 %v3116_v55, %v3167_v3  ;;  %v1487_v28 = vmul.f32 %v3116_v55, %v3176_v40 }
 0x20c   :  { %v3081_v54 = vpop.permute.xlu1 %1353 }
 0x20d   :  { %v1356_v49 = vmul.f32 %v3081_v54, %v3083_v27  ;;  %v1357_v4 = vmul.f32 %v3081_v54, %v3085_v32  ;;  %v1358_v38 = vmul.f32 %v3081_v54, %v3091_v45  ;;  %v1359_v46 = vmul.f32 %v3081_v54, %v3093_v44 }
 0x20e   :  { %v1484_v27 = vmul.f32 %v3116_v55, %v3163_v25  ;;  %v1486_v54 = vmul.f32 %v3116_v55, %v3170_v22 }
 0x20f   :  { %v1360_v44 = vadd.f32 %v1356_v49, %v1348_v60  ;;  %v1363_v17 = vadd.f32 %v1359_v46, %v1351_v21 }
 0x211   :  { %v3112_v52 = vpop.permute.xlu1 %1473 }
 0x212   :  { %v1476_v32 = vsub.f32 %v2883_v8, %v3112_v52  ;;  %v1477_v45 = vsub.f32 %v2888_v56, %v3112_v52  ;;  %v1478_v48 = vsub.f32 %v2893_v7, %v3112_v52  ;;  %v1479_v33 = vsub.f32 %v2898_v23, %v3112_v52  ;;  %v1566_v23 = vpop.permute.xlu0 %1565 }
 0x213   :  { %v1361_v8 = vadd.f32 %v1357_v4, %v1349_v14 }
 0x214   :  { %v1536_v49 = vmul.f32 %v1534_v63, %v1476_v32  ;;  %v1537_v11 = vmul.f32 %v1534_v63, %v1477_v45  ;;  %v1568_v4 = vmul.f32 %v1566_v23, %v1476_v32 }
 0x216   :  { %v3125_v12 = vpop.permute.xlu1 %1489 }
 0x217   :  { %v1492_v52 = vmul.f32 %v3125_v12, %v3123_v58  ;;  %v1493_v55 = vmul.f32 %v3125_v12, %v3129_v31 }
 0x21b   :  { %v1514_v15 = vpop.permute.xlu1 %1513 }
 0x21c   :  { %v1516_v61 = vmul.f32 %v1514_v15, %v3163_v25  ;;  %v1517_v20 = vmul.f32 %v1514_v15, %v3167_v3  ;;  %v1518_v30 = vmul.f32 %v1514_v15, %v3170_v22  ;;  %v1519_v50 = vmul.f32 %v1514_v15, %v3176_v40 }
 0x21d   :  { %v1362_v15 = vadd.f32 %v1358_v38, %v1350_v18  ;;  %v1569_v38 = vmul.f32 %v1566_v23, %v1477_v45 }
 0x21e   :  { %v1528_v13 = vadd.f32 %v1524_v1, %v1516_v61  ;;  %v1529_v56 = vadd.f32 %v1525_v53, %v1517_v20  ;;  %v1530_v39 = vadd.f32 %v1526_v2, %v1518_v30  ;;  %v1531_v57 = vadd.f32 %v1527_v62, %v1519_v50 }
 0x21f   :  { %v1538_v1 = vmul.f32 %v1534_v63, %v1478_v48  ;;  %v1539_v53 = vmul.f32 %v1534_v63, %v1479_v33  ;;  %v1494_v2 = vmul.f32 %v3125_v12, %v3137_v24  ;;  %v1570_v63 = vmul.f32 %v1566_v23, %v1478_v48 }
 0x220   :  { %v1366_v0 = vpop.permute.xlu1 %1365  ;;  %v1571_v30 = vmul.f32 %v1566_v23, %v1479_v33  ;;  %v1496_v50 = vadd.f32 %v1492_v52, %v1484_v27 }
 0x221   :  { %v1368_v9 = vmul.f32 %v1366_v0, %v3073_v6  ;;  %v1369_v60 = vmul.f32 %v1366_v0, %v3076_v37  ;;  %v1370_v7 = vmul.f32 %v1366_v0, %v3079_v5  ;;  %v1495_v6 = vmul.f32 %v3125_v12, %v3139_v29 }
 0x222   :  { %v3219_v37 = vadd.f32 %v1536_v49, %v1528_v13  ;;  %v3221_v5 = vadd.f32 %v1537_v11, %v1529_v56  ;;  %v1371_v62 = vmul.f32 %v1366_v0, %v3088_v41  ;;  %v3224_v18 = vadd.f32 %v1538_v1, %v1530_v39 }
 0x223   :  { %v1372_v14 = vadd.f32 %v1368_v9, %v1360_v44  ;;  %v3226_v21 = vadd.f32 %v1539_v53, %v1531_v57  ;;  %v1373_v61 = vadd.f32 %v1369_v60, %v1361_v8  ;;  %v1374_v20 = vadd.f32 %v1370_v7, %v1362_v15  ;;  %v1414_v15 = vpop.permute.xlu0 %1413 }
 0x224   :  { %v1497_v12 = vadd.f32 %v1493_v55, %v1485_v43  ;;  %v1498_v13 = vadd.f32 %v1494_v2, %v1486_v54  ;;  %v1499_v49 = vadd.f32 %v1495_v6, %v1487_v28  ;;  %v1592_v11 = vand.u32 2147483647, %v3219_v37 }
 0x225   :  { %v1502_v16 = vpop.permute.xlu1 %1501  ;;  %v1593_v41 = vand.u32 2147483647, %v3221_v5  ;;  %v1375_v9 = vadd.f32 %v1371_v62, %v1363_v17  ;;  %v1408_v39 = vand.u32 2147483647, %v1372_v14  ;;  %v1594_v57 = vand.u32 2147483647, %v3224_v18 }
 0x226   :  { %v1595_v0 = vand.u32 2147483647, %v3226_v21  ;;  %v1504_v44 = vmul.f32 %v1502_v16, %v1476_v32  ;;  %v1505_v8 = vmul.f32 %v1502_v16, %v1477_v45  ;;  %v1409_v56 = vand.u32 2147483647, %v1373_v61 }
 0x227   :  { %v1410_v60 = vand.u32 2147483647, %v1374_v20  ;;  %v1506_v45 = vmul.f32 %v1502_v16, %v1478_v48  ;;  %v1507_v55 = vmul.f32 %v1502_v16, %v1479_v33  ;;  %v1411_v1 = vand.u32 2147483647, %v1375_v9 }
 0x228   :  { %v1416_v53 = vsub.f32 %v1408_v39, %v1414_v15  ;;  %v3240_v62 = vadd.f32 %v1505_v8, %v1497_v12 }
 0x229   :  { %v1418_v14 = vsub.f32 %v1410_v60, %v1414_v15  ;;  %v1511_v33 = vadd.f32 %v1507_v55, %v1499_v49  ;;  %v3325_v55 = vand.u32 2147483647, %v3150_v26 }
 0x22a   :  { %v1546_v46 = vpop.permute.xlu1 %1545  ;;  %v1420_v48 = vmax.f32 %v1416_v53, 0.0 }
 0x22b   :  { %v1548_v27 = vmul.f32 %v1546_v46, %v3163_v25  ;;  %v1549_v43 = vmul.f32 %v1546_v46, %v3167_v3  ;;  %v1550_v54 = vmul.f32 %v1546_v46, %v3170_v22  ;;  %v1551_v28 = vmul.f32 %v1546_v46, %v3176_v40 }
 0x22c   :  { %v1508_v22 = vadd.f32 %v1504_v44, %v1496_v50  ;;  %v1417_v40 = vsub.f32 %v1409_v56, %v1414_v15  ;;  %v1510_v46 = vadd.f32 %v1506_v45, %v1498_v13  ;;  %v1422_v12 = vmax.f32 %v1418_v14, 0.0  ;;  %v1614_v44 = vpop.permute.xlu0 %1613 }
 0x22d   :  { %v1577_v56 = vand.u32 2147483647, %v3240_v62  ;;  %v3321_v13 = vand.u32 2147483647, %v3135_v59  ;;  %v3324_v45 = vand.u32 2147483647, %v3148_v47 }
 0x22e   :  { %v1421_v50 = vmax.f32 %v1417_v40, 0.0  ;;  %v1576_v8 = vand.u32 2147483647, %v1508_v22  ;;  %v1438_v14 = vmul.f32 %v1422_v12, %v1422_v12 }
 0x22f   :  { %v1554_v7 = vpop.permute.xlu1 %1553 }
 0x230   :  { %v1556_v17 = vmul.f32 %v1554_v7, %v3123_v58  ;;  %v1557_v23 = vmul.f32 %v1554_v7, %v3129_v31  ;;  %v1558_v52 = vmul.f32 %v1554_v7, %v3137_v24  ;;  %v1559_v32 = vmul.f32 %v1554_v7, %v3139_v29 }
 0x231   :  { %v1419_v29 = vsub.f32 %v1411_v1, %v1414_v15  ;;  %v1436_v15 = vmul.f32 %v1420_v48, %v1420_v48  ;;  %v1437_v53 = vmul.f32 %v1421_v50, %v1421_v50 }
 0x232   :  { %v1560_v25 = vadd.f32 %v1556_v17, %v1548_v27  ;;  %v1561_v2 = vadd.f32 %v1557_v23, %v1549_v43  ;;  %v1562_v3 = vadd.f32 %v1558_v52, %v1550_v54  ;;  %v1563_v6 = vadd.f32 %v1559_v32, %v1551_v28 }
 0x233   :  { %v1423_v49 = vmax.f32 %v1419_v29, 0.0  ;;  %v1578_v54 = vand.u32 2147483647, %v1510_v46  ;;  %v3322_v52 = vand.u32 2147483647, %v3142_v35 }
 0x234   :  { %v1382_v58 = vpop.permute.xlu1 %1381  ;;  %v1572_v61 = vadd.f32 %v1568_v4, %v1560_v25  ;;  %v1573_v31 = vadd.f32 %v1569_v38, %v1561_v2  ;;  %v1574_v20 = vadd.f32 %v1570_v63, %v1562_v3  ;;  %v1575_v24 = vadd.f32 %v1571_v30, %v1563_v6 }
 0x235   :  { %v1384_v16 = vsub.f32 %v1376_v36, %v1382_v58  ;;  %v3319_v4 = vand.u32 2147483647, %v3131_v34  ;;  %v3320_v63 = vand.u32 2147483647, %v3133_v19  ;;  %v1387_v10 = vsub.f32 %v3321_v13, %v1382_v58 }
 0x236   :  { %v1608_v9 = vand.u32 2147483647, %v1572_v61  ;;  %v1609_v39 = vand.u32 2147483647, %v1573_v31  ;;  %v1610_v27 = vand.u32 2147483647, %v1574_v20 }
 0x237   :  { %v1385_v38 = vsub.f32 %v3319_v4, %v1382_v58  ;;  %v1386_v30 = vsub.f32 %v3320_v63, %v1382_v58  ;;  %v1611_v36 = vand.u32 2147483647, %v1575_v24  ;;  %v1388_v60 = vmax.f32 %v1384_v16, 0.0 }
 0x238   :  { %v1616_v28 = vsub.f32 %v1608_v9, %v1614_v44  ;;  %v1617_v7 = vsub.f32 %v1609_v39, %v1614_v44  ;;  %v1618_v17 = vsub.f32 %v1610_v27, %v1614_v44  ;;  %v3323_v32 = vand.u32 2147483647, %v3144_v51 }
 0x239   :  { %v1398_v43 = vpop.permute.xlu1 %1397  ;;  %v1619_v23 = vsub.f32 %v1611_v36, %v1614_v44  ;;  %v1389_v25 = vmax.f32 %v1385_v38, 0.0  ;;  %v1390_v2 = vmax.f32 %v1386_v30, 0.0  ;;  %v1391_v3 = vmax.f32 %v1387_v10, 0.0 }
 0x23a   :  { %v1400_v34 = vsub.f32 %v3322_v52, %v1398_v43  ;;  %v1401_v19 = vsub.f32 %v3323_v32, %v1398_v43  ;;  %v1402_v59 = vsub.f32 %v3324_v45, %v1398_v43  ;;  %v1403_v1 = vsub.f32 %v3325_v55, %v1398_v43 }
 0x23b   :  { %v1424_v35 = vmul.f32 %v1388_v60, %v1388_v60  ;;  %v1620_v58 = vmax.f32 %v1616_v28, 0.0  ;;  %v1579_v51 = vand.u32 2147483647, %v1511_v33  ;;  %v1621_v31 = vmax.f32 %v1617_v7, 0.0 }
 0x23c   :  { %v1404_v6 = vmax.f32 %v1400_v34, 0.0  ;;  %v1405_v22 = vmax.f32 %v1401_v19, 0.0  ;;  %v1406_v62 = vmax.f32 %v1402_v59, 0.0  ;;  %v1407_v40 = vmax.f32 %v1403_v1, 0.0 }
 0x23d   :  { %v1622_v20 = vmax.f32 %v1618_v17, 0.0  ;;  %v1623_v47 = vmax.f32 %v1619_v23, 0.0  ;;  %v1439_v16 = vmul.f32 %v1423_v49, %v1423_v49  ;;  %v1425_v9 = vmul.f32 %v1389_v25, %v1389_v25 }
 0x23e   :  { %v1582_v61 = vpop.permute.xlu1 %1581  ;;  %v1428_v24 = vmul.f32 %v1404_v6, %v1404_v6  ;;  %v1429_v46 = vmul.f32 %v1405_v22, %v1405_v22  ;;  %v1430_v26 = vmul.f32 %v1406_v62, %v1406_v62  ;;  %v1431_v29 = vmul.f32 %v1407_v40, %v1407_v40  ;;  %v3326_v62 = vld [vmem:[#allocation13_spill] sm:$0xff] }
 0x23f   :  { %v1584_v48 = vsub.f32 %v1576_v8, %v1582_v61  ;;  %v1426_v39 = vmul.f32 %v1390_v2, %v1390_v2  ;;  %v1427_v27 = vmul.f32 %v1391_v3, %v1391_v3  ;;  %v1585_v50 = vsub.f32 %v1577_v56, %v1582_v61 }
 0x240   :  { %v1586_v44 = vsub.f32 %v1578_v54, %v1582_v61  ;;  %v1587_v4 = vsub.f32 %v1579_v51, %v1582_v61  ;;  %v1432_v12 = vadd.f32 %v1428_v24, %v1424_v35  ;;  %v1636_v38 = vmul.f32 %v1620_v58, %v1620_v58  ;;  %v3328_v35 = vld [vmem:[#allocation15_spill] sm:$0xff] }
 0x241   :  { %v1637_v63 = vmul.f32 %v1621_v31, %v1621_v31  ;;  %v1638_v30 = vmul.f32 %v1622_v20, %v1622_v20  ;;  %v1639_v33 = vmul.f32 %v1623_v47, %v1623_v47  ;;  %v1588_v10 = vmax.f32 %v1584_v48, 0.0 }
 0x242   :  { %v1433_v36 = vadd.f32 %v1429_v46, %v1425_v9  ;;  %v1434_v60 = vadd.f32 %v1430_v26, %v1426_v39  ;;  %v1435_v43 = vadd.f32 %v1431_v29, %v1427_v27  ;;  %v1589_v28 = vmax.f32 %v1585_v50, 0.0 }
 0x243   :  { %v1598_v13 = vpop.permute.xlu1 %1597  ;;  %v1590_v7 = vmax.f32 %v1586_v44, 0.0  ;;  %v1591_v17 = vmax.f32 %v1587_v4, 0.0  ;;  %v1440_v23 = vadd.f32 %v1436_v15, %v1432_v12  ;;  %v1624_v45 = vmul.f32 %v1588_v10, %v1588_v10 }
 0x244   :  { %v1600_v8 = vsub.f32 %v1592_v11, %v1598_v13  ;;  %v1601_v49 = vsub.f32 %v1593_v41, %v1598_v13  ;;  %v1602_v56 = vsub.f32 %v1594_v57, %v1598_v13  ;;  %v1603_v54 = vsub.f32 %v1595_v0, %v1598_v13 }
 0x245   :  { %v1441_v11 = vadd.f32 %v1437_v53, %v1433_v36  ;;  %v1442_v59 = vadd.f32 %v1438_v14, %v1434_v60  ;;  %v1443_v5 = vadd.f32 %v1439_v16, %v1435_v43  ;;  %v1625_v1 = vmul.f32 %v1589_v28, %v1589_v28  ;;  %v3327_v53 = vld [vmem:[#allocation14_spill] sm:$0xff] }
 0x246   :  { %v1604_v52 = vmax.f32 %v1600_v8, 0.0  ;;  %v1605_v34 = vmax.f32 %v1601_v49, 0.0  ;;  %v1606_v32 = vmax.f32 %v1602_v56, 0.0  ;;  %v1607_v19 = vmax.f32 %v1603_v54, 0.0 }
 0x247   :  { %v1626_v21 = vmul.f32 %v1590_v7, %v1590_v7  ;;  %v1627_v0 = vmul.f32 %v1591_v17, %v1591_v17 }
 0x248   :  { %v1446_v37 = vpop.permute.xlu1 %1445  ;;  %v1628_v41 = vmul.f32 %v1604_v52, %v1604_v52  ;;  %v1629_v55 = vmul.f32 %v1605_v34, %v1605_v34  ;;  %v1630_v18 = vmul.f32 %v1606_v32, %v1606_v32  ;;  %v1631_v57 = vmul.f32 %v1607_v19, %v1607_v19 }
 0x249   :  { %vm1447_vm7 = vcmp.eq.s32.totalorder %v1446_v37, 1 }
 0x24a   :  { %v1448_v25 = vsel %vm1447_vm7, %v1440_v23, 1e+08  ;;  %v1449_v2 = vsel %vm1447_vm7, %v1441_v11, 1e+08  ;;  %v1450_v15 = vsel %vm1447_vm7, %v1442_v59, 1e+08  ;;  %v1632_v3 = vadd.f32 %v1628_v41, %v1624_v45 }
 0x24b   :  { %v1451_v6 = vsel %vm1447_vm7, %v1443_v5, 1e+08  ;;  %v1452_v22 = vmin.f32 %v3051_v42, %v1448_v25  ;;  %v1453_v40 = vmin.f32 %v3326_v62, %v1449_v2  ;;  %v1454_v14 = vmin.f32 %v3327_v53, %v1450_v15 }
 0x24c   :  { %v1455_v58 = vmin.f32 %v3328_v35, %v1451_v6  ;;  %v1633_v51 = vadd.f32 %v1629_v55, %v1625_v1  ;;  %v1634_v31 = vadd.f32 %v1630_v18, %v1626_v21  ;;  %v1635_v20 = vadd.f32 %v1631_v57, %v1627_v0 }
 0x24d   :  { %v1646_v61 = vpop.permute.xlu1 %1645  ;;  %v1640_v47 = vadd.f32 %v1636_v38, %v1632_v3 }
 0x24e   :  { %vm1647_vm8 = vcmp.eq.s32.totalorder %v1646_v61, 1  ;;  %v1641_v24 = vadd.f32 %v1637_v63, %v1633_v51  ;;  %v1642_v46 = vadd.f32 %v1638_v30, %v1634_v31  ;;  %v1643_v26 = vadd.f32 %v1639_v33, %v1635_v20 }
 0x24f   :  { %v1648_v29 = vsel %vm1647_vm8, %v1640_v47, 1e+08 }
 0x250   :  { %v1649_v48 = vsel %vm1647_vm8, %v1641_v24, 1e+08  ;;  %v1650_v42 = vsel %vm1647_vm8, %v1642_v46, 1e+08  ;;  %v1651_v16 = vsel %vm1647_vm8, %v1643_v26, 1e+08  ;;  %v1652_v9 = vmin.f32 %v1452_v22, %v1648_v29 }
 0x251   :  { %v1653_v39 = vmin.f32 %v1453_v40, %v1649_v48  ;;  %v1654_v27 = vmin.f32 %v1454_v14, %v1650_v42  ;;  %v1655_v50 = vmin.f32 %v1455_v58, %v1651_v16 }
 0x252   :  { %1656 = vst [vmem:[#allocation7] sm:$0xff] %v1652_v9 }
 0x253   :  { %1657 = vst [vmem:[#allocation7 + $0x8] sm:$0xff] %v1653_v39  ;;  %1658 = vst [vmem:[#allocation7 + $0x10] sm:$0xff] %v1654_v27 }
 0x254   :  { %1659 = vst [vmem:[#allocation7 + $0x18] sm:$0xff] %v1655_v50 }
 0x255   :  { %2015 = shalt.err (!%p2012_p6)
}
 0x256   :  { %s2016_s10 = scalar_lea.hbm %s3285_s2, 512 }
 0x257   :  { %p2017_p7 = scmp.ne.s32.totalorder %s3285_s2, %s2016_s10  ;;  %p2020_p8 = scmp.lt.u32.totalorder %s2016_s10, %s3285_s2 }
 0x259   :  { %p2022_p9 = pnand %p2020_p8, %p2017_p7 }
 0x25b   :  { %2025 = shalt.err (!%p2022_p9)
}
 0x25c   :  { %1669 = dma.vmem_to_hbm [thread:$0]  %s1667_s6, 512, %s3285_s2, [#allocation4]  }
 0x25d   :  { %2030 = dma.done.wait [#allocation4], 512  }
 0x25e   :  { %2031 = vsyncadd [#allocation4], 4294966784 }
 0x25f   :  { %1673 = vsyncpa [#allocation3], 1 }
 0x260   :  { %1674 = vsyncpa [#allocation6], 1 }
 0x261   :  { %1675 = vsyncpa [#allocation4], 1 }

</bundles_post_ra>
